<compile_context>
chip_gen: v7x
topology: tpu7x:2x2x1
jax: 0.10.0
libtpu: 0.0.40
codegen_flags: <defaults>
</compile_context>

<pallas_src>
import functools

import jax
import jax.numpy as jnp
from jax import lax
from jax.experimental import pallas as pl
from jax.experimental.pallas import tpu as pltpu


def _round_up(x, m):
    return (x + m - 1) // m * m


# ----------------------------------------------------------------------------
# Fused kernel: GRU recurrence over time chunks + BatchNorm epilogue.
# ----------------------------------------------------------------------------
def _gru_bn_kernel(x_ref, wih_ref, whh_ref, bgi_ref, bgh_ref, gamma_ref,
                   beta_ref, out_ref, h_ref, *, T):
    # x_ref:   (M, Tb, E) f32  streamed chunk of inputs (native layout)
    # wih_ref: (E, G)          packed W_ih^T   (G = round_up(3E, 128))
    # whh_ref: (E, G)          packed W_hh^T
    # bgi_ref: (1, G) f32      b_ih (+ b_hh for r,z) folded into the input gates
    # bgh_ref: (1, G) f32      only b_hn (must stay inside r * (...))
    # gamma/beta: (1, E) f32   BatchNorm affine params
    # out_ref: (M, E)          final normalized hidden state (written on last chunk)
    # h_ref:   (M, E) f32      hidden-state carry (scratch, persists across grid)
    M, Tb, E = x_ref.shape
    G = wih_ref.shape[1]
    c = pl.program_id(0)

    @pl.when(c == 0)
    def _():
        h_ref[...] = jnp.zeros_like(h_ref)

    wih = wih_ref[...]
    whh = whh_ref[...]
    bgi = bgi_ref[...]
    bgh = bgh_ref[...]

    # Input-side gates for the whole chunk with ONE fat matmul (fills the MXU
    # M dimension; gi has no h dependence so it is hoisted off the serial path).
    x2d = x_ref[...].reshape(M * Tb, E).astype(wih.dtype)
    gi_all = jnp.dot(x2d, wih, preferred_element_type=jnp.float32) + bgi
    gi_all = gi_all.reshape(M, Tb, G)

    def _step(i):
        h = h_ref[...]
        gi = gi_all[:, i, :]
        gh = jnp.dot(h.astype(whh.dtype), whh,
                     preferred_element_type=jnp.float32) + bgh
        # Packed gate slices: r @ [0,E), z @ [E,2E), n @ [2E,3E).
        r = jax.nn.sigmoid(gi[:, 0:E] + gh[:, 0:E])
        z = jax.nn.sigmoid(gi[:, E:2 * E] + gh[:, E:2 * E])
        n = jnp.tanh(gi[:, 2 * E:3 * E] + r * gh[:, 2 * E:3 * E])
        h_ref[...] = (1.0 - z) * n + z * h

    # Statically-unrolled serial loop over this chunk's time steps.  Only the
    # tail chunk can contain padded steps (when T % Tb != 0); only those need
    # a runtime guard — all other steps are fully static.
    rem = T % Tb
    t0 = c * Tb
    for i in range(Tb):
        if rem == 0 or i < rem:
            _step(i)
        else:
            pl.when(t0 + i < T)(functools.partial(_step, i))

    @pl.when(c == pl.num_programs(0) - 1)
    def _():
        # BatchNorm1d(E), training mode: stats over all B*N rows, biased var.
        h_last = h_ref[...]
        mean = jnp.mean(h_last, axis=0, keepdims=True)
        var = jnp.mean((h_last - mean) ** 2, axis=0, keepdims=True)
        inv = lax.rsqrt(var + 1e-5)
        out_ref[...] = ((h_last - mean) * inv * gamma_ref[...]
                        + beta_ref[...]).astype(out_ref.dtype)


# ----------------------------------------------------------------------------
# Parameter packing: gates packed side-by-side, padded only up to G lanes.
# ----------------------------------------------------------------------------
def _pack_gate_cols(mats, E, G, dtype):
    out = jnp.zeros((E, G), dtype)
    for g, m in enumerate(mats):
        out = out.at[:, g * E:(g + 1) * E].set(m.astype(dtype))
    return out


def _pack_gate_bias(vecs, E, G):
    out = jnp.zeros((1, G), jnp.float32)
    for g, v in enumerate(vecs):
        out = out.at[:, g * E:(g + 1) * E].set(v[None, :].astype(jnp.float32))
    return out


@functools.partial(jax.jit,
                   static_argnames=("num_nodes", "mxu_dtype", "time_block"))
def temp_layer_forward(embed_feat, params, *, num_nodes,
                       mxu_dtype=jnp.float32, time_block=8):
    """JAX/Pallas equivalent of TempLayer.forward.

    embed_feat: (B, N, T, E) with N == num_nodes.  Returns (B, N, E) float32.
    mxu_dtype:  dtype of MXU operands (x / W_ih / W_hh / h); accumulation,
                gate math and the h carry stay f32.  Use jnp.bfloat16 on
                v6e/v7x for throughput; jnp.float32 for exact numerics.
    """
    B, N, T, E = embed_feat.shape
    M = B * N
    G = _round_up(3 * E, 128)          # packed gates: [0,E) r, [E,2E) z, [2E,3E) n
    Tb = T if T <= time_block else max(8, (time_block // 8) * 8)
    num_chunks = (T + Tb - 1) // Tb

    w_ih, w_hh = params["w_ih"], params["w_hh"]      # (3E, E), gate order r,z,n
    b_ih, b_hh = params["b_ih"], params["b_hh"]      # (3E,)

    wih_p = _pack_gate_cols([w_ih[g * E:(g + 1) * E, :].T for g in range(3)],
                            E, G, mxu_dtype)
    whh_p = _pack_gate_cols([w_hh[g * E:(g + 1) * E, :].T for g in range(3)],
                            E, G, mxu_dtype)
    # r/z: fold b_ih + b_hh into gi.  n: fold b_in into gi, keep b_hn on gh
    # (it must be multiplied by r).
    b_gi = _pack_gate_bias([b_ih[:E] + b_hh[:E],
                            b_ih[E:2 * E] + b_hh[E:2 * E],
                            b_ih[2 * E:]], E, G)
    b_gh = _pack_gate_bias([jnp.zeros((E,), jnp.float32),
                            jnp.zeros((E,), jnp.float32),
                            b_hh[2 * E:]], E, G)

    gamma = params["bn_gamma"][None, :].astype(jnp.float32)
    beta = params["bn_beta"][None, :].astype(jnp.float32)

    # Free, contiguous reshape (no HBM transpose): (B, N, T, E) -> (M, T, E).
    x3 = embed_feat.reshape(M, T, E).astype(jnp.float32)

    # VMEM budget: double-buffered x chunk + resident weights/biases/out/h,
    # with slack; explicit so the request also fits v7x's 64 MiB VMEM.
    w_item = jnp.dtype(mxu_dtype).itemsize
    x_block_bytes = M * Tb * E * 4
    resident_bytes = 2 * E * G * w_item + 2 * G * 4 + 2 * E * 4 + 2 * M * E * 4
    vmem_limit = int(min(100 * 2**20,
                         max(8 * 2**20,
                             4 * x_block_bytes + 2 * resident_bytes + 2 * 2**20)))

    kernel = functools.partial(_gru_bn_kernel, T=T)
    out = pl.pallas_call(
        kernel,
        out_shape=jax.ShapeDtypeStruct((M, E), jnp.float32),
        grid=(num_chunks,),
        in_specs=[
            pl.BlockSpec((M, Tb, E), lambda c: (0, c, 0)),   # streamed x chunk
            pl.BlockSpec((E, G), lambda c: (0, 0)),          # resident W_ih^T
            pl.BlockSpec((E, G), lambda c: (0, 0)),          # resident W_hh^T
            pl.BlockSpec((1, G), lambda c: (0, 0)),          # resident b_gi
            pl.BlockSpec((1, G), lambda c: (0, 0)),          # resident b_gh
            pl.BlockSpec((1, E), lambda c: (0, 0)),          # resident gamma
            pl.BlockSpec((1, E), lambda c: (0, 0)),          # resident beta
        ],
        out_specs=pl.BlockSpec((M, E), lambda c: (0, 0)),
        scratch_shapes=[pltpu.VMEM((M, E), jnp.float32)],
        compiler_params=pltpu.CompilerParams(
            dimension_semantics=("arbitrary",),   # serial recurrence over time
            vmem_limit_bytes=vmem_limit),
    )(x3, wih_p, whh_p, b_gi, b_gh, gamma, beta)
    return out.reshape(B, num_nodes, E)


# ----------------------------------------------------------------------------
# Pure-JAX reference + deterministic init (for in-script validation)
# ----------------------------------------------------------------------------
def _reference_forward(embed_feat, params, num_nodes):
    B, N, T, E = embed_feat.shape
    x = jnp.transpose(embed_feat, (2, 0, 1, 3)).reshape(T, B * N, E)
    w_ih_t, w_hh_t = params["w_ih"].T, params["w_hh"].T
    b_ih, b_hh = params["b_ih"], params["b_hh"]

    def step(h, x_t):
        gi = x_t @ w_ih_t + b_ih
        gh = h @ w_hh_t + b_hh
        r = jax.nn.sigmoid(gi[:, :E] + gh[:, :E])
        z = jax.nn.sigmoid(gi[:, E:2 * E] + gh[:, E:2 * E])
        n = jnp.tanh(gi[:, 2 * E:] + r * gh[:, 2 * E:])
        return (1.0 - z) * n + z * h, None

    h0 = jnp.zeros((B * N, E), jnp.float32)
    h_last, _ = lax.scan(step, h0, x)
    mean = jnp.mean(h_last, axis=0, keepdims=True)
    var = jnp.mean((h_last - mean) ** 2, axis=0, keepdims=True)
    o = (h_last - mean) / jnp.sqrt(var + 1e-5)
    o = o * params["bn_gamma"] + params["bn_beta"]
    return o.reshape(B, num_nodes, E)


def init_params(key, embed_dim):
    E = embed_dim
    k1, k2, k3, k4 = jax.random.split(key, 4)
    bound = 1.0 / jnp.sqrt(jnp.float32(E))
    u = lambda k, shape: jax.random.uniform(k, shape, jnp.float32, -bound, bound)
    return {
        "w_ih": u(k1, (3 * E, E)),   # gate order [r, z, n]
        "w_hh": u(k2, (3 * E, E)),
        "b_ih": u(k3, (3 * E,)),
        "b_hh": u(k4, (3 * E,)),
        "bn_gamma": jnp.ones((E,), jnp.float32),
        "bn_beta": jnp.zeros((E,), jnp.float32),
    }


if __name__ == "__main__":
    B, N, T, E = 2, 4, 8, 32          # batch, num_nodes, seq_len, embed_dim
    key = jax.random.PRNGKey(0)
    k_x, k_p = jax.random.split(key)
    embed_feat = jax.random.normal(k_x, (B, N, T, E), jnp.float32)
    params = init_params(k_p, E)

    # f32 MXU operands: exact-numerics validation against the pure-JAX reference.
    out = temp_layer_forward(embed_feat, params, num_nodes=N)
    out = jax.block_until_ready(out)
    assert out.shape == (B, N, E), out.shape

    ref = _reference_forward(embed_feat, params, N)
    max_err = float(jnp.max(jnp.abs(out - ref)))
    assert jnp.allclose(out, ref, atol=1e-3, rtol=1e-3), max_err

    # bf16 MXU-operand path (v6e/v7x throughput mode): smoke test only — BN
    # normalization can amplify bf16 rounding, so we check shape/finiteness
    # here and rely on the f32 run above for the correctness gate.
    out_bf16 = jax.block_until_ready(
        temp_layer_forward(embed_feat, params, num_nodes=N,
                           mxu_dtype=jnp.bfloat16))
    assert out_bf16.shape == (B, N, E), out_bf16.shape
    assert bool(jnp.all(jnp.isfinite(out_bf16)))

    print("KERNEL_OK")
</pallas_src>

<mosaic_0001>
module attributes {stable_mosaic.version = 11 : i64} {
  func.func @_gru_bn_kernel(%arg0: i32, %arg1: memref<8x8x32xf32, #tpu.memory_space<vmem>>, %arg2: memref<32x128xf32, #tpu.memory_space<vmem>>, %arg3: memref<32x128xf32, #tpu.memory_space<vmem>>, %arg4: memref<1x128xf32, #tpu.memory_space<vmem>>, %arg5: memref<1x128xf32, #tpu.memory_space<vmem>>, %arg6: memref<1x32xf32, #tpu.memory_space<vmem>>, %arg7: memref<1x32xf32, #tpu.memory_space<vmem>>, %arg8: memref<8x32xf32, #tpu.memory_space<vmem>>, %arg9: memref<8x32xf32, #tpu.memory_space<vmem>>) attributes {dimension_semantics = [#tpu.dimension_semantics<arbitrary>], iteration_bounds = array<i64: 1>, scalar_prefetch = 0 : i64, scratch_operands = 1 : i64, tpu.core_type = #tpu.core_type<tc>, window_params = [{transform_indices = @transform_0, window_bounds = array<i64: 8, 8, 32>}, {pipeline_mode = #tpu.pipeline_mode<synchronous>, transform_indices = @transform_1, window_bounds = array<i64: 32, 128>}, {pipeline_mode = #tpu.pipeline_mode<synchronous>, transform_indices = @transform_2, window_bounds = array<i64: 32, 128>}, {pipeline_mode = #tpu.pipeline_mode<synchronous>, transform_indices = @transform_3, window_bounds = array<i64: 1, 128>}, {pipeline_mode = #tpu.pipeline_mode<synchronous>, transform_indices = @transform_4, window_bounds = array<i64: 1, 128>}, {pipeline_mode = #tpu.pipeline_mode<synchronous>, transform_indices = @transform_5, window_bounds = array<i64: 1, 32>}, {pipeline_mode = #tpu.pipeline_mode<synchronous>, transform_indices = @transform_6, window_bounds = array<i64: 1, 32>}, {pipeline_mode = #tpu.pipeline_mode<synchronous>, transform_indices = @transform_7, window_bounds = array<i64: 8, 32>}]} {
    %c0_i32 = arith.constant 0 : i32
    %0 = arith.cmpi eq, %arg0, %c0_i32 : i32
    %1 = arith.extui %0 : i1 to i32
    %c0_i32_0 = arith.constant 0 : i32
    %2 = arith.cmpi ne, %1, %c0_i32_0 : i32
    scf.if %2 {
      %cst_77 = arith.constant 0.000000e+00 : f32
      %280 = vector.broadcast %cst_77 : f32 to vector<8x32xf32>
      %c0_78 = arith.constant 0 : index
      %c0_79 = arith.constant 0 : index
      %281 = vector.load %arg9[%c0_78, %c0_79] : memref<8x32xf32, #tpu.memory_space<vmem>>, vector<8x32xf32>
      tpu.vector_store %arg9[%c0_78, %c0_79], %280 {strides = array<i32>} : memref<8x32xf32, #tpu.memory_space<vmem>>, vector<8x32xf32>,
    } else {
    }
    %c0 = arith.constant 0 : index
    %c0_1 = arith.constant 0 : index
    %3 = vector.load %arg2[%c0, %c0_1] : memref<32x128xf32, #tpu.memory_space<vmem>>, vector<32x128xf32>
    %c0_2 = arith.constant 0 : index
    %c0_3 = arith.constant 0 : index
    %4 = vector.load %arg3[%c0_2, %c0_3] : memref<32x128xf32, #tpu.memory_space<vmem>>, vector<32x128xf32>
    %c0_4 = arith.constant 0 : index
    %c0_5 = arith.constant 0 : index
    %5 = vector.load %arg4[%c0_4, %c0_5] : memref<1x128xf32, #tpu.memory_space<vmem>>, vector<1x128xf32>
    %c0_6 = arith.constant 0 : index
    %c0_7 = arith.constant 0 : index
    %6 = vector.load %arg5[%c0_6, %c0_7] : memref<1x128xf32, #tpu.memory_space<vmem>>, vector<1x128xf32>
    %c0_8 = arith.constant 0 : index
    %c0_9 = arith.constant 0 : index
    %c0_10 = arith.constant 0 : index
    %7 = vector.load %arg1[%c0_8, %c0_9, %c0_10] : memref<8x8x32xf32, #tpu.memory_space<vmem>>, vector<8x8x32xf32>
    %8 = vector.shape_cast %7 : vector<8x8x32xf32> to vector<64x32xf32>
    %cst = arith.constant dense<0.000000e+00> : vector<64x128xf32>
    %9 = tpu.matmul %8, %3, %cst {dimension_numbers = #tpu.dot_dimension_numbers<[1], [0], [0], [1], [0, 0, 1, 1], [], []>} : vector<64x32xf32>, vector<32x128xf32>, vector<64x128xf32> -> vector<64x128xf32>
    %10 = vector.broadcast %5 : vector<1x128xf32> to vector<64x128xf32>
    %11 = arith.addf %9, %10 : vector<64x128xf32>
    %12 = vector.shape_cast %11 : vector<64x128xf32> to vector<8x8x128xf32>
    %c0_11 = arith.constant 0 : index
    %c0_12 = arith.constant 0 : index
    %13 = vector.load %arg9[%c0_11, %c0_12] : memref<8x32xf32, #tpu.memory_space<vmem>>, vector<8x32xf32>
    %14 = vector.extract_strided_slice %12 {offsets = [0, 0, 0], sizes = [8, 1, 128], strides = [1, 1, 1]} : vector<8x8x128xf32> to vector<8x1x128xf32>
    %15 = vector.shape_cast %14 : vector<8x1x128xf32> to vector<8x128xf32>
    %cst_13 = arith.constant dense<0.000000e+00> : vector<8x128xf32>
    %16 = tpu.matmul %13, %4, %cst_13 {dimension_numbers = #tpu.dot_dimension_numbers<[1], [0], [0], [1], [0, 0, 1, 1], [], []>} : vector<8x32xf32>, vector<32x128xf32>, vector<8x128xf32> -> vector<8x128xf32>
    %17 = vector.broadcast %6 : vector<1x128xf32> to vector<8x128xf32>
    %18 = arith.addf %16, %17 : vector<8x128xf32>
    %19 = vector.extract_strided_slice %15 {offsets = [0, 0], sizes = [8, 32], strides = [1, 1]} : vector<8x128xf32> to vector<8x32xf32>
    %20 = vector.extract_strided_slice %18 {offsets = [0, 0], sizes = [8, 32], strides = [1, 1]} : vector<8x128xf32> to vector<8x32xf32>
    %21 = arith.addf %19, %20 : vector<8x32xf32>
    %22 = arith.negf %21 : vector<8x32xf32>
    %23 = math.exp %22 : vector<8x32xf32>
    %cst_14 = arith.constant 1.000000e+00 : f32
    %24 = vector.broadcast %cst_14 : f32 to vector<8x32xf32>
    %25 = arith.addf %24, %23 : vector<8x32xf32>
    %26 = arith.divf %24, %25 : vector<8x32xf32>
    %27 = vector.extract_strided_slice %15 {offsets = [0, 32], sizes = [8, 32], strides = [1, 1]} : vector<8x128xf32> to vector<8x32xf32>
    %28 = vector.extract_strided_slice %18 {offsets = [0, 32], sizes = [8, 32], strides = [1, 1]} : vector<8x128xf32> to vector<8x32xf32>
    %29 = arith.addf %27, %28 : vector<8x32xf32>
    %30 = arith.negf %29 : vector<8x32xf32>
    %31 = math.exp %30 : vector<8x32xf32>
    %cst_15 = arith.constant 1.000000e+00 : f32
    %32 = vector.broadcast %cst_15 : f32 to vector<8x32xf32>
    %33 = arith.addf %32, %31 : vector<8x32xf32>
    %34 = arith.divf %32, %33 : vector<8x32xf32>
    %35 = vector.extract_strided_slice %15 {offsets = [0, 64], sizes = [8, 32], strides = [1, 1]} : vector<8x128xf32> to vector<8x32xf32>
    %36 = vector.extract_strided_slice %18 {offsets = [0, 64], sizes = [8, 32], strides = [1, 1]} : vector<8x128xf32> to vector<8x32xf32>
    %37 = arith.mulf %26, %36 : vector<8x32xf32>
    %38 = arith.addf %35, %37 : vector<8x32xf32>
    %39 = math.tanh %38 : vector<8x32xf32>
    %cst_16 = arith.constant 1.000000e+00 : f32
    %40 = vector.broadcast %cst_16 : f32 to vector<8x32xf32>
    %41 = arith.subf %40, %34 : vector<8x32xf32>
    %42 = arith.mulf %41, %39 : vector<8x32xf32>
    %43 = arith.mulf %34, %13 : vector<8x32xf32>
    %44 = arith.addf %42, %43 : vector<8x32xf32>
    %c0_17 = arith.constant 0 : index
    %c0_18 = arith.constant 0 : index
    %45 = vector.load %arg9[%c0_17, %c0_18] : memref<8x32xf32, #tpu.memory_space<vmem>>, vector<8x32xf32>
    tpu.vector_store %arg9[%c0_17, %c0_18], %44 {strides = array<i32>} : memref<8x32xf32, #tpu.memory_space<vmem>>, vector<8x32xf32>,
    %c0_19 = arith.constant 0 : index
    %c0_20 = arith.constant 0 : index
    %46 = vector.load %arg9[%c0_19, %c0_20] : memref<8x32xf32, #tpu.memory_space<vmem>>, vector<8x32xf32>
    %47 = vector.extract_strided_slice %12 {offsets = [0, 1, 0], sizes = [8, 1, 128], strides = [1, 1, 1]} : vector<8x8x128xf32> to vector<8x1x128xf32>
    %48 = vector.shape_cast %47 : vector<8x1x128xf32> to vector<8x128xf32>
    %cst_21 = arith.constant dense<0.000000e+00> : vector<8x128xf32>
    %49 = tpu.matmul %46, %4, %cst_21 {dimension_numbers = #tpu.dot_dimension_numbers<[1], [0], [0], [1], [0, 0, 1, 1], [], []>} : vector<8x32xf32>, vector<32x128xf32>, vector<8x128xf32> -> vector<8x128xf32>
    %50 = vector.broadcast %6 : vector<1x128xf32> to vector<8x128xf32>
    %51 = arith.addf %49, %50 : vector<8x128xf32>
    %52 = vector.extract_strided_slice %48 {offsets = [0, 0], sizes = [8, 32], strides = [1, 1]} : vector<8x128xf32> to vector<8x32xf32>
    %53 = vector.extract_strided_slice %51 {offsets = [0, 0], sizes = [8, 32], strides = [1, 1]} : vector<8x128xf32> to vector<8x32xf32>
    %54 = arith.addf %52, %53 : vector<8x32xf32>
    %55 = arith.negf %54 : vector<8x32xf32>
    %56 = math.exp %55 : vector<8x32xf32>
    %cst_22 = arith.constant 1.000000e+00 : f32
    %57 = vector.broadcast %cst_22 : f32 to vector<8x32xf32>
    %58 = arith.addf %57, %56 : vector<8x32xf32>
    %59 = arith.divf %57, %58 : vector<8x32xf32>
    %60 = vector.extract_strided_slice %48 {offsets = [0, 32], sizes = [8, 32], strides = [1, 1]} : vector<8x128xf32> to vector<8x32xf32>
    %61 = vector.extract_strided_slice %51 {offsets = [0, 32], sizes = [8, 32], strides = [1, 1]} : vector<8x128xf32> to vector<8x32xf32>
    %62 = arith.addf %60, %61 : vector<8x32xf32>
    %63 = arith.negf %62 : vector<8x32xf32>
    %64 = math.exp %63 : vector<8x32xf32>
    %cst_23 = arith.constant 1.000000e+00 : f32
    %65 = vector.broadcast %cst_23 : f32 to vector<8x32xf32>
    %66 = arith.addf %65, %64 : vector<8x32xf32>
    %67 = arith.divf %65, %66 : vector<8x32xf32>
    %68 = vector.extract_strided_slice %48 {offsets = [0, 64], sizes = [8, 32], strides = [1, 1]} : vector<8x128xf32> to vector<8x32xf32>
    %69 = vector.extract_strided_slice %51 {offsets = [0, 64], sizes = [8, 32], strides = [1, 1]} : vector<8x128xf32> to vector<8x32xf32>
    %70 = arith.mulf %59, %69 : vector<8x32xf32>
    %71 = arith.addf %68, %70 : vector<8x32xf32>
    %72 = math.tanh %71 : vector<8x32xf32>
    %cst_24 = arith.constant 1.000000e+00 : f32
    %73 = vector.broadcast %cst_24 : f32 to vector<8x32xf32>
    %74 = arith.subf %73, %67 : vector<8x32xf32>
    %75 = arith.mulf %74, %72 : vector<8x32xf32>
    %76 = arith.mulf %67, %46 : vector<8x32xf32>
    %77 = arith.addf %75, %76 : vector<8x32xf32>
    %c0_25 = arith.constant 0 : index
    %c0_26 = arith.constant 0 : index
    %78 = vector.load %arg9[%c0_25, %c0_26] : memref<8x32xf32, #tpu.memory_space<vmem>>, vector<8x32xf32>
    tpu.vector_store %arg9[%c0_25, %c0_26], %77 {strides = array<i32>} : memref<8x32xf32, #tpu.memory_space<vmem>>, vector<8x32xf32>,
    %c0_27 = arith.constant 0 : index
    %c0_28 = arith.constant 0 : index
    %79 = vector.load %arg9[%c0_27, %c0_28] : memref<8x32xf32, #tpu.memory_space<vmem>>, vector<8x32xf32>
    %80 = vector.extract_strided_slice %12 {offsets = [0, 2, 0], sizes = [8, 1, 128], strides = [1, 1, 1]} : vector<8x8x128xf32> to vector<8x1x128xf32>
    %81 = vector.shape_cast %80 : vector<8x1x128xf32> to vector<8x128xf32>
    %cst_29 = arith.constant dense<0.000000e+00> : vector<8x128xf32>
    %82 = tpu.matmul %79, %4, %cst_29 {dimension_numbers = #tpu.dot_dimension_numbers<[1], [0], [0], [1], [0, 0, 1, 1], [], []>} : vector<8x32xf32>, vector<32x128xf32>, vector<8x128xf32> -> vector<8x128xf32>
    %83 = vector.broadcast %6 : vector<1x128xf32> to vector<8x128xf32>
    %84 = arith.addf %82, %83 : vector<8x128xf32>
    %85 = vector.extract_strided_slice %81 {offsets = [0, 0], sizes = [8, 32], strides = [1, 1]} : vector<8x128xf32> to vector<8x32xf32>
    %86 = vector.extract_strided_slice %84 {offsets = [0, 0], sizes = [8, 32], strides = [1, 1]} : vector<8x128xf32> to vector<8x32xf32>
    %87 = arith.addf %85, %86 : vector<8x32xf32>
    %88 = arith.negf %87 : vector<8x32xf32>
    %89 = math.exp %88 : vector<8x32xf32>
    %cst_30 = arith.constant 1.000000e+00 : f32
    %90 = vector.broadcast %cst_30 : f32 to vector<8x32xf32>
    %91 = arith.addf %90, %89 : vector<8x32xf32>
    %92 = arith.divf %90, %91 : vector<8x32xf32>
    %93 = vector.extract_strided_slice %81 {offsets = [0, 32], sizes = [8, 32], strides = [1, 1]} : vector<8x128xf32> to vector<8x32xf32>
    %94 = vector.extract_strided_slice %84 {offsets = [0, 32], sizes = [8, 32], strides = [1, 1]} : vector<8x128xf32> to vector<8x32xf32>
    %95 = arith.addf %93, %94 : vector<8x32xf32>
    %96 = arith.negf %95 : vector<8x32xf32>
    %97 = math.exp %96 : vector<8x32xf32>
    %cst_31 = arith.constant 1.000000e+00 : f32
    %98 = vector.broadcast %cst_31 : f32 to vector<8x32xf32>
    %99 = arith.addf %98, %97 : vector<8x32xf32>
    %100 = arith.divf %98, %99 : vector<8x32xf32>
    %101 = vector.extract_strided_slice %81 {offsets = [0, 64], sizes = [8, 32], strides = [1, 1]} : vector<8x128xf32> to vector<8x32xf32>
    %102 = vector.extract_strided_slice %84 {offsets = [0, 64], sizes = [8, 32], strides = [1, 1]} : vector<8x128xf32> to vector<8x32xf32>
    %103 = arith.mulf %92, %102 : vector<8x32xf32>
    %104 = arith.addf %101, %103 : vector<8x32xf32>
    %105 = math.tanh %104 : vector<8x32xf32>
    %cst_32 = arith.constant 1.000000e+00 : f32
    %106 = vector.broadcast %cst_32 : f32 to vector<8x32xf32>
    %107 = arith.subf %106, %100 : vector<8x32xf32>
    %108 = arith.mulf %107, %105 : vector<8x32xf32>
    %109 = arith.mulf %100, %79 : vector<8x32xf32>
    %110 = arith.addf %108, %109 : vector<8x32xf32>
    %c0_33 = arith.constant 0 : index
    %c0_34 = arith.constant 0 : index
    %111 = vector.load %arg9[%c0_33, %c0_34] : memref<8x32xf32, #tpu.memory_space<vmem>>, vector<8x32xf32>
    tpu.vector_store %arg9[%c0_33, %c0_34], %110 {strides = array<i32>} : memref<8x32xf32, #tpu.memory_space<vmem>>, vector<8x32xf32>,
    %c0_35 = arith.constant 0 : index
    %c0_36 = arith.constant 0 : index
    %112 = vector.load %arg9[%c0_35, %c0_36] : memref<8x32xf32, #tpu.memory_space<vmem>>, vector<8x32xf32>
    %113 = vector.extract_strided_slice %12 {offsets = [0, 3, 0], sizes = [8, 1, 128], strides = [1, 1, 1]} : vector<8x8x128xf32> to vector<8x1x128xf32>
    %114 = vector.shape_cast %113 : vector<8x1x128xf32> to vector<8x128xf32>
    %cst_37 = arith.constant dense<0.000000e+00> : vector<8x128xf32>
    %115 = tpu.matmul %112, %4, %cst_37 {dimension_numbers = #tpu.dot_dimension_numbers<[1], [0], [0], [1], [0, 0, 1, 1], [], []>} : vector<8x32xf32>, vector<32x128xf32>, vector<8x128xf32> -> vector<8x128xf32>
    %116 = vector.broadcast %6 : vector<1x128xf32> to vector<8x128xf32>
    %117 = arith.addf %115, %116 : vector<8x128xf32>
    %118 = vector.extract_strided_slice %114 {offsets = [0, 0], sizes = [8, 32], strides = [1, 1]} : vector<8x128xf32> to vector<8x32xf32>
    %119 = vector.extract_strided_slice %117 {offsets = [0, 0], sizes = [8, 32], strides = [1, 1]} : vector<8x128xf32> to vector<8x32xf32>
    %120 = arith.addf %118, %119 : vector<8x32xf32>
    %121 = arith.negf %120 : vector<8x32xf32>
    %122 = math.exp %121 : vector<8x32xf32>
    %cst_38 = arith.constant 1.000000e+00 : f32
    %123 = vector.broadcast %cst_38 : f32 to vector<8x32xf32>
    %124 = arith.addf %123, %122 : vector<8x32xf32>
    %125 = arith.divf %123, %124 : vector<8x32xf32>
    %126 = vector.extract_strided_slice %114 {offsets = [0, 32], sizes = [8, 32], strides = [1, 1]} : vector<8x128xf32> to vector<8x32xf32>
    %127 = vector.extract_strided_slice %117 {offsets = [0, 32], sizes = [8, 32], strides = [1, 1]} : vector<8x128xf32> to vector<8x32xf32>
    %128 = arith.addf %126, %127 : vector<8x32xf32>
    %129 = arith.negf %128 : vector<8x32xf32>
    %130 = math.exp %129 : vector<8x32xf32>
    %cst_39 = arith.constant 1.000000e+00 : f32
    %131 = vector.broadcast %cst_39 : f32 to vector<8x32xf32>
    %132 = arith.addf %131, %130 : vector<8x32xf32>
    %133 = arith.divf %131, %132 : vector<8x32xf32>
    %134 = vector.extract_strided_slice %114 {offsets = [0, 64], sizes = [8, 32], strides = [1, 1]} : vector<8x128xf32> to vector<8x32xf32>
    %135 = vector.extract_strided_slice %117 {offsets = [0, 64], sizes = [8, 32], strides = [1, 1]} : vector<8x128xf32> to vector<8x32xf32>
    %136 = arith.mulf %125, %135 : vector<8x32xf32>
    %137 = arith.addf %134, %136 : vector<8x32xf32>
    %138 = math.tanh %137 : vector<8x32xf32>
    %cst_40 = arith.constant 1.000000e+00 : f32
    %139 = vector.broadcast %cst_40 : f32 to vector<8x32xf32>
    %140 = arith.subf %139, %133 : vector<8x32xf32>
    %141 = arith.mulf %140, %138 : vector<8x32xf32>
    %142 = arith.mulf %133, %112 : vector<8x32xf32>
    %143 = arith.addf %141, %142 : vector<8x32xf32>
    %c0_41 = arith.constant 0 : index
    %c0_42 = arith.constant 0 : index
    %144 = vector.load %arg9[%c0_41, %c0_42] : memref<8x32xf32, #tpu.memory_space<vmem>>, vector<8x32xf32>
    tpu.vector_store %arg9[%c0_41, %c0_42], %143 {strides = array<i32>} : memref<8x32xf32, #tpu.memory_space<vmem>>, vector<8x32xf32>,
    %c0_43 = arith.constant 0 : index
    %c0_44 = arith.constant 0 : index
    %145 = vector.load %arg9[%c0_43, %c0_44] : memref<8x32xf32, #tpu.memory_space<vmem>>, vector<8x32xf32>
    %146 = vector.extract_strided_slice %12 {offsets = [0, 4, 0], sizes = [8, 1, 128], strides = [1, 1, 1]} : vector<8x8x128xf32> to vector<8x1x128xf32>
    %147 = vector.shape_cast %146 : vector<8x1x128xf32> to vector<8x128xf32>
    %cst_45 = arith.constant dense<0.000000e+00> : vector<8x128xf32>
    %148 = tpu.matmul %145, %4, %cst_45 {dimension_numbers = #tpu.dot_dimension_numbers<[1], [0], [0], [1], [0, 0, 1, 1], [], []>} : vector<8x32xf32>, vector<32x128xf32>, vector<8x128xf32> -> vector<8x128xf32>
    %149 = vector.broadcast %6 : vector<1x128xf32> to vector<8x128xf32>
    %150 = arith.addf %148, %149 : vector<8x128xf32>
    %151 = vector.extract_strided_slice %147 {offsets = [0, 0], sizes = [8, 32], strides = [1, 1]} : vector<8x128xf32> to vector<8x32xf32>
    %152 = vector.extract_strided_slice %150 {offsets = [0, 0], sizes = [8, 32], strides = [1, 1]} : vector<8x128xf32> to vector<8x32xf32>
    %153 = arith.addf %151, %152 : vector<8x32xf32>
    %154 = arith.negf %153 : vector<8x32xf32>
    %155 = math.exp %154 : vector<8x32xf32>
    %cst_46 = arith.constant 1.000000e+00 : f32
    %156 = vector.broadcast %cst_46 : f32 to vector<8x32xf32>
    %157 = arith.addf %156, %155 : vector<8x32xf32>
    %158 = arith.divf %156, %157 : vector<8x32xf32>
    %159 = vector.extract_strided_slice %147 {offsets = [0, 32], sizes = [8, 32], strides = [1, 1]} : vector<8x128xf32> to vector<8x32xf32>
    %160 = vector.extract_strided_slice %150 {offsets = [0, 32], sizes = [8, 32], strides = [1, 1]} : vector<8x128xf32> to vector<8x32xf32>
    %161 = arith.addf %159, %160 : vector<8x32xf32>
    %162 = arith.negf %161 : vector<8x32xf32>
    %163 = math.exp %162 : vector<8x32xf32>
    %cst_47 = arith.constant 1.000000e+00 : f32
    %164 = vector.broadcast %cst_47 : f32 to vector<8x32xf32>
    %165 = arith.addf %164, %163 : vector<8x32xf32>
    %166 = arith.divf %164, %165 : vector<8x32xf32>
    %167 = vector.extract_strided_slice %147 {offsets = [0, 64], sizes = [8, 32], strides = [1, 1]} : vector<8x128xf32> to vector<8x32xf32>
    %168 = vector.extract_strided_slice %150 {offsets = [0, 64], sizes = [8, 32], strides = [1, 1]} : vector<8x128xf32> to vector<8x32xf32>
    %169 = arith.mulf %158, %168 : vector<8x32xf32>
    %170 = arith.addf %167, %169 : vector<8x32xf32>
    %171 = math.tanh %170 : vector<8x32xf32>
    %cst_48 = arith.constant 1.000000e+00 : f32
    %172 = vector.broadcast %cst_48 : f32 to vector<8x32xf32>
    %173 = arith.subf %172, %166 : vector<8x32xf32>
    %174 = arith.mulf %173, %171 : vector<8x32xf32>
    %175 = arith.mulf %166, %145 : vector<8x32xf32>
    %176 = arith.addf %174, %175 : vector<8x32xf32>
    %c0_49 = arith.constant 0 : index
    %c0_50 = arith.constant 0 : index
    %177 = vector.load %arg9[%c0_49, %c0_50] : memref<8x32xf32, #tpu.memory_space<vmem>>, vector<8x32xf32>
    tpu.vector_store %arg9[%c0_49, %c0_50], %176 {strides = array<i32>} : memref<8x32xf32, #tpu.memory_space<vmem>>, vector<8x32xf32>,
    %c0_51 = arith.constant 0 : index
    %c0_52 = arith.constant 0 : index
    %178 = vector.load %arg9[%c0_51, %c0_52] : memref<8x32xf32, #tpu.memory_space<vmem>>, vector<8x32xf32>
    %179 = vector.extract_strided_slice %12 {offsets = [0, 5, 0], sizes = [8, 1, 128], strides = [1, 1, 1]} : vector<8x8x128xf32> to vector<8x1x128xf32>
    %180 = vector.shape_cast %179 : vector<8x1x128xf32> to vector<8x128xf32>
    %cst_53 = arith.constant dense<0.000000e+00> : vector<8x128xf32>
    %181 = tpu.matmul %178, %4, %cst_53 {dimension_numbers = #tpu.dot_dimension_numbers<[1], [0], [0], [1], [0, 0, 1, 1], [], []>} : vector<8x32xf32>, vector<32x128xf32>, vector<8x128xf32> -> vector<8x128xf32>
    %182 = vector.broadcast %6 : vector<1x128xf32> to vector<8x128xf32>
    %183 = arith.addf %181, %182 : vector<8x128xf32>
    %184 = vector.extract_strided_slice %180 {offsets = [0, 0], sizes = [8, 32], strides = [1, 1]} : vector<8x128xf32> to vector<8x32xf32>
    %185 = vector.extract_strided_slice %183 {offsets = [0, 0], sizes = [8, 32], strides = [1, 1]} : vector<8x128xf32> to vector<8x32xf32>
    %186 = arith.addf %184, %185 : vector<8x32xf32>
    %187 = arith.negf %186 : vector<8x32xf32>
    %188 = math.exp %187 : vector<8x32xf32>
    %cst_54 = arith.constant 1.000000e+00 : f32
    %189 = vector.broadcast %cst_54 : f32 to vector<8x32xf32>
    %190 = arith.addf %189, %188 : vector<8x32xf32>
    %191 = arith.divf %189, %190 : vector<8x32xf32>
    %192 = vector.extract_strided_slice %180 {offsets = [0, 32], sizes = [8, 32], strides = [1, 1]} : vector<8x128xf32> to vector<8x32xf32>
    %193 = vector.extract_strided_slice %183 {offsets = [0, 32], sizes = [8, 32], strides = [1, 1]} : vector<8x128xf32> to vector<8x32xf32>
    %194 = arith.addf %192, %193 : vector<8x32xf32>
    %195 = arith.negf %194 : vector<8x32xf32>
    %196 = math.exp %195 : vector<8x32xf32>
    %cst_55 = arith.constant 1.000000e+00 : f32
    %197 = vector.broadcast %cst_55 : f32 to vector<8x32xf32>
    %198 = arith.addf %197, %196 : vector<8x32xf32>
    %199 = arith.divf %197, %198 : vector<8x32xf32>
    %200 = vector.extract_strided_slice %180 {offsets = [0, 64], sizes = [8, 32], strides = [1, 1]} : vector<8x128xf32> to vector<8x32xf32>
    %201 = vector.extract_strided_slice %183 {offsets = [0, 64], sizes = [8, 32], strides = [1, 1]} : vector<8x128xf32> to vector<8x32xf32>
    %202 = arith.mulf %191, %201 : vector<8x32xf32>
    %203 = arith.addf %200, %202 : vector<8x32xf32>
    %204 = math.tanh %203 : vector<8x32xf32>
    %cst_56 = arith.constant 1.000000e+00 : f32
    %205 = vector.broadcast %cst_56 : f32 to vector<8x32xf32>
    %206 = arith.subf %205, %199 : vector<8x32xf32>
    %207 = arith.mulf %206, %204 : vector<8x32xf32>
    %208 = arith.mulf %199, %178 : vector<8x32xf32>
    %209 = arith.addf %207, %208 : vector<8x32xf32>
    %c0_57 = arith.constant 0 : index
    %c0_58 = arith.constant 0 : index
    %210 = vector.load %arg9[%c0_57, %c0_58] : memref<8x32xf32, #tpu.memory_space<vmem>>, vector<8x32xf32>
    tpu.vector_store %arg9[%c0_57, %c0_58], %209 {strides = array<i32>} : memref<8x32xf32, #tpu.memory_space<vmem>>, vector<8x32xf32>,
    %c0_59 = arith.constant 0 : index
    %c0_60 = arith.constant 0 : index
    %211 = vector.load %arg9[%c0_59, %c0_60] : memref<8x32xf32, #tpu.memory_space<vmem>>, vector<8x32xf32>
    %212 = vector.extract_strided_slice %12 {offsets = [0, 6, 0], sizes = [8, 1, 128], strides = [1, 1, 1]} : vector<8x8x128xf32> to vector<8x1x128xf32>
    %213 = vector.shape_cast %212 : vector<8x1x128xf32> to vector<8x128xf32>
    %cst_61 = arith.constant dense<0.000000e+00> : vector<8x128xf32>
    %214 = tpu.matmul %211, %4, %cst_61 {dimension_numbers = #tpu.dot_dimension_numbers<[1], [0], [0], [1], [0, 0, 1, 1], [], []>} : vector<8x32xf32>, vector<32x128xf32>, vector<8x128xf32> -> vector<8x128xf32>
    %215 = vector.broadcast %6 : vector<1x128xf32> to vector<8x128xf32>
    %216 = arith.addf %214, %215 : vector<8x128xf32>
    %217 = vector.extract_strided_slice %213 {offsets = [0, 0], sizes = [8, 32], strides = [1, 1]} : vector<8x128xf32> to vector<8x32xf32>
    %218 = vector.extract_strided_slice %216 {offsets = [0, 0], sizes = [8, 32], strides = [1, 1]} : vector<8x128xf32> to vector<8x32xf32>
    %219 = arith.addf %217, %218 : vector<8x32xf32>
    %220 = arith.negf %219 : vector<8x32xf32>
    %221 = math.exp %220 : vector<8x32xf32>
    %cst_62 = arith.constant 1.000000e+00 : f32
    %222 = vector.broadcast %cst_62 : f32 to vector<8x32xf32>
    %223 = arith.addf %222, %221 : vector<8x32xf32>
    %224 = arith.divf %222, %223 : vector<8x32xf32>
    %225 = vector.extract_strided_slice %213 {offsets = [0, 32], sizes = [8, 32], strides = [1, 1]} : vector<8x128xf32> to vector<8x32xf32>
    %226 = vector.extract_strided_slice %216 {offsets = [0, 32], sizes = [8, 32], strides = [1, 1]} : vector<8x128xf32> to vector<8x32xf32>
    %227 = arith.addf %225, %226 : vector<8x32xf32>
    %228 = arith.negf %227 : vector<8x32xf32>
    %229 = math.exp %228 : vector<8x32xf32>
    %cst_63 = arith.constant 1.000000e+00 : f32
    %230 = vector.broadcast %cst_63 : f32 to vector<8x32xf32>
    %231 = arith.addf %230, %229 : vector<8x32xf32>
    %232 = arith.divf %230, %231 : vector<8x32xf32>
    %233 = vector.extract_strided_slice %213 {offsets = [0, 64], sizes = [8, 32], strides = [1, 1]} : vector<8x128xf32> to vector<8x32xf32>
    %234 = vector.extract_strided_slice %216 {offsets = [0, 64], sizes = [8, 32], strides = [1, 1]} : vector<8x128xf32> to vector<8x32xf32>
    %235 = arith.mulf %224, %234 : vector<8x32xf32>
    %236 = arith.addf %233, %235 : vector<8x32xf32>
    %237 = math.tanh %236 : vector<8x32xf32>
    %cst_64 = arith.constant 1.000000e+00 : f32
    %238 = vector.broadcast %cst_64 : f32 to vector<8x32xf32>
    %239 = arith.subf %238, %232 : vector<8x32xf32>
    %240 = arith.mulf %239, %237 : vector<8x32xf32>
    %241 = arith.mulf %232, %211 : vector<8x32xf32>
    %242 = arith.addf %240, %241 : vector<8x32xf32>
    %c0_65 = arith.constant 0 : index
    %c0_66 = arith.constant 0 : index
    %243 = vector.load %arg9[%c0_65, %c0_66] : memref<8x32xf32, #tpu.memory_space<vmem>>, vector<8x32xf32>
    tpu.vector_store %arg9[%c0_65, %c0_66], %242 {strides = array<i32>} : memref<8x32xf32, #tpu.memory_space<vmem>>, vector<8x32xf32>,
    %c0_67 = arith.constant 0 : index
    %c0_68 = arith.constant 0 : index
    %244 = vector.load %arg9[%c0_67, %c0_68] : memref<8x32xf32, #tpu.memory_space<vmem>>, vector<8x32xf32>
    %245 = vector.extract_strided_slice %12 {offsets = [0, 7, 0], sizes = [8, 1, 128], strides = [1, 1, 1]} : vector<8x8x128xf32> to vector<8x1x128xf32>
    %246 = vector.shape_cast %245 : vector<8x1x128xf32> to vector<8x128xf32>
    %cst_69 = arith.constant dense<0.000000e+00> : vector<8x128xf32>
    %247 = tpu.matmul %244, %4, %cst_69 {dimension_numbers = #tpu.dot_dimension_numbers<[1], [0], [0], [1], [0, 0, 1, 1], [], []>} : vector<8x32xf32>, vector<32x128xf32>, vector<8x128xf32> -> vector<8x128xf32>
    %248 = vector.broadcast %6 : vector<1x128xf32> to vector<8x128xf32>
    %249 = arith.addf %247, %248 : vector<8x128xf32>
    %250 = vector.extract_strided_slice %246 {offsets = [0, 0], sizes = [8, 32], strides = [1, 1]} : vector<8x128xf32> to vector<8x32xf32>
    %251 = vector.extract_strided_slice %249 {offsets = [0, 0], sizes = [8, 32], strides = [1, 1]} : vector<8x128xf32> to vector<8x32xf32>
    %252 = arith.addf %250, %251 : vector<8x32xf32>
    %253 = arith.negf %252 : vector<8x32xf32>
    %254 = math.exp %253 : vector<8x32xf32>
    %cst_70 = arith.constant 1.000000e+00 : f32
    %255 = vector.broadcast %cst_70 : f32 to vector<8x32xf32>
    %256 = arith.addf %255, %254 : vector<8x32xf32>
    %257 = arith.divf %255, %256 : vector<8x32xf32>
    %258 = vector.extract_strided_slice %246 {offsets = [0, 32], sizes = [8, 32], strides = [1, 1]} : vector<8x128xf32> to vector<8x32xf32>
    %259 = vector.extract_strided_slice %249 {offsets = [0, 32], sizes = [8, 32], strides = [1, 1]} : vector<8x128xf32> to vector<8x32xf32>
    %260 = arith.addf %258, %259 : vector<8x32xf32>
    %261 = arith.negf %260 : vector<8x32xf32>
    %262 = math.exp %261 : vector<8x32xf32>
    %cst_71 = arith.constant 1.000000e+00 : f32
    %263 = vector.broadcast %cst_71 : f32 to vector<8x32xf32>
    %264 = arith.addf %263, %262 : vector<8x32xf32>
    %265 = arith.divf %263, %264 : vector<8x32xf32>
    %266 = vector.extract_strided_slice %246 {offsets = [0, 64], sizes = [8, 32], strides = [1, 1]} : vector<8x128xf32> to vector<8x32xf32>
    %267 = vector.extract_strided_slice %249 {offsets = [0, 64], sizes = [8, 32], strides = [1, 1]} : vector<8x128xf32> to vector<8x32xf32>
    %268 = arith.mulf %257, %267 : vector<8x32xf32>
    %269 = arith.addf %266, %268 : vector<8x32xf32>
    %270 = math.tanh %269 : vector<8x32xf32>
    %cst_72 = arith.constant 1.000000e+00 : f32
    %271 = vector.broadcast %cst_72 : f32 to vector<8x32xf32>
    %272 = arith.subf %271, %265 : vector<8x32xf32>
    %273 = arith.mulf %272, %270 : vector<8x32xf32>
    %274 = arith.mulf %265, %244 : vector<8x32xf32>
    %275 = arith.addf %273, %274 : vector<8x32xf32>
    %c0_73 = arith.constant 0 : index
    %c0_74 = arith.constant 0 : index
    %276 = vector.load %arg9[%c0_73, %c0_74] : memref<8x32xf32, #tpu.memory_space<vmem>>, vector<8x32xf32>
    tpu.vector_store %arg9[%c0_73, %c0_74], %275 {strides = array<i32>} : memref<8x32xf32, #tpu.memory_space<vmem>>, vector<8x32xf32>,
    %c0_i32_75 = arith.constant 0 : i32
    %277 = arith.cmpi eq, %arg0, %c0_i32_75 : i32
    %278 = arith.extui %277 : i1 to i32
    %c0_i32_76 = arith.constant 0 : i32
    %279 = arith.cmpi ne, %278, %c0_i32_76 : i32
    scf.if %279 {
      %c0_77 = arith.constant 0 : index
      %c0_78 = arith.constant 0 : index
      %280 = vector.load %arg9[%c0_77, %c0_78] : memref<8x32xf32, #tpu.memory_space<vmem>>, vector<8x32xf32>
      %cst_79 = arith.constant dense<0.000000e+00> : vector<32xf32>
      %281 = vector.multi_reduction <add>, %280, %cst_79 [0] : vector<8x32xf32> to vector<32xf32>
      %282 = vector.shape_cast %281 : vector<32xf32> to vector<1x32xf32>
      %cst_80 = arith.constant 8.000000e+00 : f32
      %283 = vector.broadcast %cst_80 : f32 to vector<1x32xf32>
      %284 = arith.divf %282, %283 : vector<1x32xf32>
      %285 = vector.broadcast %284 : vector<1x32xf32> to vector<8x32xf32>
      %286 = arith.subf %280, %285 : vector<8x32xf32>
      %287 = arith.mulf %286, %286 : vector<8x32xf32>
      %cst_81 = arith.constant dense<0.000000e+00> : vector<32xf32>
      %288 = vector.multi_reduction <add>, %287, %cst_81 [0] : vector<8x32xf32> to vector<32xf32>
      %289 = vector.shape_cast %288 : vector<32xf32> to vector<1x32xf32>
      %cst_82 = arith.constant 8.000000e+00 : f32
      %290 = vector.broadcast %cst_82 : f32 to vector<1x32xf32>
      %291 = arith.divf %289, %290 : vector<1x32xf32>
      %cst_83 = arith.constant 9.99999974E-6 : f32
      %292 = vector.broadcast %cst_83 : f32 to vector<1x32xf32>
      %293 = arith.addf %291, %292 : vector<1x32xf32>
      %294 = math.rsqrt %293 : vector<1x32xf32>
      %295 = vector.broadcast %284 : vector<1x32xf32> to vector<8x32xf32>
      %296 = arith.subf %280, %295 : vector<8x32xf32>
      %297 = vector.broadcast %294 : vector<1x32xf32> to vector<8x32xf32>
      %298 = arith.mulf %296, %297 : vector<8x32xf32>
      %c0_84 = arith.constant 0 : index
      %c0_85 = arith.constant 0 : index
      %299 = vector.load %arg6[%c0_84, %c0_85] : memref<1x32xf32, #tpu.memory_space<vmem>>, vector<1x32xf32>
      %300 = vector.broadcast %299 : vector<1x32xf32> to vector<8x32xf32>
      %301 = arith.mulf %298, %300 : vector<8x32xf32>
      %c0_86 = arith.constant 0 : index
      %c0_87 = arith.constant 0 : index
      %302 = vector.load %arg7[%c0_86, %c0_87] : memref<1x32xf32, #tpu.memory_space<vmem>>, vector<1x32xf32>
      %303 = vector.broadcast %302 : vector<1x32xf32> to vector<8x32xf32>
      %304 = arith.addf %301, %303 : vector<8x32xf32>
      %c0_88 = arith.constant 0 : index
      %c0_89 = arith.constant 0 : index
      %305 = vector.load %arg8[%c0_88, %c0_89] : memref<8x32xf32, #tpu.memory_space<vmem>>, vector<8x32xf32>
      tpu.vector_store %arg8[%c0_88, %c0_89], %304 {strides = array<i32>} : memref<8x32xf32, #tpu.memory_space<vmem>>, vector<8x32xf32>,
    } else {
    }
    return
  }
  func.func @transform_0(%arg0: i32) -> (i32, i32, i32) {
    %c0_i32 = arith.constant 0 : i32
    %c0_i32_0 = arith.constant 0 : i32
    %c0_i32_1 = arith.constant 0 : i32
    return %c0_i32, %arg0, %c0_i32_0 : i32, i32, i32
  }
  func.func @transform_1(%arg0: i32) -> (i32, i32) {
    %c0_i32 = arith.constant 0 : i32
    %c0_i32_0 = arith.constant 0 : i32
    %c0_i32_1 = arith.constant 0 : i32
    return %c0_i32, %c0_i32_0 : i32, i32
  }
  func.func @transform_2(%arg0: i32) -> (i32, i32) {
    %c0_i32 = arith.constant 0 : i32
    %c0_i32_0 = arith.constant 0 : i32
    %c0_i32_1 = arith.constant 0 : i32
    return %c0_i32, %c0_i32_0 : i32, i32
  }
  func.func @transform_3(%arg0: i32) -> (i32, i32) {
    %c0_i32 = arith.constant 0 : i32
    %c0_i32_0 = arith.constant 0 : i32
    %c0_i32_1 = arith.constant 0 : i32
    return %c0_i32, %c0_i32_0 : i32, i32
  }
  func.func @transform_4(%arg0: i32) -> (i32, i32) {
    %c0_i32 = arith.constant 0 : i32
    %c0_i32_0 = arith.constant 0 : i32
    %c0_i32_1 = arith.constant 0 : i32
    return %c0_i32, %c0_i32_0 : i32, i32
  }
  func.func @transform_5(%arg0: i32) -> (i32, i32) {
    %c0_i32 = arith.constant 0 : i32
    %c0_i32_0 = arith.constant 0 : i32
    %c0_i32_1 = arith.constant 0 : i32
    return %c0_i32, %c0_i32_0 : i32, i32
  }
  func.func @transform_6(%arg0: i32) -> (i32, i32) {
    %c0_i32 = arith.constant 0 : i32
    %c0_i32_0 = arith.constant 0 : i32
    %c0_i32_1 = arith.constant 0 : i32
    return %c0_i32, %c0_i32_0 : i32, i32
  }
  func.func @transform_7(%arg0: i32) -> (i32, i32) {
    %c0_i32 = arith.constant 0 : i32
    %c0_i32_0 = arith.constant 0 : i32
    %c0_i32_1 = arith.constant 0 : i32
    return %c0_i32, %c0_i32_0 : i32, i32
  }
}

</mosaic_0001>

<bundles_post_ra>
// kernel: temp_layer_forward.1
= control target key start
LH: loop header
LB: loop body
LE: loop exit
PB: predicated region body
PF: predicated region fallthrough
CT: control target
= control target key end

     0   :  { %vm31_vm0 = vcmask 261120   ;;  %v3787_v3 = vmov 0.0|0.0   ;;  %v3788_v8 = vmov 0.0   ;;  %vm3789_vm1 = vmmov 0   ;;  %s4872_s0 = inlined_call_operand.vmem [shape: f32[8,8,32], index: 0, kind: input, shape index: {}]   ;;  %s4873_s1 = inlined_call_operand.vmem [shape: f32[32,128], index: 1, kind: input, shape index: {}]   ;;  %s4874_s2 = inlined_call_operand.vmem [shape: f32[32,128], index: 2, kind: input, shape index: {}]   ;;  %s4875_s3 = inlined_call_operand.vmem [shape: f32[1,128], index: 3, kind: input, shape index: {}]   ;;  %s4876_s4 = inlined_call_operand.vmem [shape: f32[1,128], index: 4, kind: input, shape index: {}]   ;;  %s4877_s5 = inlined_call_operand.vmem [shape: f32[1,32], index: 5, kind: input, shape index: {}]   ;;  %s4878_s6 = inlined_call_operand.vmem [shape: f32[1,32], index: 6, kind: input, shape index: {}]   ;;  %s4879_s7 = inlined_call_operand.hbm [shape: f32[8,32], index: 7, kind: output, shape index: {}]  }
   0x1   :  { %v33_v0 = vld [vmem:[%s4873_s1] sm:$0xff]  ;;  %v34_v1 = vld [vmem:[%s4873_s1 + $0x8] sm:$0xff]  ;;  %3320 = vmatprep.subr.bf16.mxu1 %v3787_v3  ;;  %v35_v6 = vld [vmem:[%s4873_s1 + $0x10] sm:$0xff]  ;;  %32 = vst.msk [vmem:[#allocation2] sm:$0xff] %vm31_vm0, %v3788_v8  ;;  %3232 = vmatprep.mubr.msk.f32.mxu1 %vm3789_vm1, %v3788_v8 }
   0x2   :  { %v37_v2 = vld [vmem:[%s4874_s2] sm:$0xff]  ;;  %v3312_v4 = vpack.c.bf16 %v34_v1, %v33_v0  ;;  %v38_v5 = vld [vmem:[%s4874_s2 + $0x8] sm:$0xff]  ;;  %v36_v7 = vld [vmem:[%s4873_s1 + $0x18] sm:$0xff] }
   0x3   :  { %v3855_v9 = vpack.c.bf16 %v38_v5, %v37_v2  ;;  %v3316_v10 = vpack.c.bf16 %v36_v7, %v35_v6  ;;  %v39_v11 = vld [vmem:[%s4874_s2 + $0x10] sm:$0xff]  ;;  %v40_v12 = vld [vmem:[%s4874_s2 + $0x18] sm:$0xff]  ;;  %v43_v13 = vld [vmem:[%s4872_s0] sm:$0xff] }
   0x4   :  { %3313 = vmatprep.subr.bf16.mxu0 %v3312_v4  ;;  %3212 = vmatprep.mubr.msk.f32.mxu0 %vm31_vm0, %v43_v13  ;;  %v3870_v14 = vpack.c.bf16 %v40_v12, %v39_v11 }
   0x5   :  { %3322 = vmatpush3.bf16.msra.mxu1 %v3855_v9  ;;  %3315 = vmatpush3.bf16.msra.mxu0 %v3312_v4 }
   0x6   :  { %3323 = vmatprep.subr.bf16.mxu1 %v3787_v3  ;;  %3317 = vmatprep.subr.bf16.mxu0 %v3316_v10 }
   0x7   :  { %12 = vsyncpa [#allocation4], 0  ;;  %v44_v16 = vld [vmem:[%s4872_s0 + $0x8] sm:$0xff]  ;;  %v45_v17 = vld [vmem:[%s4872_s0 + $0x10] sm:$0xff]  ;;  %s3790_s10 = smov 64   ;;  %s3792_s12 = smov 96  }
   0x8   :  { %v3874_v15 = vld [vmem:[#allocation2] sm:$0xff]  ;;  %v46_v18 = vld [vmem:[%s4872_s0 + $0x18] sm:$0xff]  ;;  %v48_v20 = vld [vmem:[%s4872_s0 + $0x28] sm:$0xff]  ;;  %vm523_vm2 = vcmask 1041409   ;;  %vm526_vm3 = vcmask 1042434   ;;  %vm529_vm4 = vcmask 1043459  }
   0x9   :  { %3325 = vmatpush3.bf16.msra.mxu1 %v3870_v14  ;;  %3319 = vmatpush3.bf16.msra.mxu0 %v3316_v10  ;;  %v47_v19 = vld [vmem:[%s4872_s0 + $0x20] sm:$0xff]  ;;  %v49_v21 = vld [vmem:[%s4872_s0 + $0x30] sm:$0xff]  ;;  %v50_v22 = vld [vmem:[%s4872_s0 + $0x38] sm:$0xff]  ;;  %vm532_vm5 = vcmask 1044484   ;;  %vm535_vm6 = vcmask 1045509   ;;  %vm538_vm7 = vcmask 1046534  }
   0xa   :  { %3326 = vmatprep.subr.bf16.mxu1 %v3787_v3  ;;  %3332 = vmatprep.subr.bf16.mxu0 %v3787_v3  ;;  %v3923_v23 = vld [vmem:[%s4876_s4] ss:$0 sm:$0xff]  ;;  %vm541_vm8 = vcmask 1047559   ;;  %vm895_vm9 = vcmask 261121   ;;  %vm897_vm10 = vcmask 253952   ;;  %vm1247_vm11 = vcmask 261122  }
   0xb   :  { %v3068_v42 = vld [vmem:[%s4875_s3] ss:$0 sm:$0xff]  ;;  %s3791_s3 = smov 32   ;;  %vm1249_vm12 = vcmask 254976   ;;  %vm1601_vm13 = vcmask 256000   ;;  %vm1599_vm14 = vcmask 261123  }
   0xc   :  { %3233 = vmatmul.mubr.msk.f32.vlgmr.msra.gmra.mrb[0].mxu1 %vm31_vm0, %v3874_v15  ;;  %3213 = vmatmul.mubr.msk.f32.vlgmr.msra.gmra.mrb[0].mxu0 %vm31_vm0, %v44_v16  ;;  %vm1953_vm15 = vcmask 257024   ;;  %s3793_s18 = smov [#allocation3]  }
   0xd   :  { %3215 = vmatprep.mubr.msk.f32.mxu0 %vm31_vm0, %v45_v17  ;;  %3328 = vmatpush3.bf16.msra.mxu1 %v3855_v9  ;;  %s3060_s19 = sshll.u32 %s3793_s18, 4  ;;  %s3061_s19 = int_to_ptr.vmem [resolvable:$true] %s3060_s19 }
   0xe   :  { %3329 = vmatprep.subr.bf16.mxu1 %v3787_v3  ;;  %3243 = vmatprep.mubr.msk.f32.mxu1 %vm3789_vm1, %v3788_v8  ;;  %s3763_s20 = scalar_lea.vmem %s3061_s19, 128  ;;  %p3768_p1 = scmp.lt.s32.totalorder %s3061_s19, %s3061_s19 }
   0xf   :  { %3334 = vmatpush3.bf16.msra.mxu0 %v3855_v9  ;;  %p3764_p0 = scmp.ne.s32.totalorder %s3061_s19, %s3763_s20  ;;  %p3769_p2 = scmp.lt.s32.totalorder %s3763_s20, %s3763_s20 }
  0x10   :  { %3216 = vmatmul.mubr.msk.f32.gmra.mrb[2].mxu0 %vm31_vm0, %v46_v18  ;;  %3335 = vmatprep.subr.bf16.mxu0 %v3787_v3 }
  0x11   :  { %3218 = vmatprep.mubr.msk.f32.mxu0 %vm31_vm0, %v47_v19  ;;  %3331 = vmatpush3.bf16.msra.mxu1 %v3870_v14  ;;  %p3770_p3 = por %p3769_p2, %p3768_p1 }
  0x12   :  { %3338 = vmatprep.subr.bf16.mxu1 %v3787_v3 }
  0x13   :  { %3337 = vmatpush3.bf16.msra.mxu0 %v3870_v14  ;;  %p3771_p4 = pnand %p3770_p3, %p3764_p0 }
  0x14   :  { %3219 = vmatmul.mubr.msk.f32.gmra.mrb[4].mxu0 %vm31_vm0, %v48_v20  ;;  %3344 = vmatprep.subr.bf16.mxu0 %v3787_v3 }
  0x15   :  { %3221 = vmatprep.mubr.msk.f32.mxu0 %vm31_vm0, %v49_v21 }
  0x18   :  { %3222 = vmatmul.mubr.msk.f32.gmra.mrb[6].mxu0 %vm31_vm0, %v50_v22 }
  0x19   :  { %3254 = vmatprep.mubr.msk.f32.mxu0 %vm3789_vm1, %v3788_v8 }
  0xdf   :  { %v263_v24 = vpop.f32.mrb[0].mxu1  ;;  %v3214_v25 = vpop.f32.mrb[0].mxu0 }
  0xe0   :  { %v264_v26 = vadd.f32 %v3923_v23, %v263_v24  ;;  %v3234_v27 = vpop.f32.mrb[1].mxu1  ;;  %v148_v28 = vpop.f32.mrb[1].mxu0  ;;  %v3939_v44 = vadd.f32 %v3214_v25, %v3068_v42 }
  0xe1   :  { %v3937_v43 = vadd.f32 %v3068_v42, %v148_v28 }
  0xe2   :  { %339 = vrot.lane.b32.xlu1 %v264_v26, %s3790_s10  ;;  %v268_v29 = vrot.slane %v264_v26, 1  ;;  %v270_v32 = vrot.slane %v264_v26, 3  ;;  %v269_v33 = vrot.slane %v264_v26, 2  ;;  %v272_v36 = vrot.slane %v264_v26, 5 }
  0xe3   :  { %v3217_v30 = vpop.f32.mrb[2].mxu0  ;;  %v271_v37 = vrot.slane %v264_v26, 4  ;;  %v274_v40 = vrot.slane %v264_v26, 7  ;;  %v273_v41 = vrot.slane %v264_v26, 6  ;;  %v283_v45 = vadd.f32 %v264_v26, %v3937_v43 }
  0xe4   :  { %341 = vrot.lane.b32.xlu0 %v268_v29, %s3790_s10  ;;  %v158_v31 = vpop.f32.mrb[3].mxu0  ;;  %v284_v47 = vadd.f32 %v268_v29, %v3939_v44  ;;  %v3945_v49 = vadd.f32 %v3217_v30, %v3068_v42 }
  0xe5   :  { %v3942_v46 = vadd.f32 %v3068_v42, %v158_v31  ;;  %v3079_v48 = vmul.f32 -1.442695, %v283_v45 }
  0xe6   :  { %345 = vrot.lane.b32.xlu1 %v270_v32, %s3790_s10  ;;  %v3080_v52 = vmul.f32 -1.442695, %v284_v47  ;;  %v286_v53 = vadd.f32 %v270_v32, %v3945_v49 }
  0xe7   :  { %v3220_v34 = vpop.f32.mrb[4].mxu0  ;;  %v285_v50 = vadd.f32 %v269_v33, %v3942_v46  ;;  %3375 = vpow2.f32 %v3079_v48 }
  0xe8   :  { %343 = vrot.lane.b32.xlu0 %v269_v33, %s3790_s10  ;;  %v168_v35 = vpop.f32.mrb[5].mxu0  ;;  %v3951_v54 = vadd.f32 %v3220_v34, %v3068_v42  ;;  %3377 = vpow2.f32 %v3080_v52  ;;  %v3082_v58 = vmul.f32 -1.442695, %v286_v53 }
  0xe9   :  { %v3948_v51 = vadd.f32 %v3068_v42, %v168_v35  ;;  %v3081_v55 = vmul.f32 -1.442695, %v285_v50 }
  0xea   :  { %349 = vrot.lane.b32.xlu1 %v272_v36, %s3790_s10  ;;  %v288_v59 = vadd.f32 %v272_v36, %v3951_v54 }
  0xeb   :  { %v3223_v38 = vpop.f32.mrb[6].mxu0  ;;  %v287_v56 = vadd.f32 %v271_v37, %v3948_v51  ;;  %3379 = vpow2.f32 %v3081_v55  ;;  %v467_v55 = vrot.slane %v3874_v15, 1 }
  0xec   :  { %347 = vrot.lane.b32.xlu0 %v271_v37, %s3790_s10  ;;  %v178_v39 = vpop.f32.mrb[7].mxu0  ;;  %v3957_v60 = vadd.f32 %v3223_v38, %v3068_v42  ;;  %3381 = vpow2.f32 %v3082_v58  ;;  %v3084_v63 = vmul.f32 -1.442695, %v288_v59  ;;  %v469_v58 = vrot.slane %v3874_v15, 3 }
  0xed   :  { %v3954_v57 = vadd.f32 %v3068_v42, %v178_v39  ;;  %v3083_v61 = vmul.f32 -1.442695, %v287_v56  ;;  %v468_v56 = vrot.slane %v3874_v15, 2  ;;  %v470_v59 = vrot.slane %v3874_v15, 4 }
  0xee   :  { %353 = vrot.lane.b32.xlu1 %v274_v40, %s3790_s10  ;;  %v290_v1 = vadd.f32 %v274_v40, %v3957_v60 }
  0xef   :  { %v289_v62 = vadd.f32 %v273_v41, %v3954_v57  ;;  %3383 = vpow2.f32 %v3083_v61  ;;  %v471_v61 = vrot.slane %v3874_v15, 5 }
  0xf0   :  { %351 = vrot.lane.b32.xlu0 %v273_v41, %s3790_s10  ;;  %3385 = vpow2.f32 %v3084_v63  ;;  %v3086_v6 = vmul.f32 -1.442695, %v290_v1 }
  0xf1   :  { %v3376_v0 = vpop.eup %3375  ;;  %v3085_v2 = vmul.f32 -1.442695, %v289_v62  ;;  %v472_v62 = vrot.slane %v3874_v15, 6 }
  0xf2   :  { %v315_v4 = vadd.f32 1.0, %v3376_v0  ;;  %v3378_v5 = vpop.eup %3377 }
  0xf3   :  { %3387 = vpow2.f32 %v3085_v2  ;;  %v316_v10 = vadd.f32 1.0, %v3378_v5 }
  0xf4   :  { %3389 = vrcp.f32 %v315_v4 }
  0xf5   :  { %v3380_v7 = vpop.eup %3379  ;;  %3391 = vpow2.f32 %v3086_v6 }
  0xf6   :  { %v3382_v11 = vpop.eup %3381  ;;  %v317_v12 = vadd.f32 1.0, %v3380_v7  ;;  %3393 = vrcp.f32 %v316_v10 }
  0xf7   :  { %v318_v16 = vadd.f32 1.0, %v3382_v11 }
  0xf8   :  { %3395 = vrcp.f32 %v317_v12 }
  0xf9   :  { %v3384_v13 = vpop.eup %3383  ;;  %3397 = vrcp.f32 %v318_v16 }
  0xfa   :  { %v3386_v17 = vpop.eup %3385  ;;  %v319_v18 = vadd.f32 1.0, %v3384_v13 }
  0xfb   :  { %v320_v20 = vadd.f32 1.0, %v3386_v17 }
  0xfc   :  { %3399 = vrcp.f32 %v319_v18 }
  0xfd   :  { %v3388_v19 = vpop.eup %3387  ;;  %3401 = vrcp.f32 %v320_v20 }
  0xfe   :  { %v3961_v21 = vpop.eup %3389  ;;  %v321_v22 = vadd.f32 1.0, %v3388_v19 }
  0xff   :  { %v3392_v25 = vpop.eup %3391 }
 0x100   :  { %v3965_v28 = vpop.eup %3393  ;;  %v322_v29 = vadd.f32 1.0, %v3392_v25  ;;  %3403 = vrcp.f32 %v321_v22 }
 0x102   :  { %v3968_v32 = vpop.eup %3395  ;;  %3405 = vrcp.f32 %v322_v29 }
 0x103   :  { %v3972_v35 = vpop.eup %3397 }
 0x106   :  { %v3975_v36 = vpop.eup %3399 }
 0x107   :  { %v3979_v41 = vpop.eup %3401 }
 0x10a   :  { %v3983_v42 = vpop.eup %3403 }
 0x10c   :  { %v3989_v52 = vpop.eup %3405 }
 0x154   :  { %v340_v24 = vpop.permute.xlu1 %339 }
 0x155   :  { %v363_v26 = vmul.f32 %v3961_v21, %v340_v24 }
 0x156   :  { %v342_v27 = vpop.permute.xlu0 %341 }
 0x157   :  { %379 = vrot.lane.b32.xlu0 %v363_v26, %s3790_s10  ;;  %v364_v31 = vmul.f32 %v3965_v28, %v342_v27  ;;  %v473_v26 = vrot.slane %v3874_v15, 7 }
 0x158   :  { %v346_v30 = vpop.permute.xlu1 %345 }
 0x159   :  { %v366_v39 = vmul.f32 %v3972_v35, %v346_v30 }
 0x15a   :  { %v344_v33 = vpop.permute.xlu0 %343 }
 0x15b   :  { %v365_v34 = vmul.f32 %v3968_v32, %v344_v33  ;;  %381 = vrot.lane.b32.xlu0 %v364_v31, %s3790_s10 }
 0x15c   :  { %v350_v37 = vpop.permute.xlu1 %349 }
 0x15d   :  { %383 = vrot.lane.b32.xlu1 %v365_v34, %s3790_s10  ;;  %v368_v47 = vmul.f32 %v3979_v41, %v350_v37 }
 0x15e   :  { %v348_v38 = vpop.permute.xlu0 %347 }
 0x15f   :  { %v367_v40 = vmul.f32 %v3975_v36, %v348_v38 }
 0x160   :  { %v354_v50 = vpop.permute.xlu1 %353 }
 0x161   :  { %385 = vrot.lane.b32.xlu1 %v366_v39, %s3790_s10  ;;  %387 = vrot.lane.b32.xlu0 %v367_v40, %s3790_s10  ;;  %v370_v53 = vmul.f32 %v3989_v52, %v354_v50  ;;  %v421_v50 = vsub.f32 1.0, %v3968_v32 }
 0x162   :  { %v352_v45 = vpop.permute.xlu0 %351 }
 0x163   :  { %v369_v48 = vmul.f32 %v3983_v42, %v352_v45 }
 0x165   :  { %389 = vrot.lane.b32.xlu1 %v368_v47, %s3790_s10  ;;  %391 = vrot.lane.b32.xlu0 %v369_v48, %s3790_s10  ;;  %v420_v48 = vsub.f32 1.0, %v3965_v28 }
 0x169   :  { %393 = vrot.lane.b32.xlu1 %v370_v53, %s3790_s10  ;;  %474 = vrot.lane.b32.xlu0 %v3874_v15, %s3791_s3 }
 0x16d   :  { %476 = vrot.lane.b32.xlu1 %v467_v55, %s3791_s3 }
 0x171   :  { %478 = vrot.lane.b32.xlu1 %v468_v56, %s3791_s3 }
 0x175   :  { %480 = vrot.lane.b32.xlu1 %v469_v58, %s3791_s3 }
 0x179   :  { %482 = vrot.lane.b32.xlu1 %v470_v59, %s3791_s3 }
 0x17d   :  { %484 = vrot.lane.b32.xlu1 %v471_v61, %s3791_s3  ;;  %v422_v61 = vsub.f32 1.0, %v3972_v35 }
 0x181   :  { %486 = vrot.lane.b32.xlu1 %v472_v62, %s3791_s3 }
 0x1c9   :  { %v380_v63 = vpop.permute.xlu0 %379 }
 0x1ca   :  { %v403_v0 = vadd.f32 %v380_v63, %v3937_v43 }
 0x1cc   :  { %3407 = vtanh.f32 %v403_v0  ;;  %v419_v0 = vsub.f32 1.0, %v3961_v21 }
 0x1cd   :  { %v382_v1 = vpop.permute.xlu0 %381 }
 0x1ce   :  { %v404_v2 = vadd.f32 %v382_v1, %v3939_v44 }
 0x1cf   :  { %v384_v4 = vpop.permute.xlu1 %383 }
 0x1d0   :  { %3409 = vtanh.f32 %v404_v2  ;;  %v405_v5 = vadd.f32 %v384_v4, %v3942_v46 }
 0x1d2   :  { %3411 = vtanh.f32 %v405_v5  ;;  %v423_v5 = vsub.f32 1.0, %v3975_v36 }
 0x1d3   :  { %v386_v6 = vpop.permute.xlu1 %385  ;;  %v388_v7 = vpop.permute.xlu0 %387 }
 0x1d4   :  { %v406_v10 = vadd.f32 %v386_v6, %v3945_v49  ;;  %v407_v11 = vadd.f32 %v388_v7, %v3948_v51 }
 0x1d6   :  { %v3408_v12 = vpop.eup %3407  ;;  %3413 = vtanh.f32 %v406_v10  ;;  %v424_v10 = vsub.f32 1.0, %v3979_v41 }
 0x1d7   :  { %v390_v13 = vpop.permute.xlu1 %389  ;;  %435 = vrot.lane.b32.xlu0 %v3408_v12, %s3792_s12  ;;  %3415 = vtanh.f32 %v407_v11  ;;  %v392_v17 = vpop.permute.xlu0 %391 }
 0x1d8   :  { %v408_v16 = vadd.f32 %v390_v13, %v3951_v54  ;;  %v409_v19 = vadd.f32 %v392_v17, %v3954_v57 }
 0x1da   :  { %v3410_v18 = vpop.eup %3409  ;;  %3417 = vtanh.f32 %v408_v16 }
 0x1db   :  { %437 = vrot.lane.b32.xlu0 %v3410_v18, %s3792_s12  ;;  %v394_v20 = vpop.permute.xlu1 %393  ;;  %3419 = vtanh.f32 %v409_v19  ;;  %v475_v15 = vpop.permute.xlu0 %474 }
 0x1dc   :  { %v3412_v22 = vpop.eup %3411  ;;  %v410_v25 = vadd.f32 %v394_v20, %v3957_v60 }
 0x1de   :  { %3421 = vtanh.f32 %v410_v25 }
 0x1df   :  { %439 = vrot.lane.b32.xlu0 %v3412_v22, %s3792_s12  ;;  %v477_v33 = vpop.permute.xlu1 %476 }
 0x1e0   :  { %v3414_v24 = vpop.eup %3413  ;;  %v499_v59 = vmul.f32 %v3965_v28, %v477_v33  ;;  %v498_v28 = vmul.f32 %v3961_v21, %v475_v15 }
 0x1e1   :  { %441 = vrot.lane.b32.xlu1 %v3414_v24, %s3792_s12  ;;  %v3416_v27 = vpop.eup %3415 }
 0x1e3   :  { %443 = vrot.lane.b32.xlu0 %v3416_v27, %s3792_s12  ;;  %v479_v34 = vpop.permute.xlu1 %478 }
 0x1e4   :  { %v3418_v29 = vpop.eup %3417  ;;  %v500_v62 = vmul.f32 %v3968_v32, %v479_v34 }
 0x1e5   :  { %488 = vrot.lane.b32.xlu1 %v473_v26, %s3791_s3  ;;  %v3420_v30 = vpop.eup %3419 }
 0x1e7   :  { %445 = vrot.lane.b32.xlu0 %v3418_v29, %s3792_s12  ;;  %v481_v37 = vpop.permute.xlu1 %480 }
 0x1e8   :  { %v3422_v31 = vpop.eup %3421  ;;  %v501_v6 = vmul.f32 %v3972_v35, %v481_v37  ;;  %v425_v35 = vsub.f32 1.0, %v3983_v42 }
 0x1eb   :  { %447 = vrot.lane.b32.xlu0 %v3420_v30, %s3792_s12  ;;  %v483_v38 = vpop.permute.xlu1 %482 }
 0x1ec   :  { %v502_v17 = vmul.f32 %v3975_v36, %v483_v38 }
 0x1ef   :  { %449 = vrot.lane.b32.xlu0 %v3422_v31, %s3792_s12  ;;  %v485_v39 = vpop.permute.xlu1 %484 }
 0x1f0   :  { %v503_v19 = vmul.f32 %v3979_v41, %v485_v39  ;;  %v426_v41 = vsub.f32 1.0, %v3989_v52 }
 0x1f3   :  { %v487_v47 = vpop.permute.xlu1 %486 }
 0x1f4   :  { %v504_v22 = vmul.f32 %v3983_v42, %v487_v47 }
 0x249   :  { %v436_v40 = vpop.permute.xlu0 %435 }
 0x24a   :  { %v459_v7 = vmul.f32 %v436_v40, %v419_v0 }
 0x24c   :  { %v506_v20 = vadd.f32 %v498_v28, %v459_v7 }
 0x24d   :  { %v438_v45 = vpop.permute.xlu0 %437 }
 0x24e   :  { %v460_v55 = vmul.f32 %v438_v45, %v420_v48 }
 0x250   :  { %v507_v1 = vadd.f32 %v499_v59, %v460_v55 }
 0x251   :  { %v440_v53 = vpop.permute.xlu0 %439 }
 0x252   :  { %v461_v56 = vmul.f32 %v440_v53, %v421_v50  ;;  %v522_v13 = vrot.slane %v507_v1, 7 }
 0x253   :  { %v442_v58 = vpop.permute.xlu1 %441 }
 0x254   :  { %v462_v2 = vmul.f32 %v442_v58, %v422_v61  ;;  %v508_v4 = vadd.f32 %v500_v62, %v461_v56  ;;  %v524_v26 = vsel %vm523_vm2, %v522_v13, %v506_v20 }
 0x255   :  { %v444_v63 = vpop.permute.xlu0 %443 }
 0x256   :  { %v463_v11 = vmul.f32 %v444_v63, %v423_v5  ;;  %v509_v16 = vadd.f32 %v501_v6, %v462_v2  ;;  %v525_v18 = vrot.slane %v508_v4, 6 }
 0x257   :  { %v489_v36 = vpop.permute.xlu1 %488 }
 0x258   :  { %v510_v24 = vadd.f32 %v502_v17, %v463_v11  ;;  %v528_v21 = vrot.slane %v509_v16, 5  ;;  %v527_v30 = vsel %vm526_vm3, %v525_v18, %v524_v26  ;;  %v505_v42 = vmul.f32 %v3989_v52, %v489_v36 }
 0x259   :  { %v446_v12 = vpop.permute.xlu0 %445 }
 0x25a   :  { %v464_v32 = vmul.f32 %v446_v12, %v424_v10  ;;  %v531_v33 = vrot.slane %v510_v24, 4  ;;  %v530_v37 = vsel %vm529_vm4, %v528_v21, %v527_v30 }
 0x25c   :  { %v511_v27 = vadd.f32 %v503_v19, %v464_v32  ;;  %v533_v45 = vsel %vm532_vm5, %v531_v33, %v530_v37 }
 0x25d   :  { %v448_v25 = vpop.permute.xlu0 %447 }
 0x25e   :  { %v465_v29 = vmul.f32 %v448_v25, %v425_v35  ;;  %v534_v38 = vrot.slane %v511_v27, 3 }
 0x260   :  { %v512_v31 = vadd.f32 %v504_v22, %v465_v29  ;;  %v536_v48 = vsel %vm535_vm6, %v534_v38, %v533_v45 }
 0x261   :  { %v450_v34 = vpop.permute.xlu0 %449 }
 0x262   :  { %v466_v15 = vmul.f32 %v450_v34, %v426_v41  ;;  %v537_v39 = vrot.slane %v512_v31, 2 }
 0x264   :  { %v513_v40 = vadd.f32 %v505_v42, %v466_v15  ;;  %v539_v50 = vsel %vm538_vm7, %v537_v39, %v536_v48 }
 0x266   :  { %v540_v47 = vrot.slane %v513_v40, 1 }
 0x268   :  { %v542_v53 = vsel %vm541_vm8, %v540_v47, %v539_v50 }
 0x269   :  { %543 = vrot.lane.b32.xlu0 %v542_v53, %s3792_s12 }
 0x2db   :  { %v544_v55 = vpop.permute.xlu0 %543 }
 0x2dc   :  { %546 = vst.msk [vmem:[#allocation2] sm:$0xff] %vm31_vm0, %v544_v55 }
 0x2e3   :  { %v4050_v52 = vld [vmem:[#allocation2] sm:$0xff] }
 0x2e4   :  { %3244 = vmatmul.mubr.msk.f32.vlgmr.msra.gmra.mrb[2].mxu1 %vm31_vm0, %v4050_v52 }
 0x2e5   :  { %3340 = vmatpush3.bf16.msra.mxu1 %v3855_v9  ;;  %3265 = vmatprep.mubr.msk.f32.mxu1 %vm3789_vm1, %v3788_v8 }
 0x2e6   :  { %3341 = vmatprep.subr.bf16.mxu1 %v3787_v3 }
 0x2e9   :  { %3343 = vmatpush3.bf16.msra.mxu1 %v3870_v14 }
 0x2ea   :  { %3350 = vmatprep.subr.bf16.mxu1 %v3787_v3 }
 0x3b7   :  { %v617_v56 = vpop.f32.mrb[2].mxu1 }
 0x3b8   :  { %v618_v58 = vadd.f32 %v3923_v23, %v617_v56  ;;  %v3245_v59 = vpop.f32.mrb[3].mxu1 }
 0x3ba   :  { %695 = vrot.lane.b32.xlu1 %v618_v58, %s3790_s10  ;;  %v623_v61 = vrot.slane %v618_v58, 1  ;;  %v622_v62 = vrot.slane %v618_v58, 7  ;;  %v624_v63 = vrot.slane %v618_v58, 2  ;;  %v625_v0 = vrot.slane %v618_v58, 3 }
 0x3bb   :  { %v626_v1 = vrot.slane %v618_v58, 4  ;;  %v627_v2 = vrot.slane %v618_v58, 5  ;;  %v628_v4 = vrot.slane %v618_v58, 6  ;;  %v638_v5 = vadd.f32 %v618_v58, %v3939_v44 }
 0x3bc   :  { %697 = vrot.lane.b32.xlu0 %v623_v61, %s3790_s10  ;;  %v639_v6 = vadd.f32 %v623_v61, %v3942_v46  ;;  %v637_v7 = vadd.f32 %v622_v62, %v3937_v43  ;;  %v640_v12 = vadd.f32 %v624_v63, %v3945_v49  ;;  %v641_v13 = vadd.f32 %v625_v0, %v3948_v51 }
 0x3bd   :  { %v3089_v10 = vmul.f32 -1.442695, %v638_v5  ;;  %v642_v32 = vadd.f32 %v626_v1, %v3951_v54  ;;  %v643_v18 = vadd.f32 %v627_v2, %v3954_v57  ;;  %v644_v20 = vadd.f32 %v628_v4, %v3957_v60 }
 0x3be   :  { %693 = vrot.lane.b32.xlu1 %v622_v62, %s3790_s10  ;;  %v3090_v11 = vmul.f32 -1.442695, %v639_v6  ;;  %v3088_v28 = vmul.f32 -1.442695, %v637_v7  ;;  %v3091_v16 = vmul.f32 -1.442695, %v640_v12 }
 0x3bf   :  { %3423 = vpow2.f32 %v3089_v10  ;;  %v3092_v17 = vmul.f32 -1.442695, %v641_v13  ;;  %v3093_v19 = vmul.f32 -1.442695, %v642_v32  ;;  %v3094_v35 = vmul.f32 -1.442695, %v643_v18 }
 0x3c0   :  { %699 = vrot.lane.b32.xlu0 %v624_v63, %s3790_s10  ;;  %3425 = vpow2.f32 %v3090_v11  ;;  %v3095_v24 = vmul.f32 -1.442695, %v644_v20  ;;  %v822_v13 = vrot.slane %v4050_v52, 1  ;;  %v824_v32 = vrot.slane %v4050_v52, 3 }
 0x3c1   :  { %3427 = vpow2.f32 %v3088_v28  ;;  %v821_v28 = vrot.slane %v4050_v52, 7  ;;  %v826_v18 = vrot.slane %v4050_v52, 5 }
 0x3c2   :  { %701 = vrot.lane.b32.xlu1 %v625_v0, %s3790_s10  ;;  %3429 = vpow2.f32 %v3091_v16  ;;  %v823_v16 = vrot.slane %v4050_v52, 2 }
 0x3c3   :  { %3431 = vpow2.f32 %v3092_v17  ;;  %v825_v17 = vrot.slane %v4050_v52, 4 }
 0x3c4   :  { %703 = vrot.lane.b32.xlu0 %v626_v1, %s3790_s10  ;;  %3433 = vpow2.f32 %v3093_v19 }
 0x3c5   :  { %3435 = vpow2.f32 %v3094_v35 }
 0x3c6   :  { %705 = vrot.lane.b32.xlu1 %v627_v2, %s3790_s10  ;;  %3437 = vpow2.f32 %v3095_v24 }
 0x3c8   :  { %707 = vrot.lane.b32.xlu0 %v628_v4, %s3790_s10 }
 0x3c9   :  { %v3424_v22 = vpop.eup %3423 }
 0x3ca   :  { %v3426_v25 = vpop.eup %3425  ;;  %v670_v26 = vadd.f32 1.0, %v3424_v22 }
 0x3cb   :  { %v3428_v21 = vpop.eup %3427  ;;  %v671_v27 = vadd.f32 1.0, %v3426_v25 }
 0x3cc   :  { %v3430_v29 = vpop.eup %3429  ;;  %v669_v30 = vadd.f32 1.0, %v3428_v21  ;;  %3439 = vrcp.f32 %v670_v26 }
 0x3cd   :  { %v3432_v36 = vpop.eup %3431  ;;  %3441 = vrcp.f32 %v671_v27  ;;  %v672_v31 = vadd.f32 1.0, %v3430_v29 }
 0x3ce   :  { %v3434_v41 = vpop.eup %3433  ;;  %3443 = vrcp.f32 %v669_v30  ;;  %v673_v33 = vadd.f32 1.0, %v3432_v36 }
 0x3cf   :  { %v3436_v34 = vpop.eup %3435  ;;  %3445 = vrcp.f32 %v672_v31  ;;  %v674_v37 = vadd.f32 1.0, %v3434_v41 }
 0x3d0   :  { %v3438_v42 = vpop.eup %3437  ;;  %3447 = vrcp.f32 %v673_v33  ;;  %v675_v38 = vadd.f32 1.0, %v3436_v34 }
 0x3d1   :  { %3449 = vrcp.f32 %v674_v37  ;;  %v676_v39 = vadd.f32 1.0, %v3438_v42 }
 0x3d2   :  { %3451 = vrcp.f32 %v675_v38 }
 0x3d3   :  { %3453 = vrcp.f32 %v676_v39  ;;  %v827_v39 = vrot.slane %v4050_v52, 6 }
 0x3d6   :  { %v4077_v15 = vpop.eup %3439 }
 0x3d7   :  { %v4080_v47 = vpop.eup %3441 }
 0x3d8   :  { %v4084_v53 = vpop.eup %3443 }
 0x3d9   :  { %v4088_v58 = vpop.eup %3445 }
 0x3da   :  { %v4092_v62 = vpop.eup %3447 }
 0x3db   :  { %v4096_v1 = vpop.eup %3449 }
 0x3dc   :  { %v4100_v5 = vpop.eup %3451 }
 0x3dd   :  { %v4104_v10 = vpop.eup %3453 }
 0x42c   :  { %v696_v40 = vpop.permute.xlu1 %695 }
 0x42d   :  { %v718_v45 = vmul.f32 %v4077_v15, %v696_v40 }
 0x42e   :  { %v698_v48 = vpop.permute.xlu0 %697 }
 0x42f   :  { %v719_v50 = vmul.f32 %v4080_v47, %v698_v48  ;;  %735 = vrot.lane.b32.xlu1 %v718_v45, %s3790_s10 }
 0x430   :  { %v694_v55 = vpop.permute.xlu1 %693 }
 0x431   :  { %v717_v56 = vmul.f32 %v4084_v53, %v694_v55  ;;  %737 = vrot.lane.b32.xlu0 %v719_v50, %s3790_s10 }
 0x432   :  { %v700_v59 = vpop.permute.xlu0 %699 }
 0x433   :  { %v720_v61 = vmul.f32 %v4088_v58, %v700_v59  ;;  %733 = vrot.lane.b32.xlu1 %v717_v56, %s3790_s10 }
 0x434   :  { %v702_v63 = vpop.permute.xlu1 %701 }
 0x435   :  { %v721_v0 = vmul.f32 %v4092_v62, %v702_v63  ;;  %739 = vrot.lane.b32.xlu0 %v720_v61, %s3790_s10 }
 0x436   :  { %v704_v2 = vpop.permute.xlu0 %703 }
 0x437   :  { %v722_v4 = vmul.f32 %v4096_v1, %v704_v2  ;;  %741 = vrot.lane.b32.xlu1 %v721_v0, %s3790_s10 }
 0x438   :  { %v706_v6 = vpop.permute.xlu1 %705 }
 0x439   :  { %v723_v7 = vmul.f32 %v4100_v5, %v706_v6  ;;  %743 = vrot.lane.b32.xlu0 %v722_v4, %s3790_s10  ;;  %v774_v6 = vsub.f32 1.0, %v4077_v15 }
 0x43a   :  { %v708_v11 = vpop.permute.xlu0 %707 }
 0x43b   :  { %v724_v12 = vmul.f32 %v4104_v10, %v708_v11  ;;  %745 = vrot.lane.b32.xlu1 %v723_v7, %s3790_s10 }
 0x43d   :  { %747 = vrot.lane.b32.xlu0 %v724_v12, %s3790_s10  ;;  %v773_v12 = vsub.f32 1.0, %v4084_v53 }
 0x43f   :  { %828 = vrot.lane.b32.xlu1 %v821_v28, %s3791_s3 }
 0x441   :  { %830 = vrot.lane.b32.xlu0 %v4050_v52, %s3791_s3 }
 0x445   :  { %832 = vrot.lane.b32.xlu0 %v822_v13, %s3791_s3  ;;  %v775_v13 = vsub.f32 1.0, %v4080_v47 }
 0x449   :  { %834 = vrot.lane.b32.xlu0 %v823_v16, %s3791_s3 }
 0x44d   :  { %836 = vrot.lane.b32.xlu0 %v824_v32, %s3791_s3 }
 0x451   :  { %838 = vrot.lane.b32.xlu0 %v825_v17, %s3791_s3 }
 0x455   :  { %840 = vrot.lane.b32.xlu0 %v826_v18, %s3791_s3 }
 0x4a1   :  { %v736_v19 = vpop.permute.xlu1 %735 }
 0x4a2   :  { %v758_v20 = vadd.f32 %v736_v19, %v3939_v44  ;;  %v777_v19 = vsub.f32 1.0, %v4092_v62 }
 0x4a3   :  { %v738_v35 = vpop.permute.xlu0 %737 }
 0x4a4   :  { %3455 = vtanh.f32 %v758_v20  ;;  %v759_v22 = vadd.f32 %v738_v35, %v3942_v46 }
 0x4a5   :  { %v734_v24 = vpop.permute.xlu1 %733 }
 0x4a6   :  { %3457 = vtanh.f32 %v759_v22  ;;  %v757_v26 = vadd.f32 %v734_v24, %v3937_v43  ;;  %v776_v22 = vsub.f32 1.0, %v4088_v58 }
 0x4a7   :  { %v740_v25 = vpop.permute.xlu0 %739 }
 0x4a8   :  { %v760_v21 = vadd.f32 %v740_v25, %v3945_v49 }
 0x4a9   :  { %v742_v27 = vpop.permute.xlu1 %741 }
 0x4aa   :  { %3459 = vtanh.f32 %v760_v21  ;;  %v761_v29 = vadd.f32 %v742_v27, %v3948_v51 }
 0x4ab   :  { %3461 = vtanh.f32 %v757_v26  ;;  %v744_v30 = vpop.permute.xlu0 %743 }
 0x4ac   :  { %3463 = vtanh.f32 %v761_v29  ;;  %v762_v31 = vadd.f32 %v744_v30, %v3951_v54 }
 0x4ad   :  { %v746_v41 = vpop.permute.xlu1 %745 }
 0x4ae   :  { %v3456_v36 = vpop.eup %3455  ;;  %3465 = vtanh.f32 %v762_v31  ;;  %v763_v37 = vadd.f32 %v746_v41, %v3954_v57 }
 0x4af   :  { %791 = vrot.lane.b32.xlu1 %v3456_v36, %s3792_s12  ;;  %v748_v42 = vpop.permute.xlu0 %747 }
 0x4b0   :  { %v3458_v33 = vpop.eup %3457  ;;  %3467 = vtanh.f32 %v763_v37  ;;  %v764_v40 = vadd.f32 %v748_v42, %v3957_v60 }
 0x4b1   :  { %v829_v63 = vpop.permute.xlu1 %828 }
 0x4b2   :  { %3469 = vtanh.f32 %v764_v40  ;;  %v852_v20 = vmul.f32 %v4084_v53, %v829_v63 }
 0x4b3   :  { %793 = vrot.lane.b32.xlu1 %v3458_v33, %s3792_s12  ;;  %v831_v56 = vpop.permute.xlu0 %830 }
 0x4b4   :  { %v3460_v34 = vpop.eup %3459  ;;  %v853_v16 = vmul.f32 %v4077_v15, %v831_v56  ;;  %v778_v15 = vsub.f32 1.0, %v4096_v1 }
 0x4b5   :  { %795 = vrot.lane.b32.xlu0 %v3460_v34, %s3792_s12  ;;  %v3462_v38 = vpop.eup %3461 }
 0x4b6   :  { %v3464_v45 = vpop.eup %3463 }
 0x4b7   :  { %789 = vrot.lane.b32.xlu1 %v3462_v38, %s3792_s12  ;;  %v833_v52 = vpop.permute.xlu0 %832 }
 0x4b8   :  { %v3466_v48 = vpop.eup %3465  ;;  %v854_v25 = vmul.f32 %v4080_v47, %v833_v52  ;;  %v780_v52 = vsub.f32 1.0, %v4104_v10 }
 0x4b9   :  { %842 = vrot.lane.b32.xlu0 %v827_v39, %s3791_s3  ;;  %v779_v39 = vsub.f32 1.0, %v4100_v5 }
 0x4ba   :  { %v3468_v50 = vpop.eup %3467 }
 0x4bb   :  { %797 = vrot.lane.b32.xlu1 %v3464_v45, %s3792_s12  ;;  %v835_v59 = vpop.permute.xlu0 %834 }
 0x4bc   :  { %v3470_v55 = vpop.eup %3469  ;;  %v855_v36 = vmul.f32 %v4088_v58, %v835_v59 }
 0x4bf   :  { %799 = vrot.lane.b32.xlu1 %v3466_v48, %s3792_s12  ;;  %v837_v61 = vpop.permute.xlu0 %836 }
 0x4c0   :  { %v856_v29 = vmul.f32 %v4092_v62, %v837_v61 }
 0x4c3   :  { %801 = vrot.lane.b32.xlu1 %v3468_v50, %s3792_s12  ;;  %v839_v2 = vpop.permute.xlu0 %838 }
 0x4c4   :  { %v857_v53 = vmul.f32 %v4096_v1, %v839_v2 }
 0x4c7   :  { %803 = vrot.lane.b32.xlu1 %v3470_v55, %s3792_s12  ;;  %v841_v7 = vpop.permute.xlu0 %840 }
 0x4c8   :  { %v858_v62 = vmul.f32 %v4100_v5, %v841_v7 }
 0x521   :  { %v792_v0 = vpop.permute.xlu1 %791 }
 0x522   :  { %v814_v11 = vmul.f32 %v792_v0, %v774_v6 }
 0x524   :  { %v861_v35 = vadd.f32 %v853_v16, %v814_v11 }
 0x525   :  { %v794_v4 = vpop.permute.xlu1 %793 }
 0x526   :  { %v815_v17 = vmul.f32 %v794_v4, %v775_v13  ;;  %v876_v31 = vrot.slane %v861_v35, 7 }
 0x527   :  { %v796_v18 = vpop.permute.xlu0 %795 }
 0x528   :  { %v816_v21 = vmul.f32 %v796_v18, %v776_v22  ;;  %v862_v30 = vadd.f32 %v854_v25, %v815_v17 }
 0x529   :  { %v790_v28 = vpop.permute.xlu1 %789 }
 0x52a   :  { %v813_v32 = vmul.f32 %v790_v28, %v773_v12  ;;  %v863_v37 = vadd.f32 %v855_v36, %v816_v21  ;;  %v878_v47 = vrot.slane %v862_v30, 6 }
 0x52b   :  { %v843_v55 = vpop.permute.xlu0 %842 }
 0x52c   :  { %v860_v27 = vadd.f32 %v852_v20, %v813_v32  ;;  %v880_v50 = vrot.slane %v863_v37, 5  ;;  %v859_v63 = vmul.f32 %v4104_v10, %v843_v55 }
 0x52d   :  { %v798_v24 = vpop.permute.xlu1 %797 }
 0x52e   :  { %v817_v26 = vmul.f32 %v798_v24, %v777_v19  ;;  %v877_v42 = vsel %vm526_vm3, %v876_v31, %v860_v27 }
 0x52f   :  { %v879_v45 = vsel %vm529_vm4, %v878_v47, %v877_v42 }
 0x530   :  { %v864_v33 = vadd.f32 %v856_v29, %v817_v26  ;;  %v881_v61 = vsel %vm532_vm5, %v880_v50, %v879_v45 }
 0x531   :  { %v800_v41 = vpop.permute.xlu1 %799 }
 0x532   :  { %v818_v34 = vmul.f32 %v800_v41, %v778_v15  ;;  %v882_v48 = vrot.slane %v864_v33, 4 }
 0x534   :  { %v865_v38 = vadd.f32 %v857_v53, %v818_v34  ;;  %v883_v4 = vsel %vm535_vm6, %v882_v48, %v881_v61 }
 0x535   :  { %v802_v40 = vpop.permute.xlu1 %801 }
 0x536   :  { %v819_v58 = vmul.f32 %v802_v40, %v779_v39  ;;  %v884_v56 = vrot.slane %v865_v38, 3 }
 0x538   :  { %v866_v1 = vadd.f32 %v858_v62, %v819_v58  ;;  %v885_v5 = vsel %vm538_vm7, %v884_v56, %v883_v4 }
 0x539   :  { %v804_v59 = vpop.permute.xlu1 %803 }
 0x53a   :  { %v886_v0 = vrot.slane %v866_v1, 2  ;;  %v820_v2 = vmul.f32 %v804_v59, %v780_v52 }
 0x53c   :  { %v867_v6 = vadd.f32 %v859_v63, %v820_v2  ;;  %v887_v7 = vsel %vm541_vm8, %v886_v0, %v885_v5 }
 0x53d   :  { %889 = vrot.lane.b32.xlu1 %v887_v7, %s3792_s12 }
 0x53e   :  { %v888_v11 = vrot.slane %v867_v6, 1 }
 0x540   :  { %891 = vrot.lane.b32.xlu0 %v888_v11, %s3792_s12 }
 0x5af   :  { %v890_v12 = vpop.permute.xlu1 %889 }
 0x5b0   :  { %896 = vst.msk [vmem:[#allocation2 - $0x1] sm:$0xfe] %vm895_vm9, %v890_v12  ;;  %vm1951_vm9 = vcmask 261124  }
 0x5b2   :  { %v892_v28 = vpop.permute.xlu0 %891 }
 0x5b3   :  { %898 = vst.msk [vmem:[#allocation2 + $0x7] sm:$0x1] %vm897_vm10, %v892_v28  ;;  %vm2303_vm10 = vcmask 261125  }
 0x5ba   :  { %v4165_v10 = vld [vmem:[#allocation2] sm:$0xff] }
 0x5bb   :  { %3255 = vmatmul.mubr.msk.f32.vlgmr.msra.gmra.mrb[8].mxu0 %vm31_vm0, %v4165_v10 }
 0x5bc   :  { %3346 = vmatpush3.bf16.msra.mxu0 %v3855_v9  ;;  %3276 = vmatprep.mubr.msk.f32.mxu0 %vm3789_vm1, %v3788_v8 }
 0x5bd   :  { %3347 = vmatprep.subr.bf16.mxu0 %v3787_v3 }
 0x5c0   :  { %3349 = vmatpush3.bf16.msra.mxu0 %v3870_v14 }
 0x5c1   :  { %3356 = vmatprep.subr.bf16.mxu0 %v3787_v3 }
 0x68e   :  { %v969_v13 = vpop.f32.mrb[8].mxu0 }
 0x68f   :  { %v970_v16 = vadd.f32 %v3923_v23, %v969_v13  ;;  %v3256_v32 = vpop.f32.mrb[9].mxu0 }
 0x691   :  { %1049 = vrot.lane.b32.xlu0 %v970_v16, %s3790_s10  ;;  %v975_v17 = vrot.slane %v970_v16, 7  ;;  %v976_v18 = vrot.slane %v970_v16, 1  ;;  %v974_v19 = vrot.slane %v970_v16, 6  ;;  %v978_v20 = vrot.slane %v970_v16, 3 }
 0x692   :  { %v977_v35 = vrot.slane %v970_v16, 2  ;;  %v980_v22 = vrot.slane %v970_v16, 5  ;;  %v979_v23 = vrot.slane %v970_v16, 4  ;;  %v991_v24 = vadd.f32 %v970_v16, %v3942_v46 }
 0x693   :  { %1047 = vrot.lane.b32.xlu1 %v975_v17, %s3790_s10  ;;  %v990_v25 = vadd.f32 %v975_v17, %v3939_v44  ;;  %v992_v26 = vadd.f32 %v976_v18, %v3945_v49  ;;  %v989_v29 = vadd.f32 %v974_v19, %v3937_v43  ;;  %v994_v15 = vadd.f32 %v978_v20, %v3951_v54 }
 0x694   :  { %v3099_v21 = vmul.f32 -1.442695, %v991_v24  ;;  %v993_v31 = vadd.f32 %v977_v35, %v3948_v51  ;;  %v996_v53 = vadd.f32 %v980_v22, %v3957_v60  ;;  %v995_v34 = vadd.f32 %v979_v23, %v3954_v57 }
 0x695   :  { %1051 = vrot.lane.b32.xlu0 %v976_v18, %s3790_s10  ;;  %v3098_v27 = vmul.f32 -1.442695, %v990_v25  ;;  %v3100_v30 = vmul.f32 -1.442695, %v992_v26  ;;  %v3097_v36 = vmul.f32 -1.442695, %v989_v29 }
 0x696   :  { %3471 = vpow2.f32 %v3099_v21  ;;  %v3102_v41 = vmul.f32 -1.442695, %v994_v15  ;;  %v3101_v33 = vmul.f32 -1.442695, %v993_v31  ;;  %v3104_v37 = vmul.f32 -1.442695, %v996_v53 }
 0x697   :  { %1045 = vrot.lane.b32.xlu1 %v974_v19, %s3790_s10  ;;  %3473 = vpow2.f32 %v3098_v27  ;;  %v3103_v47 = vmul.f32 -1.442695, %v995_v34  ;;  %v1174_v29 = vrot.slane %v4165_v10, 7  ;;  %v1175_v15 = vrot.slane %v4165_v10, 1 }
 0x698   :  { %3475 = vpow2.f32 %v3100_v30  ;;  %v1173_v30 = vrot.slane %v4165_v10, 6  ;;  %v1177_v31 = vrot.slane %v4165_v10, 3 }
 0x699   :  { %1055 = vrot.lane.b32.xlu0 %v978_v20, %s3790_s10  ;;  %3477 = vpow2.f32 %v3097_v36  ;;  %v1176_v36 = vrot.slane %v4165_v10, 2 }
 0x69a   :  { %3479 = vpow2.f32 %v3102_v41 }
 0x69b   :  { %1053 = vrot.lane.b32.xlu1 %v977_v35, %s3790_s10  ;;  %3481 = vpow2.f32 %v3101_v33 }
 0x69c   :  { %3483 = vpow2.f32 %v3104_v37 }
 0x69d   :  { %1059 = vrot.lane.b32.xlu0 %v980_v22, %s3790_s10  ;;  %3485 = vpow2.f32 %v3103_v47 }
 0x69f   :  { %1057 = vrot.lane.b32.xlu1 %v979_v23, %s3790_s10 }
 0x6a0   :  { %v3472_v42 = vpop.eup %3471 }
 0x6a1   :  { %v3474_v38 = vpop.eup %3473  ;;  %v1023_v39 = vadd.f32 1.0, %v3472_v42 }
 0x6a2   :  { %v3476_v40 = vpop.eup %3475  ;;  %v1022_v62 = vadd.f32 1.0, %v3474_v38 }
 0x6a3   :  { %v3478_v45 = vpop.eup %3477  ;;  %v1024_v48 = vadd.f32 1.0, %v3476_v40  ;;  %3487 = vrcp.f32 %v1023_v39 }
 0x6a4   :  { %v3480_v58 = vpop.eup %3479  ;;  %3489 = vrcp.f32 %v1022_v62  ;;  %v1021_v50 = vadd.f32 1.0, %v3478_v45 }
 0x6a5   :  { %v3482_v55 = vpop.eup %3481  ;;  %3491 = vrcp.f32 %v1024_v48  ;;  %v1026_v56 = vadd.f32 1.0, %v3480_v58 }
 0x6a6   :  { %v3484_v1 = vpop.eup %3483  ;;  %3493 = vrcp.f32 %v1021_v50  ;;  %v1025_v52 = vadd.f32 1.0, %v3482_v55 }
 0x6a7   :  { %v3486_v59 = vpop.eup %3485  ;;  %3495 = vrcp.f32 %v1026_v56  ;;  %v1028_v61 = vadd.f32 1.0, %v3484_v1 }
 0x6a8   :  { %3497 = vrcp.f32 %v1025_v52  ;;  %v1027_v0 = vadd.f32 1.0, %v3486_v59 }
 0x6a9   :  { %3499 = vrcp.f32 %v1028_v61 }
 0x6aa   :  { %3501 = vrcp.f32 %v1027_v0 }
 0x6ad   :  { %v4192_v63 = vpop.eup %3487 }
 0x6ae   :  { %v4195_v5 = vpop.eup %3489 }
 0x6af   :  { %v4199_v11 = vpop.eup %3491 }
 0x6b0   :  { %v4203_v13 = vpop.eup %3493 }
 0x6b1   :  { %v4207_v17 = vpop.eup %3495 }
 0x6b2   :  { %v4211_v20 = vpop.eup %3497 }
 0x6b3   :  { %v4215_v23 = vpop.eup %3499 }
 0x6b4   :  { %v4219_v26 = vpop.eup %3501 }
 0x703   :  { %v1050_v2 = vpop.permute.xlu0 %1049 }
 0x704   :  { %v1071_v4 = vmul.f32 %v4192_v63, %v1050_v2 }
 0x705   :  { %v1048_v6 = vpop.permute.xlu1 %1047 }
 0x706   :  { %v1070_v7 = vmul.f32 %v4195_v5, %v1048_v6  ;;  %1089 = vrot.lane.b32.xlu0 %v1071_v4, %s3790_s10  ;;  %v1179_v4 = vrot.slane %v4165_v10, 5 }
 0x707   :  { %v1052_v12 = vpop.permute.xlu0 %1051 }
 0x708   :  { %v1072_v28 = vmul.f32 %v4199_v11, %v1052_v12  ;;  %1087 = vrot.lane.b32.xlu1 %v1070_v7, %s3790_s10  ;;  %v1178_v7 = vrot.slane %v4165_v10, 4 }
 0x709   :  { %v1046_v16 = vpop.permute.xlu1 %1045 }
 0x70a   :  { %v1069_v32 = vmul.f32 %v4203_v13, %v1046_v16  ;;  %1091 = vrot.lane.b32.xlu0 %v1072_v28, %s3790_s10 }
 0x70b   :  { %v1056_v18 = vpop.permute.xlu0 %1055 }
 0x70c   :  { %v1074_v19 = vmul.f32 %v4207_v17, %v1056_v18  ;;  %1085 = vrot.lane.b32.xlu1 %v1069_v32, %s3790_s10 }
 0x70d   :  { %v1054_v35 = vpop.permute.xlu1 %1053 }
 0x70e   :  { %v1073_v22 = vmul.f32 %v4211_v20, %v1054_v35  ;;  %1095 = vrot.lane.b32.xlu0 %v1074_v19, %s3790_s10  ;;  %v1126_v35 = vsub.f32 1.0, %v4195_v5 }
 0x70f   :  { %v1060_v24 = vpop.permute.xlu0 %1059 }
 0x710   :  { %v1076_v25 = vmul.f32 %v4215_v23, %v1060_v24  ;;  %1093 = vrot.lane.b32.xlu1 %v1073_v22, %s3790_s10 }
 0x711   :  { %v1058_v21 = vpop.permute.xlu1 %1057 }
 0x712   :  { %v1075_v27 = vmul.f32 %v4219_v26, %v1058_v21  ;;  %1099 = vrot.lane.b32.xlu0 %v1076_v25, %s3790_s10  ;;  %v1127_v21 = vsub.f32 1.0, %v4192_v63 }
 0x714   :  { %1097 = vrot.lane.b32.xlu1 %v1075_v27, %s3790_s10 }
 0x716   :  { %1182 = vrot.lane.b32.xlu0 %v1174_v29, %s3791_s3  ;;  %v1125_v29 = vsub.f32 1.0, %v4203_v13 }
 0x718   :  { %1180 = vrot.lane.b32.xlu1 %v1173_v30, %s3791_s3 }
 0x71a   :  { %1184 = vrot.lane.b32.xlu0 %v4165_v10, %s3791_s3 }
 0x71e   :  { %1186 = vrot.lane.b32.xlu0 %v1175_v15, %s3791_s3 }
 0x722   :  { %1188 = vrot.lane.b32.xlu0 %v1176_v36, %s3791_s3 }
 0x726   :  { %1190 = vrot.lane.b32.xlu0 %v1177_v31, %s3791_s3  ;;  %v1128_v31 = vsub.f32 1.0, %v4199_v11 }
 0x778   :  { %v1090_v41 = vpop.permute.xlu0 %1089 }
 0x779   :  { %v1111_v53 = vadd.f32 %v1090_v41, %v3942_v46 }
 0x77a   :  { %v1088_v33 = vpop.permute.xlu1 %1087 }
 0x77b   :  { %3503 = vtanh.f32 %v1111_v53  ;;  %v1110_v34 = vadd.f32 %v1088_v33, %v3939_v44 }
 0x77c   :  { %v1092_v37 = vpop.permute.xlu0 %1091 }
 0x77d   :  { %v1112_v42 = vadd.f32 %v1092_v37, %v3945_v49  ;;  %3505 = vtanh.f32 %v1110_v34 }
 0x77e   :  { %v1086_v47 = vpop.permute.xlu1 %1085 }
 0x77f   :  { %3507 = vtanh.f32 %v1112_v42  ;;  %v1109_v38 = vadd.f32 %v1086_v47, %v3937_v43  ;;  %v1129_v42 = vsub.f32 1.0, %v4211_v20 }
 0x780   :  { %v1096_v39 = vpop.permute.xlu0 %1095 }
 0x781   :  { %3509 = vtanh.f32 %v1109_v38  ;;  %v1114_v58 = vadd.f32 %v1096_v39, %v3951_v54 }
 0x782   :  { %v1094_v40 = vpop.permute.xlu1 %1093 }
 0x783   :  { %v1113_v62 = vadd.f32 %v1094_v40, %v3948_v51 }
 0x784   :  { %v1100_v56 = vpop.permute.xlu0 %1099 }
 0x785   :  { %v3504_v45 = vpop.eup %3503  ;;  %3511 = vtanh.f32 %v1113_v62  ;;  %v1116_v52 = vadd.f32 %v1100_v56, %v3957_v60 }
 0x786   :  { %1145 = vrot.lane.b32.xlu1 %v3504_v45, %s3792_s12  ;;  %v1098_v48 = vpop.permute.xlu1 %1097 }
 0x787   :  { %v1115_v50 = vadd.f32 %v1098_v48, %v3954_v57  ;;  %v3506_v55 = vpop.eup %3505 }
 0x788   :  { %v1183_v12 = vpop.permute.xlu0 %1182 }
 0x789   :  { %v3508_v1 = vpop.eup %3507  ;;  %3513 = vtanh.f32 %v1115_v50  ;;  %v1205_v27 = vmul.f32 %v4195_v5, %v1183_v12  ;;  %v1130_v50 = vsub.f32 1.0, %v4207_v17 }
 0x78a   :  { %1147 = vrot.lane.b32.xlu0 %v3508_v1, %s3792_s12  ;;  %1143 = vrot.lane.b32.xlu1 %v3506_v55, %s3792_s12  ;;  %3515 = vtanh.f32 %v1114_v58  ;;  %v1181_v32 = vpop.permute.xlu1 %1180 }
 0x78b   :  { %v3510_v59 = vpop.eup %3509  ;;  %3517 = vtanh.f32 %v1116_v52  ;;  %v1204_v36 = vmul.f32 %v4203_v13, %v1181_v32 }
 0x78c   :  { %v1185_v28 = vpop.permute.xlu0 %1184 }
 0x78d   :  { %v1206_v33 = vmul.f32 %v4192_v63, %v1185_v28  ;;  %v1131_v28 = vsub.f32 1.0, %v4219_v26 }
 0x78e   :  { %1141 = vrot.lane.b32.xlu1 %v3510_v59, %s3792_s12 }
 0x78f   :  { %v3512_v61 = vpop.eup %3511 }
 0x790   :  { %v1187_v16 = vpop.permute.xlu0 %1186 }
 0x791   :  { %v1207_v5 = vmul.f32 %v4199_v11, %v1187_v16 }
 0x792   :  { %1149 = vrot.lane.b32.xlu1 %v3512_v61, %s3792_s12 }
 0x793   :  { %v3514_v0 = vpop.eup %3513 }
 0x794   :  { %1153 = vrot.lane.b32.xlu0 %v3514_v0, %s3792_s12  ;;  %v3516_v2 = vpop.eup %3515  ;;  %v1189_v18 = vpop.permute.xlu0 %1188 }
 0x795   :  { %v3518_v6 = vpop.eup %3517  ;;  %v1208_v39 = vmul.f32 %v4211_v20, %v1189_v18  ;;  %v1132_v20 = vsub.f32 1.0, %v4215_v23 }
 0x796   :  { %1151 = vrot.lane.b32.xlu1 %v3516_v2, %s3792_s12 }
 0x798   :  { %1194 = vrot.lane.b32.xlu0 %v1179_v4, %s3791_s3  ;;  %v1191_v22 = vpop.permute.xlu0 %1190 }
 0x799   :  { %v1209_v56 = vmul.f32 %v4207_v17, %v1191_v22 }
 0x79a   :  { %1155 = vrot.lane.b32.xlu1 %v3518_v6, %s3792_s12 }
 0x79e   :  { %1192 = vrot.lane.b32.xlu1 %v1178_v7, %s3791_s3 }
 0x7f8   :  { %v1146_v19 = vpop.permute.xlu1 %1145 }
 0x7f9   :  { %v1167_v10 = vmul.f32 %v1146_v19, %v1127_v21 }
 0x7fb   :  { %v1214_v47 = vadd.f32 %v1206_v33, %v1167_v10  ;;  %v4293_v10 = vld [vmem:[%s4876_s4] ss:$0 sm:$0xff] }
 0x7fc   :  { %v1144_v24 = vpop.permute.xlu1 %1143  ;;  %v1148_v30 = vpop.permute.xlu0 %1147 }
 0x7fd   :  { %v1166_v25 = vmul.f32 %v1144_v24, %v1126_v35  ;;  %v1168_v34 = vmul.f32 %v1148_v30, %v1128_v31  ;;  %v1230_v63 = vrot.slane %v1214_v47, 6 }
 0x7ff   :  { %v1213_v41 = vadd.f32 %v1205_v27, %v1166_v25  ;;  %v1215_v13 = vadd.f32 %v1207_v5, %v1168_v34 }
 0x800   :  { %v1142_v15 = vpop.permute.xlu1 %1141 }
 0x801   :  { %v1165_v53 = vmul.f32 %v1142_v15, %v1125_v29  ;;  %v1228_v40 = vrot.slane %v1213_v41, 7  ;;  %v1232_v11 = vrot.slane %v1215_v13, 5 }
 0x803   :  { %v1212_v37 = vadd.f32 %v1204_v36, %v1165_v53 }
 0x804   :  { %v1150_v38 = vpop.permute.xlu1 %1149 }
 0x805   :  { %v1169_v62 = vmul.f32 %v1150_v38, %v1129_v42  ;;  %v1229_v48 = vsel %vm529_vm4, %v1228_v40, %v1212_v37 }
 0x806   :  { %v1154_v45 = vpop.permute.xlu0 %1153  ;;  %v1231_v59 = vsel %vm532_vm5, %v1230_v63, %v1229_v48 }
 0x807   :  { %v1216_v58 = vadd.f32 %v1208_v39, %v1169_v62  ;;  %v1233_v7 = vsel %vm535_vm6, %v1232_v11, %v1231_v59  ;;  %v1171_v18 = vmul.f32 %v1154_v45, %v1131_v28 }
 0x808   :  { %v1152_v55 = vpop.permute.xlu1 %1151 }
 0x809   :  { %v1170_v1 = vmul.f32 %v1152_v55, %v1130_v50  ;;  %v1234_v52 = vrot.slane %v1216_v58, 4 }
 0x80a   :  { %v1195_v0 = vpop.permute.xlu0 %1194 }
 0x80b   :  { %v1217_v61 = vadd.f32 %v1209_v56, %v1170_v1  ;;  %v1235_v12 = vsel %vm538_vm7, %v1234_v52, %v1233_v7  ;;  %v1211_v17 = vmul.f32 %v4215_v23, %v1195_v0 }
 0x80c   :  { %v1156_v2 = vpop.permute.xlu1 %1155 }
 0x80d   :  { %v1236_v4 = vrot.slane %v1217_v61, 3  ;;  %v1172_v6 = vmul.f32 %v1156_v2, %v1132_v20 }
 0x80f   :  { %v1237_v16 = vsel %vm541_vm8, %v1236_v4, %v1235_v12  ;;  %v1219_v19 = vadd.f32 %v1211_v17, %v1172_v6 }
 0x810   :  { %1241 = vrot.lane.b32.xlu1 %v1237_v16, %s3792_s12  ;;  %v1193_v32 = vpop.permute.xlu1 %1192 }
 0x811   :  { %v1210_v35 = vmul.f32 %v4219_v26, %v1193_v32  ;;  %v1239_v24 = vrot.slane %v1219_v19, 1 }
 0x813   :  { %v1218_v22 = vadd.f32 %v1210_v35, %v1171_v18 }
 0x815   :  { %v1238_v25 = vrot.slane %v1218_v22, 2 }
 0x817   :  { %v1240_v21 = vsel %vm523_vm2, %v1239_v24, %v1238_v25 }
 0x818   :  { %1243 = vrot.lane.b32.xlu0 %v1240_v21, %s3792_s12 }
 0x882   :  { %v1242_v27 = vpop.permute.xlu1 %1241 }
 0x883   :  { %1248 = vst.msk [vmem:[#allocation2 - $0x2] sm:$0xfc] %vm1247_vm11, %v1242_v27  ;;  %vm2657_vm11 = vcmask 259072  }
 0x88a   :  { %v1244_v23 = vpop.permute.xlu0 %1243 }
 0x88b   :  { %1250 = vst.msk [vmem:[#allocation2 + $0x6] sm:$0x3] %vm1249_vm12, %v1244_v23  ;;  %vm2655_vm12 = vcmask 261126  }
 0x892   :  { %v4280_v29 = vld [vmem:[#allocation2] sm:$0xff] }
 0x893   :  { %3266 = vmatmul.mubr.msk.f32.vlgmr.msra.gmra.mrb[4].mxu1 %vm31_vm0, %v4280_v29 }
 0x894   :  { %3352 = vmatpush3.bf16.msra.mxu1 %v3855_v9  ;;  %3287 = vmatprep.mubr.msk.f32.mxu1 %vm3789_vm1, %v3788_v8 }
 0x895   :  { %3353 = vmatprep.subr.bf16.mxu1 %v3787_v3 }
 0x898   :  { %3355 = vmatpush3.bf16.msra.mxu1 %v3870_v14 }
 0x899   :  { %3362 = vmatprep.subr.bf16.mxu1 %v3787_v3 }
 0x966   :  { %v1321_v26 = vpop.f32.mrb[4].mxu1 }
 0x967   :  { %v1322_v30 = vadd.f32 %v4293_v10, %v1321_v26  ;;  %v3267_v15 = vpop.f32.mrb[5].mxu1 }
 0x969   :  { %1403 = vrot.lane.b32.xlu0 %v1322_v30, %s3790_s10  ;;  %v1327_v36 = vrot.slane %v1322_v30, 6  ;;  %v1328_v31 = vrot.slane %v1322_v30, 7  ;;  %v1326_v41 = vrot.slane %v1322_v30, 5  ;;  %v1331_v53 = vrot.slane %v1322_v30, 3 }
 0x96a   :  { %v1330_v33 = vrot.slane %v1322_v30, 2  ;;  %v1332_v34 = vrot.slane %v1322_v30, 4  ;;  %v1329_v37 = vrot.slane %v1322_v30, 1  ;;  %v1344_v42 = vadd.f32 %v1322_v30, %v3945_v49 }
 0x96b   :  { %1399 = vrot.lane.b32.xlu1 %v1327_v36, %s3790_s10  ;;  %v1342_v47 = vadd.f32 %v1327_v36, %v3939_v44  ;;  %v1343_v38 = vadd.f32 %v1328_v31, %v3942_v46  ;;  %v1341_v40 = vadd.f32 %v1326_v41, %v3937_v43  ;;  %v1347_v45 = vadd.f32 %v1331_v53, %v3954_v57 }
 0x96c   :  { %v3109_v5 = vmul.f32 -1.442695, %v1344_v42  ;;  %v1346_v48 = vadd.f32 %v1330_v33, %v3951_v54  ;;  %v1348_v50 = vadd.f32 %v1332_v34, %v3957_v60  ;;  %v1345_v55 = vadd.f32 %v1329_v37, %v3948_v51 }
 0x96d   :  { %1401 = vrot.lane.b32.xlu0 %v1328_v31, %s3790_s10  ;;  %v3107_v39 = vmul.f32 -1.442695, %v1342_v47  ;;  %v3108_v62 = vmul.f32 -1.442695, %v1343_v38  ;;  %v3106_v13 = vmul.f32 -1.442695, %v1341_v40 }
 0x96e   :  { %3519 = vpow2.f32 %v3109_v5  ;;  %v3112_v58 = vmul.f32 -1.442695, %v1347_v45  ;;  %v3111_v63 = vmul.f32 -1.442695, %v1346_v48  ;;  %v3113_v56 = vmul.f32 -1.442695, %v1348_v50 }
 0x96f   :  { %1397 = vrot.lane.b32.xlu1 %v1326_v41, %s3790_s10  ;;  %3521 = vpow2.f32 %v3107_v39  ;;  %v3110_v52 = vmul.f32 -1.442695, %v1345_v55  ;;  %v1525_v45 = vrot.slane %v4280_v29, 5  ;;  %v1529_v48 = vrot.slane %v4280_v29, 2 }
 0x970   :  { %3523 = vpow2.f32 %v3108_v62  ;;  %v1526_v62 = vrot.slane %v4280_v29, 6 }
 0x971   :  { %1409 = vrot.lane.b32.xlu0 %v1331_v53, %s3790_s10  ;;  %3525 = vpow2.f32 %v3106_v13  ;;  %v1527_v13 = vrot.slane %v4280_v29, 7 }
 0x972   :  { %3527 = vpow2.f32 %v3112_v58  ;;  %v1530_v58 = vrot.slane %v4280_v29, 3 }
 0x973   :  { %1407 = vrot.lane.b32.xlu1 %v1330_v33, %s3790_s10  ;;  %3529 = vpow2.f32 %v3111_v63 }
 0x974   :  { %3531 = vpow2.f32 %v3113_v56 }
 0x975   :  { %1411 = vrot.lane.b32.xlu0 %v1332_v34, %s3790_s10  ;;  %3533 = vpow2.f32 %v3110_v52 }
 0x977   :  { %1405 = vrot.lane.b32.xlu1 %v1329_v37, %s3790_s10 }
 0x978   :  { %v3520_v1 = vpop.eup %3519 }
 0x979   :  { %v3522_v59 = vpop.eup %3521  ;;  %v1376_v11 = vadd.f32 1.0, %v3520_v1 }
 0x97a   :  { %v3524_v61 = vpop.eup %3523  ;;  %v1374_v20 = vadd.f32 1.0, %v3522_v59 }
 0x97b   :  { %v3526_v0 = vpop.eup %3525  ;;  %v1375_v2 = vadd.f32 1.0, %v3524_v61  ;;  %3535 = vrcp.f32 %v1376_v11 }
 0x97c   :  { %v3528_v4 = vpop.eup %3527  ;;  %3537 = vrcp.f32 %v1374_v20  ;;  %v1373_v6 = vadd.f32 1.0, %v3526_v0 }
 0x97d   :  { %v3530_v7 = vpop.eup %3529  ;;  %3539 = vrcp.f32 %v1375_v2  ;;  %v1379_v12 = vadd.f32 1.0, %v3528_v4 }
 0x97e   :  { %v3532_v28 = vpop.eup %3531  ;;  %3541 = vrcp.f32 %v1373_v6  ;;  %v1378_v17 = vadd.f32 1.0, %v3530_v7 }
 0x97f   :  { %v3534_v16 = vpop.eup %3533  ;;  %3543 = vrcp.f32 %v1379_v12  ;;  %v1380_v32 = vadd.f32 1.0, %v3532_v28 }
 0x980   :  { %3545 = vrcp.f32 %v1378_v17  ;;  %v1377_v19 = vadd.f32 1.0, %v3534_v16 }
 0x981   :  { %3547 = vrcp.f32 %v1380_v32 }
 0x982   :  { %3549 = vrcp.f32 %v1377_v19 }
 0x985   :  { %v4312_v18 = vpop.eup %3535 }
 0x986   :  { %v4315_v24 = vpop.eup %3537 }
 0x987   :  { %v4319_v27 = vpop.eup %3539 }
 0x988   :  { %v4323_v30 = vpop.eup %3541 }
 0x989   :  { %v4327_v31 = vpop.eup %3543 }
 0x98a   :  { %v4331_v33 = vpop.eup %3545 }
 0x98b   :  { %v4335_v42 = vpop.eup %3547 }
 0x98c   :  { %v4339_v5 = vpop.eup %3549 }
 0x9db   :  { %v1404_v35 = vpop.permute.xlu0 %1403 }
 0x9dc   :  { %v1424_v22 = vmul.f32 %v4312_v18, %v1404_v35 }
 0x9dd   :  { %v1400_v25 = vpop.permute.xlu1 %1399 }
 0x9de   :  { %v1422_v21 = vmul.f32 %v4315_v24, %v1400_v25  ;;  %1443 = vrot.lane.b32.xlu0 %v1424_v22, %s3790_s10  ;;  %v1531_v25 = vrot.slane %v4280_v29, 4 }
 0x9df   :  { %v1402_v23 = vpop.permute.xlu0 %1401 }
 0x9e0   :  { %v1423_v26 = vmul.f32 %v4319_v27, %v1402_v23  ;;  %1439 = vrot.lane.b32.xlu1 %v1422_v21, %s3790_s10  ;;  %v1528_v23 = vrot.slane %v4280_v29, 1 }
 0x9e1   :  { %v1398_v15 = vpop.permute.xlu1 %1397 }
 0x9e2   :  { %v1421_v36 = vmul.f32 %v4323_v30, %v1398_v15  ;;  %1441 = vrot.lane.b32.xlu0 %v1423_v26, %s3790_s10 }
 0x9e3   :  { %v1410_v41 = vpop.permute.xlu0 %1409 }
 0x9e4   :  { %v1427_v53 = vmul.f32 %v4327_v31, %v1410_v41  ;;  %1437 = vrot.lane.b32.xlu1 %v1421_v36, %s3790_s10 }
 0x9e5   :  { %v1408_v34 = vpop.permute.xlu1 %1407 }
 0x9e6   :  { %v1426_v37 = vmul.f32 %v4331_v33, %v1408_v34  ;;  %1449 = vrot.lane.b32.xlu0 %v1427_v53, %s3790_s10 }
 0x9e7   :  { %v1412_v47 = vpop.permute.xlu0 %1411 }
 0x9e8   :  { %v1428_v38 = vmul.f32 %v4335_v42, %v1412_v47  ;;  %1447 = vrot.lane.b32.xlu1 %v1426_v37, %s3790_s10 }
 0x9e9   :  { %v1406_v39 = vpop.permute.xlu1 %1405 }
 0x9ea   :  { %v1425_v40 = vmul.f32 %v4339_v5, %v1406_v39  ;;  %1451 = vrot.lane.b32.xlu0 %v1428_v38, %s3790_s10 }
 0x9ec   :  { %1445 = vrot.lane.b32.xlu1 %v1425_v40, %s3790_s10  ;;  %v1483_v40 = vsub.f32 1.0, %v4327_v31 }
 0x9ee   :  { %1534 = vrot.lane.b32.xlu0 %v1526_v62, %s3791_s3  ;;  %v1478_v62 = vsub.f32 1.0, %v4315_v24 }
 0x9f0   :  { %1532 = vrot.lane.b32.xlu1 %v1525_v45, %s3791_s3 }
 0x9f2   :  { %1536 = vrot.lane.b32.xlu0 %v1527_v13, %s3791_s3 }
 0x9f4   :  { %1542 = vrot.lane.b32.xlu1 %v1529_v48, %s3791_s3 }
 0x9f6   :  { %1538 = vrot.lane.b32.xlu0 %v4280_v29, %s3791_s3  ;;  %v1477_v29 = vsub.f32 1.0, %v4323_v30 }
 0x9fa   :  { %1544 = vrot.lane.b32.xlu0 %v1530_v58, %s3791_s3 }
 0xa50   :  { %v1444_v50 = vpop.permute.xlu0 %1443 }
 0xa51   :  { %v1464_v63 = vadd.f32 %v1444_v50, %v3945_v49 }
 0xa52   :  { %v1440_v55 = vpop.permute.xlu1 %1439 }
 0xa53   :  { %3551 = vtanh.f32 %v1464_v63  ;;  %v1462_v56 = vadd.f32 %v1440_v55, %v3939_v44  ;;  %v1479_v63 = vsub.f32 1.0, %v4319_v27  ;;  %v1482_v55 = vsub.f32 1.0, %v4331_v33 }
 0xa54   :  { %v1442_v1 = vpop.permute.xlu0 %1441 }
 0xa55   :  { %3553 = vtanh.f32 %v1462_v56  ;;  %v1463_v52 = vadd.f32 %v1442_v1, %v3942_v46 }
 0xa56   :  { %v1438_v59 = vpop.permute.xlu1 %1437 }
 0xa57   :  { %3555 = vtanh.f32 %v1463_v52  ;;  %v1461_v61 = vadd.f32 %v1438_v59, %v3937_v43  ;;  %v1484_v52 = vsub.f32 1.0, %v4335_v42 }
 0xa58   :  { %v1450_v11 = vpop.permute.xlu0 %1449 }
 0xa59   :  { %v1467_v20 = vadd.f32 %v1450_v11, %v3954_v57 }
 0xa5a   :  { %v1448_v0 = vpop.permute.xlu1 %1447 }
 0xa5b   :  { %3557 = vtanh.f32 %v1467_v20  ;;  %v1466_v6 = vadd.f32 %v1448_v0, %v3951_v54 }
 0xa5c   :  { %v1452_v2 = vpop.permute.xlu0 %1451  ;;  %3559 = vtanh.f32 %v1461_v61 }
 0xa5d   :  { %v3552_v4 = vpop.eup %3551  ;;  %v1468_v7 = vadd.f32 %v1452_v2, %v3957_v60 }
 0xa5e   :  { %1499 = vrot.lane.b32.xlu0 %v3552_v4, %s3792_s12  ;;  %v1446_v12 = vpop.permute.xlu1 %1445  ;;  %v1480_v4 = vsub.f32 1.0, %v4312_v18 }
 0xa5f   :  { %v3554_v28 = vpop.eup %3553  ;;  %3561 = vtanh.f32 %v1468_v7  ;;  %v1465_v17 = vadd.f32 %v1446_v12, %v3948_v51 }
 0xa60   :  { %1495 = vrot.lane.b32.xlu1 %v3554_v28, %s3792_s12  ;;  %3563 = vtanh.f32 %v1466_v6  ;;  %v1535_v26 = vpop.permute.xlu0 %1534 }
 0xa61   :  { %v3556_v16 = vpop.eup %3555  ;;  %3565 = vtanh.f32 %v1465_v17  ;;  %v1557_v56 = vmul.f32 %v4315_v24, %v1535_v26 }
 0xa62   :  { %v1533_v36 = vpop.permute.xlu1 %1532 }
 0xa63   :  { %v1556_v2 = vmul.f32 %v4323_v30, %v1533_v36 }
 0xa64   :  { %1497 = vrot.lane.b32.xlu1 %v3556_v16, %s3792_s12  ;;  %v1537_v15 = vpop.permute.xlu0 %1536 }
 0xa65   :  { %v3558_v32 = vpop.eup %3557  ;;  %v1558_v7 = vmul.f32 %v4319_v27, %v1537_v15 }
 0xa66   :  { %1505 = vrot.lane.b32.xlu0 %v3558_v32, %s3792_s12  ;;  %v3560_v19 = vpop.eup %3559  ;;  %v1543_v53 = vpop.permute.xlu1 %1542 }
 0xa67   :  { %v1561_v11 = vmul.f32 %v4331_v33, %v1543_v53 }
 0xa68   :  { %1493 = vrot.lane.b32.xlu1 %v3560_v19, %s3792_s12  ;;  %v1539_v41 = vpop.permute.xlu0 %1538 }
 0xa69   :  { %v3562_v35 = vpop.eup %3561 }
 0xa6a   :  { %1507 = vrot.lane.b32.xlu0 %v3562_v35, %s3792_s12  ;;  %v3564_v22 = vpop.eup %3563 }
 0xa6b   :  { %v3566_v21 = vpop.eup %3565 }
 0xa6c   :  { %1503 = vrot.lane.b32.xlu1 %v3564_v22, %s3792_s12  ;;  %v1545_v34 = vpop.permute.xlu0 %1544 }
 0xa6d   :  { %v1562_v50 = vmul.f32 %v4327_v31, %v1545_v34 }
 0xa6e   :  { %1546 = vrot.lane.b32.xlu0 %v1531_v25, %s3791_s3  ;;  %v1559_v25 = vmul.f32 %v4312_v18, %v1539_v41 }
 0xa70   :  { %1501 = vrot.lane.b32.xlu1 %v3566_v21, %s3792_s12 }
 0xa74   :  { %1540 = vrot.lane.b32.xlu1 %v1528_v23, %s3791_s3  ;;  %v1481_v23 = vsub.f32 1.0, %v4339_v5 }
 0xad0   :  { %v1500_v47 = vpop.permute.xlu0 %1499 }
 0xad1   :  { %v1520_v17 = vmul.f32 %v1500_v47, %v1480_v4 }
 0xad2   :  { %v1496_v37 = vpop.permute.xlu1 %1495 }
 0xad3   :  { %v1518_v48 = vmul.f32 %v1496_v37, %v1478_v62  ;;  %v1567_v27 = vadd.f32 %v1559_v25, %v1520_v17 }
 0xad5   :  { %v1565_v31 = vadd.f32 %v1557_v56, %v1518_v48  ;;  %v1584_v41 = vrot.slane %v1567_v27, 5 }
 0xad6   :  { %v1498_v38 = vpop.permute.xlu1 %1497 }
 0xad7   :  { %v1519_v61 = vmul.f32 %v1498_v38, %v1479_v63  ;;  %v1580_v30 = vrot.slane %v1565_v31, 7 }
 0xad8   :  { %v1506_v39 = vpop.permute.xlu0 %1505 }
 0xad9   :  { %v1523_v13 = vmul.f32 %v1506_v39, %v1483_v40  ;;  %v1566_v19 = vadd.f32 %v1558_v7, %v1519_v61 }
 0xada   :  { %v1494_v45 = vpop.permute.xlu1 %1493 }
 0xadb   :  { %v1517_v1 = vmul.f32 %v1494_v45, %v1477_v29  ;;  %v1570_v20 = vadd.f32 %v1562_v50, %v1523_v13 }
 0xadc   :  { %v1508_v58 = vpop.permute.xlu0 %1507 }
 0xadd   :  { %v1524_v12 = vmul.f32 %v1508_v58, %v1484_v52  ;;  %v1564_v16 = vadd.f32 %v1556_v2, %v1517_v1  ;;  %v1589_v33 = vrot.slane %v1570_v20, 2 }
 0xade   :  { %v1504_v59 = vpop.permute.xlu1 %1503 }
 0xadf   :  { %v1522_v0 = vmul.f32 %v1504_v59, %v1482_v55  ;;  %v1581_v15 = vsel %vm532_vm5, %v1580_v30, %v1564_v16 }
 0xae0   :  { %v1547_v6 = vpop.permute.xlu0 %1546 }
 0xae1   :  { %v1569_v28 = vadd.f32 %v1561_v11, %v1522_v0  ;;  %v1563_v24 = vmul.f32 %v4335_v42, %v1547_v6  ;;  %v1582_v42 = vrot.slane %v1566_v19, 6 }
 0xae2   :  { %v1502_v32 = vpop.permute.xlu1 %1501 }
 0xae3   :  { %v1588_v35 = vrot.slane %v1569_v28, 3  ;;  %v1571_v22 = vadd.f32 %v1563_v24, %v1524_v12  ;;  %v1521_v53 = vmul.f32 %v1502_v32, %v1481_v23  ;;  %v1583_v18 = vsel %vm535_vm6, %v1582_v42, %v1581_v15 }
 0xae4   :  { %v1585_v39 = vsel %vm538_vm7, %v1584_v41, %v1583_v18 }
 0xae5   :  { %v1591_v21 = vrot.slane %v1571_v22, 1  ;;  %v1590_v26 = vsel %vm523_vm2, %v1589_v33, %v1588_v35 }
 0xae6   :  { %v1541_v36 = vpop.permute.xlu1 %1540 }
 0xae7   :  { %v1560_v34 = vmul.f32 %v4339_v5, %v1541_v36  ;;  %v1592_v37 = vsel %vm526_vm3, %v1591_v21, %v1590_v26 }
 0xae8   :  { %1595 = vrot.lane.b32.xlu0 %v1592_v37, %s3792_s12 }
 0xae9   :  { %v1568_v47 = vadd.f32 %v1560_v34, %v1521_v53 }
 0xaeb   :  { %v1586_v38 = vrot.slane %v1568_v47, 4 }
 0xaed   :  { %v1587_v40 = vsel %vm541_vm8, %v1586_v38, %v1585_v39 }
 0xaee   :  { %1593 = vrot.lane.b32.xlu1 %v1587_v40, %s3792_s12 }
 0xb5a   :  { %v1596_v62 = vpop.permute.xlu0 %1595 }
 0xb5b   :  { %1602 = vst.msk [vmem:[#allocation2 + $0x5] sm:$0x7] %vm1601_vm13, %v1596_v62 }
 0xb60   :  { %v1594_v5 = vpop.permute.xlu1 %1593 }
 0xb61   :  { %1600 = vst.msk [vmem:[#allocation2 - $0x3] sm:$0xf8] %vm1599_vm14, %v1594_v5 }
 0xb68   :  { %v4400_v45 = vld [vmem:[#allocation2] sm:$0xff] }
 0xb69   :  { %3277 = vmatmul.mubr.msk.f32.vlgmr.msra.gmra.mrb[10].mxu0 %vm31_vm0, %v4400_v45 }
 0xb6a   :  { %3358 = vmatpush3.bf16.msra.mxu0 %v3855_v9  ;;  %3298 = vmatprep.mubr.msk.f32.mxu0 %vm3789_vm1, %v3788_v8 }
 0xb6b   :  { %3359 = vmatprep.subr.bf16.mxu0 %v3787_v3 }
 0xb6e   :  { %3361 = vmatpush3.bf16.msra.mxu0 %v3870_v14 }
 0xc3c   :  { %v1673_v13 = vpop.f32.mrb[10].mxu0 }
 0xc3d   :  { %v1674_v48 = vadd.f32 %v4293_v10, %v1673_v13  ;;  %v3278_v29 = vpop.f32.mrb[11].mxu0 }
 0xc3f   :  { %1757 = vrot.lane.b32.xlu0 %v1674_v48, %s3790_s10  ;;  %v1679_v58 = vrot.slane %v1674_v48, 5  ;;  %v1680_v50 = vrot.slane %v1674_v48, 6  ;;  %v1682_v63 = vrot.slane %v1674_v48, 1  ;;  %v1678_v55 = vrot.slane %v1674_v48, 4 }
 0xc40   :  { %v1683_v56 = vrot.slane %v1674_v48, 2  ;;  %v1684_v1 = vrot.slane %v1674_v48, 3  ;;  %v1681_v52 = vrot.slane %v1674_v48, 7  ;;  %v1697_v59 = vadd.f32 %v1674_v48, %v3948_v51 }
 0xc41   :  { %1751 = vrot.lane.b32.xlu1 %v1679_v58, %s3790_s10  ;;  %v1694_v11 = vadd.f32 %v1679_v58, %v3939_v44  ;;  %v1695_v61 = vadd.f32 %v1680_v50, %v3942_v46  ;;  %v1698_v2 = vadd.f32 %v1682_v63, %v3951_v54  ;;  %v1693_v31 = vadd.f32 %v1678_v55, %v3937_v43 }
 0xc42   :  { %v3119_v20 = vmul.f32 -1.442695, %v1697_v59  ;;  %v1699_v7 = vadd.f32 %v1683_v56, %v3954_v57  ;;  %v1700_v28 = vadd.f32 %v1684_v1, %v3957_v60  ;;  %v1696_v17 = vadd.f32 %v1681_v52, %v3945_v49 }
 0xc43   :  { %1753 = vrot.lane.b32.xlu0 %v1680_v50, %s3790_s10  ;;  %v3116_v0 = vmul.f32 -1.442695, %v1694_v11  ;;  %v3117_v4 = vmul.f32 -1.442695, %v1695_v61  ;;  %v3120_v6 = vmul.f32 -1.442695, %v1698_v2 }
 0xc44   :  { %3567 = vpow2.f32 %v3119_v20  ;;  %v3115_v12 = vmul.f32 -1.442695, %v1693_v31  ;;  %v3121_v24 = vmul.f32 -1.442695, %v1699_v7  ;;  %v3122_v16 = vmul.f32 -1.442695, %v1700_v28 }
 0xc45   :  { %1759 = vrot.lane.b32.xlu1 %v1682_v63, %s3790_s10  ;;  %3569 = vpow2.f32 %v3116_v0  ;;  %v3118_v19 = vmul.f32 -1.442695, %v1696_v17  ;;  %v1881_v31 = vrot.slane %v4400_v45, 1  ;;  %v1882_v7 = vrot.slane %v4400_v45, 2 }
 0xc46   :  { %3571 = vpow2.f32 %v3117_v4  ;;  %v1878_v4 = vrot.slane %v4400_v45, 5 }
 0xc47   :  { %1749 = vrot.lane.b32.xlu0 %v1678_v55, %s3790_s10  ;;  %3573 = vpow2.f32 %v3120_v6  ;;  %v1879_v6 = vrot.slane %v4400_v45, 6 }
 0xc48   :  { %3575 = vpow2.f32 %v3115_v12  ;;  %v1877_v12 = vrot.slane %v4400_v45, 4 }
 0xc49   :  { %1761 = vrot.lane.b32.xlu1 %v1683_v56, %s3790_s10  ;;  %3577 = vpow2.f32 %v3121_v24 }
 0xc4a   :  { %3579 = vpow2.f32 %v3122_v16 }
 0xc4b   :  { %1763 = vrot.lane.b32.xlu0 %v1684_v1, %s3790_s10  ;;  %3581 = vpow2.f32 %v3118_v19 }
 0xc4d   :  { %1755 = vrot.lane.b32.xlu1 %v1681_v52, %s3790_s10 }
 0xc4e   :  { %v3568_v32 = vpop.eup %3567 }
 0xc4f   :  { %v3570_v33 = vpop.eup %3569  ;;  %v1729_v35 = vadd.f32 1.0, %v3568_v32 }
 0xc50   :  { %v3572_v22 = vpop.eup %3571  ;;  %v1726_v25 = vadd.f32 1.0, %v3570_v33 }
 0xc51   :  { %v3574_v30 = vpop.eup %3573  ;;  %v1727_v21 = vadd.f32 1.0, %v3572_v22  ;;  %3583 = vrcp.f32 %v1729_v35 }
 0xc52   :  { %v3576_v23 = vpop.eup %3575  ;;  %3585 = vrcp.f32 %v1726_v25  ;;  %v1730_v26 = vadd.f32 1.0, %v3574_v30 }
 0xc53   :  { %v3578_v27 = vpop.eup %3577  ;;  %3587 = vrcp.f32 %v1727_v21  ;;  %v1725_v15 = vadd.f32 1.0, %v3576_v23 }
 0xc54   :  { %v3580_v36 = vpop.eup %3579  ;;  %3589 = vrcp.f32 %v1730_v26  ;;  %v1731_v42 = vadd.f32 1.0, %v3578_v27 }
 0xc55   :  { %v3582_v53 = vpop.eup %3581  ;;  %3591 = vrcp.f32 %v1725_v15  ;;  %v1732_v34 = vadd.f32 1.0, %v3580_v36 }
 0xc56   :  { %3593 = vrcp.f32 %v1731_v42  ;;  %v1728_v47 = vadd.f32 1.0, %v3582_v53 }
 0xc57   :  { %3595 = vrcp.f32 %v1732_v34 }
 0xc58   :  { %3597 = vrcp.f32 %v1728_v47 }
 0xc5b   :  { %v4426_v37 = vpop.eup %3583 }
 0xc5c   :  { %v4429_v38 = vpop.eup %3585 }
 0xc5d   :  { %v4433_v62 = vpop.eup %3587 }
 0xc5e   :  { %v4437_v48 = vpop.eup %3589 }
 0xc5f   :  { %v4441_v50 = vpop.eup %3591 }
 0xc60   :  { %v4445_v56 = vpop.eup %3593 }
 0xc61   :  { %v4449_v59 = vpop.eup %3595 }
 0xc62   :  { %v4453_v20 = vpop.eup %3597 }
 0xcb1   :  { %v1758_v18 = vpop.permute.xlu0 %1757 }
 0xcb2   :  { %v1777_v41 = vmul.f32 %v4426_v37, %v1758_v18 }
 0xcb3   :  { %v1752_v39 = vpop.permute.xlu1 %1751 }
 0xcb4   :  { %v1774_v40 = vmul.f32 %v4429_v38, %v1752_v39  ;;  %1797 = vrot.lane.b32.xlu0 %v1777_v41, %s3790_s10  ;;  %v1883_v39 = vrot.slane %v4400_v45, 3 }
 0xcb5   :  { %v1754_v5 = vpop.permute.xlu0 %1753 }
 0xcb6   :  { %v1775_v13 = vmul.f32 %v4433_v62, %v1754_v5  ;;  %1791 = vrot.lane.b32.xlu1 %v1774_v40, %s3790_s10  ;;  %v1880_v5 = vrot.slane %v4400_v45, 7 }
 0xcb7   :  { %v1760_v29 = vpop.permute.xlu1 %1759 }
 0xcb8   :  { %v1778_v58 = vmul.f32 %v4437_v48, %v1760_v29  ;;  %1793 = vrot.lane.b32.xlu0 %v1775_v13, %s3790_s10 }
 0xcb9   :  { %v1750_v63 = vpop.permute.xlu0 %1749 }
 0xcba   :  { %v1773_v55 = vmul.f32 %v4441_v50, %v1750_v63  ;;  %1799 = vrot.lane.b32.xlu1 %v1778_v58, %s3790_s10 }
 0xcbb   :  { %v1762_v1 = vpop.permute.xlu1 %1761 }
 0xcbc   :  { %v1779_v52 = vmul.f32 %v4445_v56, %v1762_v1  ;;  %1789 = vrot.lane.b32.xlu0 %v1773_v55, %s3790_s10 }
 0xcbd   :  { %v1764_v11 = vpop.permute.xlu0 %1763 }
 0xcbe   :  { %v1780_v61 = vmul.f32 %v4449_v59, %v1764_v11  ;;  %1801 = vrot.lane.b32.xlu1 %v1779_v52, %s3790_s10 }
 0xcbf   :  { %v1756_v0 = vpop.permute.xlu1 %1755 }
 0xcc0   :  { %v1776_v2 = vmul.f32 %v4453_v20, %v1756_v0  ;;  %1803 = vrot.lane.b32.xlu0 %v1780_v61, %s3790_s10  ;;  %v1834_v0 = vsub.f32 1.0, %v4437_v48 }
 0xcc2   :  { %1795 = vrot.lane.b32.xlu1 %v1776_v2, %s3790_s10 }
 0xcc4   :  { %1886 = vrot.lane.b32.xlu0 %v1878_v4, %s3791_s3  ;;  %v1835_v4 = vsub.f32 1.0, %v4445_v56 }
 0xcc6   :  { %1892 = vrot.lane.b32.xlu1 %v4400_v45, %s3791_s3 }
 0xcc8   :  { %1894 = vrot.lane.b32.xlu0 %v1881_v31, %s3791_s3 }
 0xcca   :  { %1888 = vrot.lane.b32.xlu1 %v1879_v6, %s3791_s3  ;;  %v1833_v6 = vsub.f32 1.0, %v4426_v37 }
 0xccc   :  { %1896 = vrot.lane.b32.xlu0 %v1882_v7, %s3791_s3  ;;  %v1830_v7 = vsub.f32 1.0, %v4429_v38 }
 0xcd0   :  { %1884 = vrot.lane.b32.xlu0 %v1877_v12, %s3791_s3 }
 0xd26   :  { %v1798_v28 = vpop.permute.xlu0 %1797 }
 0xd27   :  { %v1817_v24 = vadd.f32 %v1798_v28, %v3948_v51 }
 0xd28   :  { %v1792_v17 = vpop.permute.xlu1 %1791 }
 0xd29   :  { %3599 = vtanh.f32 %v1817_v24  ;;  %v1814_v16 = vadd.f32 %v1792_v17, %v3939_v44 }
 0xd2a   :  { %v1794_v32 = vpop.permute.xlu0 %1793 }
 0xd2b   :  { %3601 = vtanh.f32 %v1814_v16  ;;  %v1815_v35 = vadd.f32 %v1794_v32, %v3942_v46 }
 0xd2c   :  { %v1800_v19 = vpop.permute.xlu1 %1799 }
 0xd2d   :  { %v1818_v33 = vadd.f32 %v1800_v19, %v3951_v54 }
 0xd2e   :  { %v1790_v22 = vpop.permute.xlu0 %1789 }
 0xd2f   :  { %3603 = vtanh.f32 %v1818_v33  ;;  %v1813_v21 = vadd.f32 %v1790_v22, %v3937_v43  ;;  %v1829_v22 = vsub.f32 1.0, %v4441_v50 }
 0xd30   :  { %v1802_v25 = vpop.permute.xlu1 %1801  ;;  %3605 = vtanh.f32 %v1815_v35 }
 0xd31   :  { %v1819_v30 = vadd.f32 %v1802_v25, %v3954_v57 }
 0xd32   :  { %v1804_v26 = vpop.permute.xlu0 %1803 }
 0xd33   :  { %v3600_v23 = vpop.eup %3599  ;;  %3607 = vtanh.f32 %v1819_v30  ;;  %v1820_v42 = vadd.f32 %v1804_v26, %v3957_v60  ;;  %v1831_v30 = vsub.f32 1.0, %v4433_v62 }
 0xd34   :  { %v1796_v27 = vpop.permute.xlu1 %1795  ;;  %1853 = vrot.lane.b32.xlu0 %v3600_v23, %s3792_s12  ;;  %3609 = vtanh.f32 %v1813_v21 }
 0xd35   :  { %v3602_v15 = vpop.eup %3601  ;;  %v1816_v36 = vadd.f32 %v1796_v27, %v3945_v49 }
 0xd36   :  { %1847 = vrot.lane.b32.xlu1 %v3602_v15, %s3792_s12  ;;  %v1887_v13 = vpop.permute.xlu0 %1886 }
 0xd37   :  { %3611 = vtanh.f32 %v1816_v36  ;;  %v1909_v25 = vmul.f32 %v4429_v38, %v1887_v13 }
 0xd38   :  { %3613 = vtanh.f32 %v1820_v42  ;;  %v1893_v58 = vpop.permute.xlu1 %1892 }
 0xd39   :  { %v3604_v53 = vpop.eup %3603  ;;  %v1912_v33 = vmul.f32 %v4426_v37, %v1893_v58 }
 0xd3a   :  { %1855 = vrot.lane.b32.xlu1 %v3604_v53, %s3792_s12  ;;  %v3606_v34 = vpop.eup %3605  ;;  %v1895_v29 = vpop.permute.xlu0 %1894 }
 0xd3b   :  { %v1913_v28 = vmul.f32 %v4437_v48, %v1895_v29  ;;  %v1836_v48 = vsub.f32 1.0, %v4449_v59 }
 0xd3c   :  { %v1889_v55 = vpop.permute.xlu1 %1888 }
 0xd3d   :  { %v3608_v47 = vpop.eup %3607 }
 0xd3e   :  { %1849 = vrot.lane.b32.xlu1 %v3606_v34, %s3792_s12  ;;  %1857 = vrot.lane.b32.xlu0 %v3608_v47, %s3792_s12  ;;  %v3610_v18 = vpop.eup %3609  ;;  %v1897_v63 = vpop.permute.xlu0 %1896  ;;  %v1910_v47 = vmul.f32 %v4433_v62, %v1889_v55 }
 0xd3f   :  { %v1914_v17 = vmul.f32 %v4445_v56, %v1897_v63 }
 0xd41   :  { %v3612_v41 = vpop.eup %3611 }
 0xd42   :  { %1851 = vrot.lane.b32.xlu0 %v3612_v41, %s3792_s12  ;;  %1845 = vrot.lane.b32.xlu1 %v3610_v18, %s3792_s12  ;;  %v3614_v40 = vpop.eup %3613  ;;  %v1885_v1 = vpop.permute.xlu0 %1884 }
 0xd43   :  { %v1908_v42 = vmul.f32 %v4441_v50, %v1885_v1 }
 0xd46   :  { %1898 = vrot.lane.b32.xlu0 %v1883_v39, %s3791_s3  ;;  %1859 = vrot.lane.b32.xlu1 %v3614_v40, %s3792_s12  ;;  %v1832_v39 = vsub.f32 1.0, %v4453_v20 }
 0xd4a   :  { %1890 = vrot.lane.b32.xlu1 %v1880_v5, %s3791_s3 }
 0xda6   :  { %v1854_v11 = vpop.permute.xlu0 %1853 }
 0xda7   :  { %v1873_v24 = vmul.f32 %v1854_v11, %v1833_v6 }
 0xda8   :  { %v1848_v52 = vpop.permute.xlu1 %1847 }
 0xda9   :  { %v1870_v16 = vmul.f32 %v1848_v52, %v1830_v7  ;;  %v1920_v23 = vadd.f32 %v1912_v33, %v1873_v24 }
 0xdab   :  { %v1917_v27 = vadd.f32 %v1909_v25, %v1870_v16  ;;  %v1938_v18 = vrot.slane %v1920_v23, 4 }
 0xdac   :  { %v1856_v61 = vpop.permute.xlu1 %1855 }
 0xdad   :  { %v1874_v45 = vmul.f32 %v1856_v61, %v1834_v0  ;;  %v1932_v5 = vrot.slane %v1917_v27, 7 }
 0xdaf   :  { %v1921_v35 = vadd.f32 %v1913_v28, %v1874_v45 }
 0xdb0   :  { %v1850_v2 = vpop.permute.xlu1 %1849  ;;  %v1858_v31 = vpop.permute.xlu0 %1857 }
 0xdb1   :  { %v1875_v12 = vmul.f32 %v1858_v31, %v1835_v4  ;;  %v1871_v15 = vmul.f32 %v1850_v2, %v1831_v30  ;;  %v1939_v53 = vrot.slane %v1921_v35, 3 }
 0xdb3   :  { %v1922_v21 = vadd.f32 %v1914_v17, %v1875_v12  ;;  %v1918_v13 = vadd.f32 %v1910_v47, %v1871_v15  ;;  %v1940_v50 = vsel %vm523_vm2, %v1939_v53, %v1938_v18 }
 0xdb4   :  { %v1846_v32 = vpop.permute.xlu1 %1845  ;;  %v1852_v19 = vpop.permute.xlu0 %1851 }
 0xdb5   :  { %v1869_v26 = vmul.f32 %v1846_v32, %v1829_v22  ;;  %v1941_v38 = vrot.slane %v1922_v21, 2  ;;  %v1872_v58 = vmul.f32 %v1852_v19, %v1832_v39  ;;  %v1934_v11 = vrot.slane %v1918_v13, 6 }
 0xdb7   :  { %v1916_v41 = vadd.f32 %v1908_v42, %v1869_v26  ;;  %v1942_v1 = vsel %vm526_vm3, %v1941_v38, %v1940_v50 }
 0xdb8   :  { %v1860_v56 = vpop.permute.xlu1 %1859  ;;  %v1899_v36 = vpop.permute.xlu0 %1898 }
 0xdb9   :  { %v1876_v37 = vmul.f32 %v1860_v56, %v1836_v48  ;;  %v1915_v34 = vmul.f32 %v4449_v59, %v1899_v36  ;;  %v1933_v55 = vsel %vm535_vm6, %v1932_v5, %v1916_v41 }
 0xdba   :  { %v1935_v0 = vsel %vm538_vm7, %v1934_v11, %v1933_v55 }
 0xdbb   :  { %v1923_v40 = vadd.f32 %v1915_v34, %v1876_v37 }
 0xdbc   :  { %v1891_v29 = vpop.permute.xlu1 %1890 }
 0xdbd   :  { %v1943_v63 = vrot.slane %v1923_v40, 1  ;;  %v1911_v52 = vmul.f32 %v4453_v20, %v1891_v29 }
 0xdbf   :  { %v1919_v59 = vadd.f32 %v1911_v52, %v1872_v58  ;;  %v1944_v62 = vsel %vm529_vm4, %v1943_v63, %v1942_v1 }
 0xdc0   :  { %1947 = vrot.lane.b32.xlu0 %v1944_v62, %s3792_s12 }
 0xdc1   :  { %v1936_v61 = vrot.slane %v1919_v59, 5 }
 0xdc3   :  { %v1937_v2 = vsel %vm541_vm8, %v1936_v61, %v1935_v0 }
 0xdc4   :  { %1945 = vrot.lane.b32.xlu1 %v1937_v2, %s3792_s12 }
 0xe32   :  { %v1948_v20 = vpop.permute.xlu0 %1947 }
 0xe33   :  { %1954 = vst.msk [vmem:[#allocation2 + $0x4] sm:$0xf] %vm1953_vm15, %v1948_v20 }
 0xe36   :  { %v1946_v4 = vpop.permute.xlu1 %1945 }
 0xe37   :  { %1952 = vst.msk [vmem:[#allocation2 - $0x4] sm:$0xf0] %vm1951_vm9, %v1946_v4 }
 0xe3e   :  { %v4514_v31 = vld [vmem:[#allocation2] sm:$0xff] }
 0xe3f   :  { %3288 = vmatmul.mubr.msk.f32.vlgmr.msra.gmra.mrb[6].mxu1 %vm31_vm0, %v4514_v31 }
 0xe40   :  { %3364 = vmatpush3.bf16.msra.mxu1 %v3855_v9  ;;  %3309 = vmatprep.mubr.msk.f32.mxu1 %vm3789_vm1, %v3788_v8  ;;  %vm2305_vm1 = vcmask 258048  }
 0xe41   :  { %3365 = vmatprep.subr.bf16.mxu1 %v3787_v3 }
 0xe44   :  { %3367 = vmatpush3.bf16.msra.mxu1 %v3870_v14 }
 0xf12   :  { %v2025_v6 = vpop.f32.mrb[6].mxu1 }
 0xf13   :  { %v2026_v45 = vadd.f32 %v4293_v10, %v2025_v6  ;;  %v3289_v7 = vpop.f32.mrb[7].mxu1 }
 0xf15   :  { %2111 = vrot.lane.b32.xlu1 %v2026_v45, %s3790_s10  ;;  %v2034_v12 = vrot.slane %v2026_v45, 7  ;;  %v2033_v28 = vrot.slane %v2026_v45, 6  ;;  %v2031_v9 = vrot.slane %v2026_v45, 4  ;;  %v2035_v8 = vrot.slane %v2026_v45, 1 }
 0xf16   :  { %v2032_v3 = vrot.slane %v2026_v45, 5  ;;  %v2036_v14 = vrot.slane %v2026_v45, 2  ;;  %v2030_v10 = vrot.slane %v2026_v45, 3  ;;  %v2050_v24 = vadd.f32 %v2026_v45, %v3951_v54 }
 0xf17   :  { %2109 = vrot.lane.b32.xlu0 %v2034_v12, %s3790_s10  ;;  %v2049_v17 = vadd.f32 %v2034_v12, %v3948_v51  ;;  %v2048_v16 = vadd.f32 %v2033_v28, %v3945_v49  ;;  %v2046_v33 = vadd.f32 %v2031_v9, %v3939_v44  ;;  %v2051_v22 = vadd.f32 %v2035_v8, %v3954_v57 }
 0xf18   :  { %v3129_v32 = vmul.f32 -1.442695, %v2050_v24  ;;  %v2047_v30 = vadd.f32 %v2032_v3, %v3942_v46  ;;  %v2052_v23 = vadd.f32 %v2036_v14, %v3957_v60  ;;  %v2045_v48 = vadd.f32 %v2030_v10, %v3937_v43 }
 0xf19   :  { %2107 = vrot.lane.b32.xlu1 %v2033_v28, %s3790_s10  ;;  %v3128_v19 = vmul.f32 -1.442695, %v2049_v17  ;;  %v3127_v35 = vmul.f32 -1.442695, %v2048_v16  ;;  %v3125_v25 = vmul.f32 -1.442695, %v2046_v33 }
 0xf1a   :  { %3615 = vpow2.f32 %v3129_v32  ;;  %v3130_v21 = vmul.f32 -1.442695, %v2051_v22  ;;  %v3126_v26 = vmul.f32 -1.442695, %v2047_v30  ;;  %v3131_v27 = vmul.f32 -1.442695, %v2052_v23 }
 0xf1b   :  { %2103 = vrot.lane.b32.xlu0 %v2031_v9, %s3790_s10  ;;  %3617 = vpow2.f32 %v3128_v19  ;;  %v3124_v56 = vmul.f32 -1.442695, %v2045_v48  ;;  %v2232_v17 = vrot.slane %v4514_v31, 6  ;;  %v2233_v16 = vrot.slane %v4514_v31, 7 }
 0xf1c   :  { %3619 = vpow2.f32 %v3127_v35  ;;  %v2230_v32 = vrot.slane %v4514_v31, 4  ;;  %v2231_v19 = vrot.slane %v4514_v31, 5  ;;  %v2234_v33 = vrot.slane %v4514_v31, 1 }
 0xf1d   :  { %2113 = vrot.lane.b32.xlu1 %v2035_v8, %s3790_s10  ;;  %3621 = vpow2.f32 %v3125_v25  ;;  %v2235_v35 = vrot.slane %v4514_v31, 2 }
 0xf1e   :  { %3623 = vpow2.f32 %v3130_v21 }
 0xf1f   :  { %2105 = vrot.lane.b32.xlu0 %v2032_v3, %s3790_s10  ;;  %3625 = vpow2.f32 %v3126_v26 }
 0xf20   :  { %3627 = vpow2.f32 %v3131_v27 }
 0xf21   :  { %2115 = vrot.lane.b32.xlu1 %v2036_v14, %s3790_s10  ;;  %3629 = vpow2.f32 %v3124_v56 }
 0xf23   :  { %2101 = vrot.lane.b32.xlu0 %v2030_v10, %s3790_s10 }
 0xf24   :  { %v3616_v15 = vpop.eup %3615 }
 0xf25   :  { %v3618_v36 = vpop.eup %3617  ;;  %v2082_v42 = vadd.f32 1.0, %v3616_v15 }
 0xf26   :  { %v3620_v53 = vpop.eup %3619  ;;  %v2081_v37 = vadd.f32 1.0, %v3618_v36 }
 0xf27   :  { %v3622_v34 = vpop.eup %3621  ;;  %v2080_v47 = vadd.f32 1.0, %v3620_v53  ;;  %3631 = vrcp.f32 %v2082_v42 }
 0xf28   :  { %v3624_v38 = vpop.eup %3623  ;;  %3633 = vrcp.f32 %v2081_v37  ;;  %v2078_v18 = vadd.f32 1.0, %v3622_v34 }
 0xf29   :  { %v3626_v41 = vpop.eup %3625  ;;  %3635 = vrcp.f32 %v2080_v47  ;;  %v2083_v39 = vadd.f32 1.0, %v3624_v38 }
 0xf2a   :  { %v3628_v40 = vpop.eup %3627  ;;  %3637 = vrcp.f32 %v2078_v18  ;;  %v2079_v5 = vadd.f32 1.0, %v3626_v41 }
 0xf2b   :  { %v3630_v13 = vpop.eup %3629  ;;  %3639 = vrcp.f32 %v2083_v39  ;;  %v2084_v29 = vadd.f32 1.0, %v3628_v40 }
 0xf2c   :  { %3641 = vrcp.f32 %v2079_v5  ;;  %v2077_v63 = vadd.f32 1.0, %v3630_v13 }
 0xf2d   :  { %3643 = vrcp.f32 %v2084_v29  ;;  %v2229_v29 = vrot.slane %v4514_v31, 3 }
 0xf2e   :  { %3645 = vrcp.f32 %v2077_v63 }
 0xf31   :  { %v4540_v58 = vpop.eup %3631 }
 0xf32   :  { %v4543_v1 = vpop.eup %3633 }
 0xf33   :  { %v4547_v55 = vpop.eup %3635 }
 0xf34   :  { %v4551_v0 = vpop.eup %3637 }
 0xf35   :  { %v4555_v4 = vpop.eup %3639 }
 0xf36   :  { %v4559_v7 = vpop.eup %3641 }
 0xf37   :  { %v4563_v9 = vpop.eup %3643 }
 0xf38   :  { %v4567_v14 = vpop.eup %3645 }
 0xf87   :  { %v2112_v52 = vpop.permute.xlu1 %2111 }
 0xf88   :  { %v2130_v50 = vmul.f32 %v4540_v58, %v2112_v52 }
 0xf89   :  { %v2110_v59 = vpop.permute.xlu0 %2109 }
 0xf8a   :  { %v2129_v62 = vmul.f32 %v4543_v1, %v2110_v59  ;;  %2151 = vrot.lane.b32.xlu1 %v2130_v50, %s3790_s10 }
 0xf8b   :  { %v2108_v11 = vpop.permute.xlu1 %2107 }
 0xf8c   :  { %v2128_v61 = vmul.f32 %v4547_v55, %v2108_v11  ;;  %2149 = vrot.lane.b32.xlu0 %v2129_v62, %s3790_s10 }
 0xf8d   :  { %v2104_v2 = vpop.permute.xlu0 %2103 }
 0xf8e   :  { %v2126_v20 = vmul.f32 %v4551_v0, %v2104_v2  ;;  %2147 = vrot.lane.b32.xlu1 %v2128_v61, %s3790_s10 }
 0xf8f   :  { %v2114_v6 = vpop.permute.xlu1 %2113 }
 0xf90   :  { %v2131_v45 = vmul.f32 %v4555_v4, %v2114_v6  ;;  %2143 = vrot.lane.b32.xlu0 %v2126_v20, %s3790_s10  ;;  %v2185_v6 = vsub.f32 1.0, %v4543_v1 }
 0xf91   :  { %v2106_v12 = vpop.permute.xlu0 %2105 }
 0xf92   :  { %v2127_v28 = vmul.f32 %v4559_v7, %v2106_v12  ;;  %2153 = vrot.lane.b32.xlu1 %v2131_v45, %s3790_s10  ;;  %v2184_v12 = vsub.f32 1.0, %v4547_v55 }
 0xf93   :  { %v2116_v8 = vpop.permute.xlu1 %2115 }
 0xf94   :  { %v2132_v3 = vmul.f32 %v4563_v9, %v2116_v8  ;;  %2145 = vrot.lane.b32.xlu0 %v2127_v28, %s3790_s10 }
 0xf95   :  { %v2102_v10 = vpop.permute.xlu0 %2101 }
 0xf96   :  { %v2125_v24 = vmul.f32 %v4567_v14, %v2102_v10  ;;  %2155 = vrot.lane.b32.xlu1 %v2132_v3, %s3790_s10  ;;  %v2186_v3 = vsub.f32 1.0, %v4540_v58 }
 0xf98   :  { %2141 = vrot.lane.b32.xlu0 %v2125_v24, %s3790_s10 }
 0xf9a   :  { %2242 = vrot.lane.b32.xlu1 %v2232_v17, %s3791_s3 }
 0xf9c   :  { %2244 = vrot.lane.b32.xlu0 %v2233_v16, %s3791_s3 }
 0xf9e   :  { %2238 = vrot.lane.b32.xlu1 %v2230_v32, %s3791_s3  ;;  %v2187_v32 = vsub.f32 1.0, %v4555_v4 }
 0xfa0   :  { %2246 = vrot.lane.b32.xlu0 %v4514_v31, %s3791_s3 }
 0xfa2   :  { %2240 = vrot.lane.b32.xlu1 %v2231_v19, %s3791_s3 }
 0xfa4   :  { %2248 = vrot.lane.b32.xlu0 %v2234_v33, %s3791_s3 }
 0xfa8   :  { %2250 = vrot.lane.b32.xlu0 %v2235_v35, %s3791_s3 }
 0xffc   :  { %v2152_v22 = vpop.permute.xlu1 %2151 }
 0xffd   :  { %v2170_v25 = vadd.f32 %v2152_v22, %v3951_v54 }
 0xffe   :  { %v2150_v30 = vpop.permute.xlu0 %2149 }
 0xfff   :  { %3647 = vtanh.f32 %v2170_v25  ;;  %v2169_v21 = vadd.f32 %v2150_v30, %v3948_v51  ;;  %v2182_v30 = vsub.f32 1.0, %v4551_v0 }
0x1000   :  { %v2148_v23 = vpop.permute.xlu1 %2147 }
0x1001   :  { %3649 = vtanh.f32 %v2169_v21  ;;  %v2168_v26 = vadd.f32 %v2148_v23, %v3945_v49  ;;  %v2183_v23 = vsub.f32 1.0, %v4559_v7 }
0x1002   :  { %v2144_v48 = vpop.permute.xlu0 %2143 }
0x1003   :  { %3651 = vtanh.f32 %v2168_v26  ;;  %v2166_v27 = vadd.f32 %v2144_v48, %v3939_v44 }
0x1004   :  { %v2154_v15 = vpop.permute.xlu1 %2153 }
0x1005   :  { %v2171_v56 = vadd.f32 %v2154_v15, %v3954_v57  ;;  %3653 = vtanh.f32 %v2166_v27  ;;  %v2188_v27 = vsub.f32 1.0, %v4563_v9 }
0x1006   :  { %v2146_v36 = vpop.permute.xlu0 %2145 }
0x1007   :  { %3655 = vtanh.f32 %v2171_v56  ;;  %v2167_v42 = vadd.f32 %v2146_v36, %v3942_v46 }
0x1008   :  { %v2156_v53 = vpop.permute.xlu1 %2155 }
0x1009   :  { %v3648_v37 = vpop.eup %3647  ;;  %v2172_v34 = vadd.f32 %v2156_v53, %v3957_v60  ;;  %3657 = vtanh.f32 %v2167_v42 }
0x100a   :  { %2207 = vrot.lane.b32.xlu1 %v3648_v37, %s3792_s12  ;;  %v2142_v47 = vpop.permute.xlu0 %2141 }
0x100b   :  { %v3650_v38 = vpop.eup %3649  ;;  %3659 = vtanh.f32 %v2172_v34  ;;  %v2165_v18 = vadd.f32 %v2142_v47, %v3937_v43 }
0x100c   :  { %2205 = vrot.lane.b32.xlu0 %v3650_v38, %s3792_s12  ;;  %v2243_v50 = vpop.permute.xlu1 %2242 }
0x100d   :  { %v3652_v41 = vpop.eup %3651  ;;  %3661 = vtanh.f32 %v2165_v18  ;;  %v2263_v8 = vmul.f32 %v4547_v55, %v2243_v50 }
0x100e   :  { %2203 = vrot.lane.b32.xlu1 %v3652_v41, %s3792_s12  ;;  %v2245_v52 = vpop.permute.xlu0 %2244 }
0x100f   :  { %v3654_v39 = vpop.eup %3653  ;;  %v2264_v24 = vmul.f32 %v4543_v1, %v2245_v52 }
0x1010   :  { %v2239_v62 = vpop.permute.xlu1 %2238 }
0x1011   :  { %v3656_v40 = vpop.eup %3655  ;;  %v2261_v42 = vmul.f32 %v4551_v0, %v2239_v62 }
0x1012   :  { %2199 = vrot.lane.b32.xlu1 %v3654_v39, %s3792_s12  ;;  %2209 = vrot.lane.b32.xlu0 %v3656_v40, %s3792_s12  ;;  %v2247_v59 = vpop.permute.xlu0 %2246  ;;  %v2181_v39 = vsub.f32 1.0, %v4567_v14 }
0x1013   :  { %v3658_v5 = vpop.eup %3657  ;;  %v2265_v22 = vmul.f32 %v4540_v58, %v2247_v59 }
0x1014   :  { %v2241_v61 = vpop.permute.xlu1 %2240 }
0x1015   :  { %v3660_v13 = vpop.eup %3659  ;;  %v2262_v37 = vmul.f32 %v4559_v7, %v2241_v61 }
0x1016   :  { %2201 = vrot.lane.b32.xlu1 %v3658_v5, %s3792_s12  ;;  %2211 = vrot.lane.b32.xlu0 %v3660_v13, %s3792_s12  ;;  %v2249_v11 = vpop.permute.xlu0 %2248 }
0x1017   :  { %v3662_v63 = vpop.eup %3661  ;;  %v2266_v25 = vmul.f32 %v4555_v4, %v2249_v11 }
0x101a   :  { %2236 = vrot.lane.b32.xlu0 %v2229_v29, %s3791_s3  ;;  %2197 = vrot.lane.b32.xlu1 %v3662_v63, %s3792_s12  ;;  %v2251_v2 = vpop.permute.xlu0 %2250 }
0x101b   :  { %v2267_v58 = vmul.f32 %v4563_v9, %v2251_v2 }
0x107c   :  { %v2208_v20 = vpop.permute.xlu1 %2207 }
0x107d   :  { %v2226_v17 = vmul.f32 %v2208_v20, %v2186_v3 }
0x107e   :  { %v2206_v45 = vpop.permute.xlu0 %2205 }
0x107f   :  { %v2225_v28 = vmul.f32 %v2206_v45, %v2185_v6  ;;  %v2273_v26 = vadd.f32 %v2265_v22, %v2226_v17  ;;  %v4635_v45 = vld [vmem:[%s4876_s4] ss:$0 sm:$0xff] }
0x1080   :  { %v2204_v31 = vpop.permute.xlu1 %2203 }
0x1081   :  { %v2224_v10 = vmul.f32 %v2204_v31, %v2184_v12  ;;  %v2272_v19 = vadd.f32 %v2264_v24, %v2225_v28  ;;  %v2291_v38 = vrot.slane %v2273_v26, 3 }
0x1083   :  { %v2271_v16 = vadd.f32 %v2263_v8, %v2224_v10  ;;  %v2289_v15 = vrot.slane %v2272_v19, 4 }
0x1084   :  { %v2200_v33 = vpop.permute.xlu1 %2199  ;;  %v2210_v35 = vpop.permute.xlu0 %2209 }
0x1085   :  { %v2227_v21 = vmul.f32 %v2210_v35, %v2187_v32  ;;  %v2288_v55 = vrot.slane %v2271_v16, 5  ;;  %v2222_v48 = vmul.f32 %v2200_v33, %v2182_v30 }
0x1087   :  { %v2274_v1 = vadd.f32 %v2266_v25, %v2227_v21  ;;  %v2290_v34 = vsel %vm523_vm2, %v2289_v15, %v2288_v55  ;;  %v2269_v18 = vadd.f32 %v2261_v42, %v2222_v48 }
0x1088   :  { %v2202_v56 = vpop.permute.xlu1 %2201  ;;  %v2212_v36 = vpop.permute.xlu0 %2211  ;;  %v2292_v9 = vsel %vm526_vm3, %v2291_v38, %v2290_v34 }
0x1089   :  { %v2223_v53 = vmul.f32 %v2202_v56, %v2183_v23  ;;  %v2228_v4 = vmul.f32 %v2212_v36, %v2188_v27  ;;  %v2293_v47 = vrot.slane %v2274_v1, 2  ;;  %v2284_v7 = vrot.slane %v2269_v18, 7 }
0x108b   :  { %v2275_v41 = vadd.f32 %v2267_v58, %v2228_v4  ;;  %v2270_v40 = vadd.f32 %v2262_v37, %v2223_v53  ;;  %v2294_v52 = vsel %vm529_vm4, %v2293_v47, %v2292_v9 }
0x108c   :  { %v2198_v5 = vpop.permute.xlu1 %2197  ;;  %v2237_v13 = vpop.permute.xlu0 %2236 }
0x108d   :  { %v2295_v29 = vrot.slane %v2275_v41, 1  ;;  %v2221_v63 = vmul.f32 %v2198_v5, %v2181_v39  ;;  %v2260_v0 = vmul.f32 %v4567_v14, %v2237_v13  ;;  %v2286_v62 = vrot.slane %v2270_v40, 6 }
0x108f   :  { %v2268_v50 = vadd.f32 %v2260_v0, %v2221_v63  ;;  %v2296_v59 = vsel %vm532_vm5, %v2295_v29, %v2294_v52 }
0x1090   :  { %2299 = vrot.lane.b32.xlu0 %v2296_v59, %s3792_s12 }
0x1091   :  { %v2285_v11 = vsel %vm538_vm7, %v2284_v7, %v2268_v50 }
0x1092   :  { %v2287_v61 = vsel %vm541_vm8, %v2286_v62, %v2285_v11 }
0x1093   :  { %2297 = vrot.lane.b32.xlu1 %v2287_v61, %s3792_s12 }
0x1102   :  { %v2300_v2 = vpop.permute.xlu0 %2299 }
0x1103   :  { %2306 = vst.msk [vmem:[#allocation2 + $0x3] sm:$0x1f] %vm2305_vm1, %v2300_v2 }
0x1105   :  { %v2298_v14 = vpop.permute.xlu1 %2297 }
0x1106   :  { %2304 = vst.msk [vmem:[#allocation2 - $0x5] sm:$0xe0] %vm2303_vm10, %v2298_v14 }
0x110d   :  { %v4628_v20 = vld [vmem:[#allocation2] sm:$0xff] }
0x110e   :  { %3299 = vmatmul.mubr.msk.f32.vlgmr.msra.gmra.mrb[12].mxu0 %vm31_vm0, %v4628_v20 }
0x11e1   :  { %v2377_v6 = vpop.f32.mrb[12].mxu0 }
0x11e2   :  { %v2378_v12 = vadd.f32 %v4635_v45, %v2377_v6  ;;  %v3300_v28 = vpop.f32.mrb[13].mxu0 }
0x11e4   :  { %2465 = vrot.lane.b32.xlu1 %v2378_v12, %s3790_s10  ;;  %v2385_v31 = vrot.slane %v2378_v12, 5  ;;  %v2384_v8 = vrot.slane %v2378_v12, 4  ;;  %v2387_v3 = vrot.slane %v2378_v12, 7  ;;  %v2386_v10 = vrot.slane %v2378_v12, 6 }
0x11e5   :  { %v2383_v24 = vrot.slane %v2378_v12, 3  ;;  %v2388_v17 = vrot.slane %v2378_v12, 1  ;;  %v2382_v16 = vrot.slane %v2378_v12, 2  ;;  %v2403_v32 = vadd.f32 %v2378_v12, %v3954_v57 }
0x11e6   :  { %2459 = vrot.lane.b32.xlu0 %v2385_v31, %s3790_s10  ;;  %v2400_v19 = vadd.f32 %v2385_v31, %v3945_v49  ;;  %v2399_v33 = vadd.f32 %v2384_v8, %v3942_v46  ;;  %v2402_v25 = vadd.f32 %v2387_v3, %v3951_v54  ;;  %v2401_v21 = vadd.f32 %v2386_v10, %v3948_v51 }
0x11e7   :  { %v3139_v35 = vmul.f32 -1.442695, %v2403_v32  ;;  %v2398_v23 = vadd.f32 %v2383_v24, %v3939_v44  ;;  %v2404_v48 = vadd.f32 %v2388_v17, %v3957_v60  ;;  %v2397_v27 = vadd.f32 %v2382_v16, %v3937_v43 }
0x11e8   :  { %2457 = vrot.lane.b32.xlu1 %v2384_v8, %s3790_s10  ;;  %v3136_v22 = vmul.f32 -1.442695, %v2400_v19  ;;  %v3135_v30 = vmul.f32 -1.442695, %v2399_v33  ;;  %v3138_v55 = vmul.f32 -1.442695, %v2402_v25 }
0x11e9   :  { %3663 = vpow2.f32 %v3139_v35  ;;  %v3137_v26 = vmul.f32 -1.442695, %v2401_v21  ;;  %v3134_v1 = vmul.f32 -1.442695, %v2398_v23  ;;  %v3140_v15 = vmul.f32 -1.442695, %v2404_v48 }
0x11ea   :  { %2463 = vrot.lane.b32.xlu0 %v2387_v3, %s3790_s10  ;;  %3665 = vpow2.f32 %v3136_v22  ;;  %v3133_v36 = vmul.f32 -1.442695, %v2397_v27  ;;  %v2583_v33 = vrot.slane %v4628_v20, 4  ;;  %v2584_v35 = vrot.slane %v4628_v20, 5 }
0x11eb   :  { %3667 = vpow2.f32 %v3135_v30  ;;  %v2582_v22 = vrot.slane %v4628_v20, 3  ;;  %v2585_v25 = vrot.slane %v4628_v20, 6  ;;  %v2586_v30 = vrot.slane %v4628_v20, 7 }
0x11ec   :  { %2461 = vrot.lane.b32.xlu1 %v2386_v10, %s3790_s10  ;;  %3669 = vpow2.f32 %v3138_v55  ;;  %v2587_v21 = vrot.slane %v4628_v20, 1 }
0x11ed   :  { %3671 = vpow2.f32 %v3137_v26 }
0x11ee   :  { %2455 = vrot.lane.b32.xlu0 %v2383_v24, %s3790_s10  ;;  %3673 = vpow2.f32 %v3134_v1 }
0x11ef   :  { %3675 = vpow2.f32 %v3140_v15 }
0x11f0   :  { %2467 = vrot.lane.b32.xlu1 %v2388_v17, %s3790_s10  ;;  %3677 = vpow2.f32 %v3133_v36 }
0x11f2   :  { %2453 = vrot.lane.b32.xlu0 %v2382_v16, %s3790_s10 }
0x11f3   :  { %v3664_v56 = vpop.eup %3663 }
0x11f4   :  { %v3666_v42 = vpop.eup %3665  ;;  %v2435_v58 = vadd.f32 1.0, %v3664_v56 }
0x11f5   :  { %v3668_v53 = vpop.eup %3667  ;;  %v2432_v4 = vadd.f32 1.0, %v3666_v42 }
0x11f6   :  { %v3670_v37 = vpop.eup %3669  ;;  %v2431_v34 = vadd.f32 1.0, %v3668_v53  ;;  %3679 = vrcp.f32 %v2435_v58 }
0x11f7   :  { %v3672_v47 = vpop.eup %3671  ;;  %3681 = vrcp.f32 %v2432_v4  ;;  %v2434_v38 = vadd.f32 1.0, %v3670_v37 }
0x11f8   :  { %v3674_v18 = vpop.eup %3673  ;;  %3683 = vrcp.f32 %v2431_v34  ;;  %v2433_v41 = vadd.f32 1.0, %v3672_v47 }
0x11f9   :  { %v3676_v39 = vpop.eup %3675  ;;  %3685 = vrcp.f32 %v2434_v38  ;;  %v2430_v40 = vadd.f32 1.0, %v3674_v18 }
0x11fa   :  { %v3678_v5 = vpop.eup %3677  ;;  %3687 = vrcp.f32 %v2433_v41  ;;  %v2436_v13 = vadd.f32 1.0, %v3676_v39 }
0x11fb   :  { %3689 = vrcp.f32 %v2430_v40  ;;  %v2429_v63 = vadd.f32 1.0, %v3678_v5 }
0x11fc   :  { %3691 = vrcp.f32 %v2436_v13  ;;  %v2581_v13 = vrot.slane %v4628_v20, 2 }
0x11fd   :  { %3693 = vrcp.f32 %v2429_v63 }
0x1200   :  { %v4654_v29 = vpop.eup %3679 }
0x1201   :  { %v4657_v52 = vpop.eup %3681 }
0x1202   :  { %v4661_v59 = vpop.eup %3683 }
0x1203   :  { %v4665_v61 = vpop.eup %3685 }
0x1204   :  { %v4669_v6 = vpop.eup %3687 }
0x1205   :  { %v4673_v31 = vpop.eup %3689 }
0x1206   :  { %v4677_v10 = vpop.eup %3691 }
0x1207   :  { %v4681_v16 = vpop.eup %3693 }
0x1256   :  { %v2466_v0 = vpop.permute.xlu1 %2465 }
0x1257   :  { %v2483_v9 = vmul.f32 %v4654_v29, %v2466_v0 }
0x1258   :  { %v2460_v7 = vpop.permute.xlu0 %2459 }
0x1259   :  { %v2480_v50 = vmul.f32 %v4657_v52, %v2460_v7  ;;  %2505 = vrot.lane.b32.xlu1 %v2483_v9, %s3790_s10 }
0x125a   :  { %v2458_v62 = vpop.permute.xlu1 %2457 }
0x125b   :  { %v2479_v11 = vmul.f32 %v4661_v59, %v2458_v62  ;;  %2499 = vrot.lane.b32.xlu0 %v2480_v50, %s3790_s10 }
0x125c   :  { %v2464_v2 = vpop.permute.xlu0 %2463 }
0x125d   :  { %v2482_v14 = vmul.f32 %v4665_v61, %v2464_v2  ;;  %2497 = vrot.lane.b32.xlu1 %v2479_v11, %s3790_s10 }
0x125e   :  { %v2462_v12 = vpop.permute.xlu1 %2461 }
0x125f   :  { %v2481_v28 = vmul.f32 %v4669_v6, %v2462_v12  ;;  %2503 = vrot.lane.b32.xlu0 %v2482_v14, %s3790_s10 }
0x1260   :  { %v2456_v8 = vpop.permute.xlu0 %2455 }
0x1261   :  { %v2478_v3 = vmul.f32 %v4673_v31, %v2456_v8  ;;  %2501 = vrot.lane.b32.xlu1 %v2481_v28, %s3790_s10  ;;  %v2535_v28 = vsub.f32 1.0, %v4661_v59 }
0x1262   :  { %v2468_v24 = vpop.permute.xlu1 %2467 }
0x1263   :  { %v2484_v17 = vmul.f32 %v4677_v10, %v2468_v24  ;;  %2495 = vrot.lane.b32.xlu0 %v2478_v3, %s3790_s10  ;;  %v2536_v3 = vsub.f32 1.0, %v4657_v52 }
0x1264   :  { %v2454_v32 = vpop.permute.xlu0 %2453 }
0x1265   :  { %v2477_v19 = vmul.f32 %v4681_v16, %v2454_v32  ;;  %2507 = vrot.lane.b32.xlu1 %v2484_v17, %s3790_s10 }
0x1267   :  { %2493 = vrot.lane.b32.xlu0 %v2477_v19, %s3790_s10  ;;  %v2537_v19 = vsub.f32 1.0, %v4669_v6 }
0x1269   :  { %2592 = vrot.lane.b32.xlu1 %v2583_v33, %s3791_s3  ;;  %v2539_v33 = vsub.f32 1.0, %v4654_v29 }
0x126b   :  { %2594 = vrot.lane.b32.xlu0 %v2584_v35, %s3791_s3 }
0x126d   :  { %2590 = vrot.lane.b32.xlu1 %v2582_v22, %s3791_s3 }
0x126f   :  { %2596 = vrot.lane.b32.xlu0 %v2585_v25, %s3791_s3 }
0x1273   :  { %2598 = vrot.lane.b32.xlu0 %v2586_v30, %s3791_s3 }
0x1277   :  { %2600 = vrot.lane.b32.xlu0 %v4628_v20, %s3791_s3 }
0x127b   :  { %2602 = vrot.lane.b32.xlu0 %v2587_v21, %s3791_s3 }
0x12cb   :  { %v2506_v55 = vpop.permute.xlu1 %2505 }
0x12cc   :  { %v2523_v23 = vadd.f32 %v2506_v55, %v3954_v57 }
0x12cd   :  { %v2500_v26 = vpop.permute.xlu0 %2499 }
0x12ce   :  { %3695 = vtanh.f32 %v2523_v23  ;;  %v2520_v48 = vadd.f32 %v2500_v26, %v3945_v49 }
0x12cf   :  { %v2498_v1 = vpop.permute.xlu1 %2497 }
0x12d0   :  { %3697 = vtanh.f32 %v2520_v48  ;;  %v2519_v27 = vadd.f32 %v2498_v1, %v3942_v46  ;;  %v2538_v48 = vsub.f32 1.0, %v4665_v61  ;;  %v2540_v1 = vsub.f32 1.0, %v4677_v10 }
0x12d1   :  { %v2504_v15 = vpop.permute.xlu0 %2503 }
0x12d2   :  { %3699 = vtanh.f32 %v2519_v27  ;;  %v2522_v42 = vadd.f32 %v2504_v15, %v3951_v54 }
0x12d3   :  { %v2502_v56 = vpop.permute.xlu1 %2501 }
0x12d4   :  { %v2521_v36 = vadd.f32 %v2502_v56, %v3948_v51 }
0x12d5   :  { %v2496_v58 = vpop.permute.xlu0 %2495 }
0x12d6   :  { %3701 = vtanh.f32 %v2521_v36  ;;  %v2518_v47 = vadd.f32 %v2496_v58, %v3939_v44 }
0x12d7   :  { %v2508_v53 = vpop.permute.xlu1 %2507  ;;  %3703 = vtanh.f32 %v2522_v42 }
0x12d8   :  { %v3696_v4 = vpop.eup %3695  ;;  %v2524_v37 = vadd.f32 %v2508_v53, %v3957_v60 }
0x12d9   :  { %2561 = vrot.lane.b32.xlu1 %v3696_v4, %s3792_s12  ;;  %v2494_v38 = vpop.permute.xlu0 %2493 }
0x12da   :  { %v3698_v34 = vpop.eup %3697  ;;  %3705 = vtanh.f32 %v2524_v37  ;;  %v2517_v41 = vadd.f32 %v2494_v38, %v3937_v43 }
0x12db   :  { %2555 = vrot.lane.b32.xlu0 %v3698_v34, %s3792_s12  ;;  %3707 = vtanh.f32 %v2518_v47  ;;  %v2593_v62 = vpop.permute.xlu1 %2592  ;;  %v2534_v47 = vsub.f32 1.0, %v4673_v31 }
0x12dc   :  { %v3700_v18 = vpop.eup %3699  ;;  %3709 = vtanh.f32 %v2517_v41  ;;  %v2614_v17 = vmul.f32 %v4661_v59, %v2593_v62 }
0x12dd   :  { %2553 = vrot.lane.b32.xlu1 %v3700_v18, %s3792_s12  ;;  %v2595_v9 = vpop.permute.xlu0 %2594 }
0x12de   :  { %v2615_v22 = vmul.f32 %v4657_v52, %v2595_v9 }
0x12df   :  { %v2591_v2 = vpop.permute.xlu1 %2590 }
0x12e0   :  { %v3702_v39 = vpop.eup %3701  ;;  %v2613_v18 = vmul.f32 %v4673_v31, %v2591_v2 }
0x12e1   :  { %2557 = vrot.lane.b32.xlu1 %v3702_v39, %s3792_s12  ;;  %v3704_v40 = vpop.eup %3703  ;;  %v2597_v7 = vpop.permute.xlu0 %2596 }
0x12e2   :  { %v2616_v25 = vmul.f32 %v4669_v6, %v2597_v7 }
0x12e4   :  { %v3706_v5 = vpop.eup %3705 }
0x12e5   :  { %2559 = vrot.lane.b32.xlu1 %v3704_v40, %s3792_s12  ;;  %2563 = vrot.lane.b32.xlu0 %v3706_v5, %s3792_s12  ;;  %v3708_v63 = vpop.eup %3707  ;;  %v2599_v50 = vpop.permute.xlu0 %2598 }
0x12e6   :  { %v3710_v0 = vpop.eup %3709  ;;  %v2617_v59 = vmul.f32 %v4665_v61, %v2599_v50 }
0x12e9   :  { %2551 = vrot.lane.b32.xlu1 %v3708_v63, %s3792_s12  ;;  %2588 = vrot.lane.b32.xlu0 %v2581_v13, %s3791_s3  ;;  %v2601_v11 = vpop.permute.xlu0 %2600 }
0x12ea   :  { %v2618_v27 = vmul.f32 %v4654_v29, %v2601_v11 }
0x12ed   :  { %2549 = vrot.lane.b32.xlu1 %v3710_v0, %s3792_s12  ;;  %v2603_v14 = vpop.permute.xlu0 %2602  ;;  %v2533_v0 = vsub.f32 1.0, %v4681_v16 }
0x12ee   :  { %v2619_v36 = vmul.f32 %v4677_v10, %v2603_v14 }
0x134b   :  { %v2562_v12 = vpop.permute.xlu1 %2561 }
0x134c   :  { %v2579_v55 = vmul.f32 %v2562_v12, %v2539_v33 }
0x134d   :  { %v2556_v8 = vpop.permute.xlu0 %2555 }
0x134e   :  { %v2576_v32 = vmul.f32 %v2556_v8, %v2536_v3  ;;  %v2626_v58 = vadd.f32 %v2618_v27, %v2579_v55 }
0x134f   :  { %v2554_v20 = vpop.permute.xlu1 %2553 }
0x1350   :  { %v2575_v24 = vmul.f32 %v2554_v20, %v2535_v28  ;;  %v2623_v23 = vadd.f32 %v2615_v22, %v2576_v32  ;;  %v2645_v39 = vrot.slane %v2626_v58, 2 }
0x1352   :  { %v2622_v30 = vadd.f32 %v2614_v17, %v2575_v24  ;;  %v2639_v4 = vrot.slane %v2623_v23, 5 }
0x1353   :  { %v2558_v35 = vpop.permute.xlu1 %2557 }
0x1354   :  { %v2577_v21 = vmul.f32 %v2558_v35, %v2537_v19  ;;  %v2638_v52 = vrot.slane %v2622_v30, 6 }
0x1356   :  { %v2624_v26 = vadd.f32 %v2616_v25, %v2577_v21  ;;  %v2640_v61 = vsel %vm523_vm2, %v2639_v4, %v2638_v52 }
0x1357   :  { %v2560_v15 = vpop.permute.xlu1 %2559  ;;  %v2564_v56 = vpop.permute.xlu0 %2563 }
0x1358   :  { %v2578_v42 = vmul.f32 %v2560_v15, %v2538_v48  ;;  %v2580_v6 = vmul.f32 %v2564_v56, %v2540_v1  ;;  %v2641_v53 = vrot.slane %v2624_v26, 4 }
0x135a   :  { %v2625_v37 = vadd.f32 %v2617_v59, %v2578_v42  ;;  %v2627_v34 = vadd.f32 %v2619_v36, %v2580_v6  ;;  %v2642_v10 = vsel %vm526_vm3, %v2641_v53, %v2640_v61 }
0x135b   :  { %v2552_v38 = vpop.permute.xlu1 %2551  ;;  %v2589_v40 = vpop.permute.xlu0 %2588 }
0x135c   :  { %v2643_v29 = vrot.slane %v2625_v37, 3  ;;  %v2574_v41 = vmul.f32 %v2552_v38, %v2534_v47  ;;  %v2647_v13 = vrot.slane %v2627_v34, 1  ;;  %v2612_v50 = vmul.f32 %v4681_v16, %v2589_v40 }
0x135e   :  { %v2644_v5 = vsel %vm529_vm4, %v2643_v29, %v2642_v10  ;;  %v2621_v63 = vadd.f32 %v2613_v18, %v2574_v41 }
0x135f   :  { %v2550_v9 = vpop.permute.xlu1 %2549  ;;  %v2646_v7 = vsel %vm532_vm5, %v2645_v39, %v2644_v5 }
0x1360   :  { %v2573_v31 = vmul.f32 %v2550_v9, %v2533_v0  ;;  %v2648_v62 = vsel %vm535_vm6, %v2647_v13, %v2646_v7  ;;  %v2636_v11 = vrot.slane %v2621_v63, 7 }
0x1361   :  { %2651 = vrot.lane.b32.xlu0 %v2648_v62, %s3792_s12 }
0x1362   :  { %v2620_v2 = vadd.f32 %v2612_v50, %v2573_v31 }
0x1364   :  { %v2637_v14 = vsel %vm541_vm8, %v2636_v11, %v2620_v2 }
0x1365   :  { %2649 = vrot.lane.b32.xlu1 %v2637_v14, %s3792_s12 }
0x13d3   :  { %v2652_v12 = vpop.permute.xlu0 %2651 }
0x13d4   :  { %2658 = vst.msk [vmem:[#allocation2 + $0x2] sm:$0x3f] %vm2657_vm11, %v2652_v12 }
0x13d7   :  { %v2650_v28 = vpop.permute.xlu1 %2649 }
0x13d8   :  { %2656 = vst.msk [vmem:[#allocation2 - $0x6] sm:$0xc0] %vm2655_vm12, %v2650_v28 }
0x13df   :  { %v4742_v8 = vld [vmem:[#allocation2] sm:$0xff] }
0x13e0   :  { %3310 = vmatmul.mubr.msk.f32.vlgmr.msra.gmra.mrb[8].mxu1 %vm31_vm0, %v4742_v8 }
0x14b3   :  { %v2729_v16 = vpop.f32.mrb[8].mxu1 }
0x14b4   :  { %v2730_v20 = vadd.f32 %v4635_v45, %v2729_v16  ;;  %v3311_v3 = vpop.f32.mrb[9].mxu1 }
0x14b6   :  { %v2736_v24 = vrot.slane %v2730_v20, 3  ;;  %v2735_v17 = vrot.slane %v2730_v20, 2  ;;  %v2738_v32 = vrot.slane %v2730_v20, 5  ;;  %v2737_v19 = vrot.slane %v2730_v20, 4 }
0x14b7   :  { %v2740_v33 = vrot.slane %v2730_v20, 7  ;;  %v2739_v35 = vrot.slane %v2730_v20, 6  ;;  %v2734_v45 = vrot.slane %v2730_v20, 1  ;;  %v2756_v36 = vadd.f32 %v2730_v20, %v3957_v60 }
0x14b8   :  { %2809 = vrot.lane.b32.xlu0 %v2736_v24, %s3790_s10  ;;  %2807 = vrot.lane.b32.xlu1 %v2735_v17, %s3790_s10  ;;  %v2751_v22 = vadd.f32 %v2736_v24, %v3942_v46  ;;  %v2750_v25 = vadd.f32 %v2735_v17, %v3939_v44  ;;  %v2753_v21 = vadd.f32 %v2738_v32, %v3948_v51 }
0x14b9   :  { %v2752_v23 = vadd.f32 %v2737_v19, %v3945_v49  ;;  %v2755_v48 = vadd.f32 %v2740_v33, %v3954_v57  ;;  %v2754_v59 = vadd.f32 %v2739_v35, %v3951_v54  ;;  %v2749_v15 = vadd.f32 %v2734_v45, %v3937_v43 }
0x14ba   :  { %v3144_v30 = vmul.f32 -1.442695, %v2751_v22  ;;  %v3143_v55 = vmul.f32 -1.442695, %v2750_v25  ;;  %v3146_v26 = vmul.f32 -1.442695, %v2753_v21 }
0x14bb   :  { %v3145_v1 = vmul.f32 -1.442695, %v2752_v23  ;;  %v3148_v27 = vmul.f32 -1.442695, %v2755_v48  ;;  %v3147_v56 = vmul.f32 -1.442695, %v2754_v59 }
0x14bc   :  { %2813 = vrot.lane.b32.xlu0 %v2738_v32, %s3790_s10  ;;  %2811 = vrot.lane.b32.xlu1 %v2737_v19, %s3790_s10  ;;  %3711 = vpow2.f32 %v3144_v30  ;;  %v3142_v52 = vmul.f32 -1.442695, %v2749_v15  ;;  %v3149_v42 = vmul.f32 -1.442695, %v2756_v36  ;;  %v2934_v25 = vrot.slane %v4742_v8, 2 }
0x14bd   :  { %3713 = vpow2.f32 %v3143_v55  ;;  %v2935_v30 = vrot.slane %v4742_v8, 3  ;;  %v2936_v21 = vrot.slane %v4742_v8, 4  ;;  %v2937_v55 = vrot.slane %v4742_v8, 5 }
0x14be   :  { %3715 = vpow2.f32 %v3146_v26  ;;  %v2938_v23 = vrot.slane %v4742_v8, 6  ;;  %v2939_v26 = vrot.slane %v4742_v8, 7 }
0x14bf   :  { %3717 = vpow2.f32 %v3145_v1 }
0x14c0   :  { %2817 = vrot.lane.b32.xlu0 %v2740_v33, %s3790_s10  ;;  %2815 = vrot.lane.b32.xlu1 %v2739_v35, %s3790_s10  ;;  %3719 = vpow2.f32 %v3148_v27 }
0x14c1   :  { %3721 = vpow2.f32 %v3147_v56 }
0x14c2   :  { %3723 = vpow2.f32 %v3142_v52 }
0x14c3   :  { %3725 = vpow2.f32 %v3149_v42 }
0x14c4   :  { %2819 = vrot.lane.b32.xlu1 %v2730_v20, %s3790_s10  ;;  %2805 = vrot.lane.b32.xlu0 %v2734_v45, %s3790_s10 }
0x14c6   :  { %v3712_v6 = vpop.eup %3711 }
0x14c7   :  { %v3714_v58 = vpop.eup %3713  ;;  %v2783_v53 = vadd.f32 1.0, %v3712_v6 }
0x14c8   :  { %v3716_v4 = vpop.eup %3715  ;;  %v2782_v37 = vadd.f32 1.0, %v3714_v58 }
0x14c9   :  { %v3718_v34 = vpop.eup %3717  ;;  %3727 = vrcp.f32 %v2783_v53  ;;  %v2785_v47 = vadd.f32 1.0, %v3716_v4 }
0x14ca   :  { %v3720_v38 = vpop.eup %3719  ;;  %3729 = vrcp.f32 %v2782_v37  ;;  %v2784_v18 = vadd.f32 1.0, %v3718_v34 }
0x14cb   :  { %v3722_v61 = vpop.eup %3721  ;;  %3731 = vrcp.f32 %v2785_v47  ;;  %v2787_v29 = vadd.f32 1.0, %v3720_v38 }
0x14cc   :  { %v3724_v41 = vpop.eup %3723  ;;  %3733 = vrcp.f32 %v2784_v18  ;;  %v2786_v39 = vadd.f32 1.0, %v3722_v61 }
0x14cd   :  { %v3726_v10 = vpop.eup %3725  ;;  %3735 = vrcp.f32 %v2787_v29  ;;  %v2781_v40 = vadd.f32 1.0, %v3724_v41 }
0x14ce   :  { %3737 = vrcp.f32 %v2786_v39  ;;  %v2788_v5 = vadd.f32 1.0, %v3726_v10 }
0x14cf   :  { %3739 = vrcp.f32 %v2781_v40 }
0x14d0   :  { %3741 = vrcp.f32 %v2788_v5 }
0x14d3   :  { %v4763_v13 = vpop.eup %3727 }
0x14d4   :  { %v4765_v63 = vpop.eup %3729 }
0x14d5   :  { %v4769_v31 = vpop.eup %3731 }
0x14d6   :  { %v4773_v62 = vpop.eup %3733 }
0x14d7   :  { %v4777_v28 = vpop.eup %3735 }
0x14d8   :  { %v4781_v16 = vpop.eup %3737 }
0x14d9   :  { %v4785_v32 = vpop.eup %3739 }
0x14da   :  { %v4789_v19 = vpop.eup %3741 }
0x152a   :  { %v2810_v0 = vpop.permute.xlu0 %2809  ;;  %v2808_v9 = vpop.permute.xlu1 %2807 }
0x152b   :  { %v2831_v7 = vmul.f32 %v4763_v13, %v2810_v0  ;;  %v2830_v50 = vmul.f32 %v4765_v63, %v2808_v9  ;;  %v2886_v0 = vsub.f32 1.0, %v4765_v63 }
0x152d   :  { %2847 = vrot.lane.b32.xlu1 %v2830_v50, %s3790_s10  ;;  %2849 = vrot.lane.b32.xlu0 %v2831_v7, %s3790_s10  ;;  %v2888_v7 = vsub.f32 1.0, %v4773_v62  ;;  %v2887_v50 = vsub.f32 1.0, %v4763_v13 }
0x152e   :  { %v2814_v11 = vpop.permute.xlu0 %2813  ;;  %v2812_v2 = vpop.permute.xlu1 %2811 }
0x152f   :  { %v2833_v14 = vmul.f32 %v4769_v31, %v2814_v11  ;;  %v2832_v12 = vmul.f32 %v4773_v62, %v2812_v2  ;;  %v2889_v2 = vsub.f32 1.0, %v4769_v31 }
0x1531   :  { %2851 = vrot.lane.b32.xlu1 %v2832_v12, %s3790_s10  ;;  %2853 = vrot.lane.b32.xlu0 %v2833_v14, %s3790_s10 }
0x1532   :  { %v2818_v20 = vpop.permute.xlu0 %2817  ;;  %v2816_v3 = vpop.permute.xlu1 %2815 }
0x1533   :  { %v2835_v24 = vmul.f32 %v4777_v28, %v2818_v20  ;;  %v2834_v17 = vmul.f32 %v4781_v16, %v2816_v3 }
0x1535   :  { %2855 = vrot.lane.b32.xlu1 %v2834_v17, %s3790_s10  ;;  %2857 = vrot.lane.b32.xlu0 %v2835_v24, %s3790_s10 }
0x1536   :  { %v2820_v33 = vpop.permute.xlu1 %2819  ;;  %v2806_v35 = vpop.permute.xlu0 %2805 }
0x1537   :  { %v2836_v45 = vmul.f32 %v4789_v19, %v2820_v33  ;;  %v2829_v22 = vmul.f32 %v4785_v32, %v2806_v35 }
0x1539   :  { %2859 = vrot.lane.b32.xlu1 %v2836_v45, %s3790_s10  ;;  %2845 = vrot.lane.b32.xlu0 %v2829_v22, %s3790_s10  ;;  %v2890_v22 = vsub.f32 1.0, %v4781_v16 }
0x153d   :  { %2942 = vrot.lane.b32.xlu1 %v2934_v25, %s3791_s3  ;;  %2944 = vrot.lane.b32.xlu0 %v2935_v30, %s3791_s3  ;;  %v2892_v30 = vsub.f32 1.0, %v4789_v19 }
0x1541   :  { %2946 = vrot.lane.b32.xlu0 %v2936_v21, %s3791_s3 }
0x1545   :  { %2948 = vrot.lane.b32.xlu0 %v2937_v55, %s3791_s3 }
0x1549   :  { %2950 = vrot.lane.b32.xlu0 %v2938_v23, %s3791_s3 }
0x154d   :  { %2952 = vrot.lane.b32.xlu0 %v2939_v26, %s3791_s3 }
0x159f   :  { %v2848_v48 = vpop.permute.xlu1 %2847  ;;  %v2850_v1 = vpop.permute.xlu0 %2849 }
0x15a0   :  { %v2871_v59 = vadd.f32 %v2850_v1, %v3942_v46  ;;  %v2870_v42 = vadd.f32 %v2848_v48, %v3939_v44  ;;  %v2933_v46 = vrot.slane %v4742_v8, 1 }
0x15a2   :  { %3743 = vtanh.f32 %v2871_v59 }
0x15a3   :  { %v2852_v27 = vpop.permute.xlu1 %2851  ;;  %v2854_v58 = vpop.permute.xlu0 %2853 }
0x15a4   :  { %v2872_v6 = vadd.f32 %v2852_v27, %v3945_v49  ;;  %v2873_v53 = vadd.f32 %v2854_v58, %v3948_v51 }
0x15a7   :  { %v2856_v15 = vpop.permute.xlu1 %2855  ;;  %v2858_v4 = vpop.permute.xlu0 %2857 }
0x15a8   :  { %v2874_v44 = vadd.f32 %v2856_v15, %v3951_v54  ;;  %v2875_v49 = vadd.f32 %v2858_v4, %v3954_v57 }
0x15ab   :  { %v2860_v56 = vpop.permute.xlu1 %2859  ;;  %v2846_v34 = vpop.permute.xlu0 %2845 }
0x15ac   :  { %v2876_v36 = vadd.f32 %v2860_v56, %v3957_v60  ;;  %v3744_v52 = vpop.eup %3743  ;;  %v2869_v51 = vadd.f32 %v2846_v34, %v3937_v43 }
0x15ad   :  { %2905 = vrot.lane.b32.xlu0 %v3744_v52, %s3792_s12 }
0x15ae   :  { %3745 = vtanh.f32 %v2876_v36 }
0x15af   :  { %3747 = vtanh.f32 %v2870_v42  ;;  %v2945_v57 = vpop.permute.xlu0 %2944  ;;  %v2943_v41 = vpop.permute.xlu1 %2942 }
0x15b0   :  { %3749 = vtanh.f32 %v2872_v6  ;;  %v2965_v20 = vmul.f32 %v4765_v63, %v2943_v41  ;;  %v2966_v33 = vmul.f32 %v4763_v13, %v2945_v57  ;;  %v2891_v13 = vsub.f32 1.0, %v4777_v28 }
0x15b1   :  { %2954 = vrot.lane.b32.xlu0 %v4742_v8, %s3791_s3  ;;  %3751 = vtanh.f32 %v2873_v53 }
0x15b2   :  { %3753 = vtanh.f32 %v2874_v44 }
0x15b3   :  { %3755 = vtanh.f32 %v2875_v49  ;;  %v2947_v61 = vpop.permute.xlu0 %2946 }
0x15b4   :  { %3757 = vtanh.f32 %v2869_v51  ;;  %v2967_v17 = vmul.f32 %v4773_v62, %v2947_v61 }
0x15b5   :  { %2940 = vrot.lane.b32.xlu0 %v2933_v46, %s3791_s3 }
0x15b7   :  { %v2949_v29 = vpop.permute.xlu0 %2948 }
0x15b8   :  { %v3746_v60 = vpop.eup %3745  ;;  %v2968_v35 = vmul.f32 %v4769_v31, %v2949_v29 }
0x15b9   :  { %2915 = vrot.lane.b32.xlu1 %v3746_v60, %s3792_s12  ;;  %v3748_v37 = vpop.eup %3747  ;;  %v2885_v60 = vsub.f32 1.0, %v4785_v32 }
0x15ba   :  { %v3750_v8 = vpop.eup %3749 }
0x15bb   :  { %v3752_v47 = vpop.eup %3751  ;;  %v2951_v39 = vpop.permute.xlu0 %2950 }
0x15bc   :  { %v3754_v38 = vpop.eup %3753  ;;  %v2969_v23 = vmul.f32 %v4781_v16, %v2951_v39 }
0x15bd   :  { %2903 = vrot.lane.b32.xlu1 %v3748_v37, %s3792_s12  ;;  %v3756_v54 = vpop.eup %3755 }
0x15be   :  { %v3758_v18 = vpop.eup %3757 }
0x15bf   :  { %v2953_v40 = vpop.permute.xlu0 %2952 }
0x15c0   :  { %v2970_v56 = vmul.f32 %v4777_v28, %v2953_v40 }
0x15c1   :  { %2907 = vrot.lane.b32.xlu1 %v3750_v8, %s3792_s12 }
0x15c5   :  { %2909 = vrot.lane.b32.xlu1 %v3752_v47, %s3792_s12 }
0x15c9   :  { %2911 = vrot.lane.b32.xlu1 %v3754_v38, %s3792_s12 }
0x15cd   :  { %2913 = vrot.lane.b32.xlu1 %v3756_v54, %s3792_s12 }
0x15d1   :  { %2901 = vrot.lane.b32.xlu1 %v3758_v18, %s3792_s12 }
0x161f   :  { %v2906_v9 = vpop.permute.xlu0 %2905 }
0x1620   :  { %v2927_v3 = vmul.f32 %v2906_v9, %v2887_v50 }
0x1622   :  { %v2974_v26 = vadd.f32 %v2966_v33, %v2927_v3 }
0x1623   :  { %v2955_v25 = vpop.permute.xlu0 %2954 }
0x1624   :  { %v2971_v31 = vmul.f32 %v4789_v19, %v2955_v25  ;;  %v2989_v36 = vrot.slane %v2974_v26, 6 }
0x1627   :  { %v2941_v6 = vpop.permute.xlu0 %2940 }
0x1628   :  { %v2964_v19 = vmul.f32 %v4785_v32, %v2941_v6 }
0x162b   :  { %v2916_v10 = vpop.permute.xlu1 %2915 }
0x162c   :  { %v2932_v1 = vmul.f32 %v2916_v10, %v2892_v30 }
0x162e   :  { %v2979_v58 = vadd.f32 %v2971_v31, %v2932_v1 }
0x162f   :  { %v2904_v43 = vpop.permute.xlu1 %2903 }
0x1630   :  { %v2926_v11 = vmul.f32 %v2904_v43, %v2886_v0  ;;  %v2999_v34 = vrot.slane %v2979_v58, 1 }
0x1632   :  { %v2973_v45 = vadd.f32 %v2965_v20, %v2926_v11 }
0x1633   :  { %v2908_v5 = vpop.permute.xlu1 %2907 }
0x1634   :  { %v2928_v14 = vmul.f32 %v2908_v5, %v2888_v7  ;;  %v2988_v59 = vrot.slane %v2973_v45, 7 }
0x1636   :  { %v2975_v21 = vadd.f32 %v2967_v17, %v2928_v14  ;;  %v2990_v46 = vsel %vm523_vm2, %v2989_v36, %v2988_v59  ;;  %vm3007_vm2 = vcmask 261127   ;;  %v3150_v17 = vld [vmem:[%s4877_s5] ss:$0 sm:$0xff] }
0x1637   :  { %v2910_v12 = vpop.permute.xlu1 %2909 }
0x1638   :  { %v2929_v24 = vmul.f32 %v2910_v12, %v2889_v2  ;;  %v2991_v27 = vrot.slane %v2975_v21, 5 }
0x163a   :  { %v2976_v63 = vadd.f32 %v2968_v35, %v2929_v24  ;;  %v2992_v4 = vsel %vm526_vm3, %v2991_v27, %v2990_v46  ;;  %vm3009_vm3 = vcmask 260096   ;;  %v3151_v35 = vld [vmem:[%s4878_s6] ss:$0 sm:$0xff] }
0x163b   :  { %v2912_v55 = vpop.permute.xlu1 %2911 }
0x163c   :  { %v2930_v48 = vmul.f32 %v2912_v55, %v2890_v22  ;;  %v2993_v52 = vrot.slane %v2976_v63, 4 }
0x163e   :  { %v2977_v62 = vadd.f32 %v2969_v23, %v2930_v48  ;;  %v2994_v37 = vsel %vm529_vm4, %v2993_v52, %v2992_v4 }
0x163f   :  { %v2914_v15 = vpop.permute.xlu1 %2913 }
0x1640   :  { %v2931_v42 = vmul.f32 %v2914_v15, %v2891_v13  ;;  %v2995_v16 = vrot.slane %v2977_v62, 3 }
0x1642   :  { %v2978_v53 = vadd.f32 %v2970_v56, %v2931_v42  ;;  %v2996_v8 = vsel %vm532_vm5, %v2995_v16, %v2994_v37 }
0x1643   :  { %v2902_v44 = vpop.permute.xlu1 %2901 }
0x1644   :  { %v2997_v49 = vrot.slane %v2978_v53, 2  ;;  %v2925_v28 = vmul.f32 %v2902_v44, %v2885_v60 }
0x1646   :  { %v2972_v51 = vadd.f32 %v2964_v19, %v2925_v28  ;;  %v2998_v47 = vsel %vm535_vm6, %v2997_v49, %v2996_v8 }
0x1647   :  { %v3000_v38 = vsel %vm538_vm7, %v2999_v34, %v2998_v47 }
0x1648   :  { %3003 = vrot.lane.b32.xlu0 %v3000_v38, %s3792_s12  ;;  %3001 = vrot.lane.b32.xlu1 %v2972_v51, %s3792_s12 }
0x16ba   :  { %v3002_v54 = vpop.permute.xlu1 %3001  ;;  %v3004_v32 = vpop.permute.xlu0 %3003 }
0x16bb   :  { %3008 = vst.msk [vmem:[#allocation2 - $0x7] sm:$0x80] %vm3007_vm2, %v3002_v54 }
0x16bc   :  { %3010 = vst.msk [vmem:[#allocation2 + $0x1] sm:$0x7f] %vm3009_vm3, %v3004_v32 }
0x16c3   :  { %v3014_v18 = vld [vmem:[#allocation2] sm:$0xff] }
0x16c4   :  { %v3015_v57 = vsel %vm31_vm0, %v3014_v18, 0.0 }
0x16c5   :  { %v3016_v61 = vrot.slane %v3015_v57, 4 }
0x16c7   :  { %v3017_v29 = vadd.f32 %v3016_v61, %v3015_v57 }
0x16c9   :  { %v3018_v41 = vrot.slane %v3017_v29, 2 }
0x16cb   :  { %v3019_v39 = vadd.f32 %v3018_v41, %v3017_v29 }
0x16cd   :  { %v3020_v10 = vrot.slane %v3019_v39, 1 }
0x16cf   :  { %v3021_v43 = vadd.f32 %v3020_v10, %v3019_v39 }
0x16d1   :  { %v3023_v40 = vmul.f32 0.125, %v3021_v43 }
0x16d3   :  { %v3024_v5 = vsub.f32 %v3014_v18, %v3023_v40 }
0x16d5   :  { %v3025_v0 = vmul.f32 %v3024_v5, %v3024_v5 }
0x16d7   :  { %v3026_v9 = vsel %vm31_vm0, %v3025_v0, 0.0 }
0x16d8   :  { %v3027_v7 = vrot.slane %v3026_v9, 4 }
0x16da   :  { %v3028_v50 = vadd.f32 %v3027_v7, %v3026_v9 }
0x16dc   :  { %v3029_v11 = vrot.slane %v3028_v50, 2 }
0x16de   :  { %v3030_v2 = vadd.f32 %v3029_v11, %v3028_v50 }
0x16e0   :  { %v3031_v14 = vrot.slane %v3030_v2, 1 }
0x16e2   :  { %v3032_v12 = vadd.f32 %v3031_v14, %v3030_v2 }
0x16e4   :  { %v3033_v20 = vmul.f32 0.125, %v3032_v12 }
0x16e6   :  { %v3034_v3 = vadd.f32 1e-05, %v3033_v20 }
0x16e8   :  { %3759 = vrsqrt.f32 %v3034_v3 }
0x16f2   :  { %v3760_v24 = vpop.eup %3759 }
0x16f3   :  { %v3036_v33 = vmul.f32 %v3760_v24, %v3024_v5 }
0x16f5   :  { %v3044_v45 = vmul.f32 %v3150_v17, %v3036_v33 }
0x16f7   :  { %v3052_v22 = vadd.f32 %v3151_v35, %v3044_v45 }
0x16f9   :  { %3053 = vst.msk [vmem:[#allocation3] sm:$0xff] %vm31_vm0, %v3052_v22 }
0x16fa   :  { %3774 = shalt.err (!%p3771_p4)
}
0x16fb   :  { %s3775_s22 = scalar_lea.hbm %s4879_s7, 128 }
0x16fc   :  { %p3776_p5 = scmp.ne.s32.totalorder %s4879_s7, %s3775_s22  ;;  %p3779_p6 = scmp.lt.u32.totalorder %s3775_s22, %s4879_s7 }
0x16fe   :  { %p3781_p7 = pnand %p3779_p6, %p3776_p5 }
0x1700   :  { %3784 = shalt.err (!%p3781_p7)
}
0x1701   :  { %3063 = dma.vmem_to_hbm [thread:$0]  %s3061_s19, 128, %s4879_s7, [#allocation4]  }
0x1702   :  { %3785 = dma.done.wait [#allocation4], 128  }
0x1703   :  { %3786 = vsyncadd [#allocation4], 4294967168 }
0x1704   :  { %3067 = vsyncpa [#allocation4], 1 }

</bundles_post_ra>
